<compile_context>
chip_gen: v6e
topology: v6e:2x2x1
jax: 0.10.0
libtpu: 0.0.40
codegen_flags: <defaults>
</compile_context>

<pallas_src>
import functools
import math

import jax
import jax.numpy as jnp
from jax.experimental import pallas as pl
from jax.experimental.pallas import tpu as pltpu


# ----------------------------------------------------------------------------
# Fully fused HGT_NC forward kernel (grid=(1,), everything VMEM resident).
# ----------------------------------------------------------------------------
def _hgt_nc_fused_kernel(*refs, n_types, n_etypes, n_layers, n_heads, d_k,
                         hidden, etype_pairs):
    feats = refs[:n_types]
    biases = refs[n_types:n_types + n_etypes]
    base = n_types + n_etypes
    (adapt_w, adapt_b, kqv_w, kqv_b, a_w, a_b, ln_w, ln_b,
     skip, out_w, out_b) = refs[base:base + 11]
    out_refs = refs[base + 11:]

    # 1) adapt_ws + tanh
    h = []
    for t in range(n_types):
        y = jnp.dot(feats[t][...], adapt_w[t],
                    preferred_element_type=jnp.float32) + adapt_b[t]
        h.append(jnp.tanh(y))

    # 2) HGT layers (fully unrolled; all intermediates are VMEM/vreg values)
    for l in range(n_layers):
        # fused K/Q/V projection (relations already folded into K'/V' columns)
        q, k, v = [], [], []
        for t in range(n_types):
            y = jnp.dot(h[t], kqv_w[l, t],
                        preferred_element_type=jnp.float32) + kqv_b[l, t]
            q.append(y[:, 0 * hidden:1 * hidden])
            k.append(y[:, 1 * hidden:2 * hidden])
            v.append(y[:, 2 * hidden:3 * hidden])

        trans_acc = [None] * n_types
        n_in = [0] * n_types
        for e, (s, d) in enumerate(etype_pairs):
            bias = biases[e][...]          # (Nd, Ns): 0 on edges, -1e30 elsewhere
            aw_d = a_w[l, d]               # (hidden, hidden)
            # per-head scores (MXU) -> one batched masked softmax over all heads
            scores = []
            for hh in range(n_heads):
                qh = q[d][:, hh * d_k:(hh + 1) * d_k]
                kh = k[s][:, hh * d_k:(hh + 1) * d_k]
                sc = jax.lax.dot_general(qh, kh, (((1,), (1,)), ((), ())),
                                         preferred_element_type=jnp.float32)
                scores.append(sc + bias)
            s3 = jnp.stack(scores, axis=0)                   # (H, Nd, Ns)
            m = jnp.max(s3, axis=-1, keepdims=True)
            ex = jnp.exp(s3 - m)
            att = ex / jnp.sum(ex, axis=-1, keepdims=True)   # (H, Nd, Ns)
            # message aggregation; head outputs folded directly into a_linear:
            #   t @ W_a == sum_h (att_h @ v_h) @ W_a[h*d_k:(h+1)*d_k, :]
            part = None
            for hh in range(n_heads):
                msg = jnp.dot(att[hh], v[s][:, hh * d_k:(hh + 1) * d_k],
                              preferred_element_type=jnp.float32)      # (Nd, dk)
                contrib = jnp.dot(msg, aw_d[hh * d_k:(hh + 1) * d_k, :],
                                  preferred_element_type=jnp.float32)  # (Nd, hid)
                part = contrib if part is None else part + contrib
            trans_acc[d] = part if trans_acc[d] is None else trans_acc[d] + part
            n_in[d] += 1

        # cross_reducer='mean' + a_linear bias + sigmoid-gated skip + LayerNorm
        new_h = []
        for t in range(n_types):
            trans = trans_acc[t] * jnp.float32(1.0 / n_in[t]) + a_b[l, t]
            alpha = jax.nn.sigmoid(skip[l:l + 1, t:t + 1])   # (1, 1)
            x = trans * alpha + h[t] * (1.0 - alpha)
            mean = jnp.mean(x, axis=-1, keepdims=True)
            var = jnp.mean(jnp.square(x - mean), axis=-1, keepdims=True)
            y = (x - mean) * jax.lax.rsqrt(var + 1e-5)
            new_h.append(y * ln_w[l, t] + ln_b[l, t])
            # TODO(synk): nn.Dropout(0.2) is an identity in eval/inference mode.
        h = new_h

    # 3) shared output projection per node type
    for t in range(n_types):
        out_refs[t][...] = jnp.dot(h[t], out_w[...],
                                   preferred_element_type=jnp.float32) + out_b[...]


def _full_spec(arr):
    nd = arr.ndim
    return pl.BlockSpec(arr.shape, lambda i, _n=nd: (0,) * _n)


# ----------------------------------------------------------------------------
# Wrapper: weight folding / stacking + single pallas_call
# ----------------------------------------------------------------------------
def hgt_nc_forward(params, graph, features):
    node_dict = graph["node_dict"]
    edge_dict = graph["edge_dict"]
    canonical = graph["canonical_etypes"]
    node_types = sorted(node_dict, key=node_dict.get)
    n_types, n_etypes = len(node_types), len(canonical)
    n_heads, d_k = params["n_heads"], params["d_k"]
    hidden, out_dim = params["hidden_dim"], params["out_dim"]
    n_layers = len(params["layers"])
    sqrt_dk = math.sqrt(d_k)

    etype_pairs = tuple((node_dict[s], node_dict[d]) for (s, _, d) in canonical)
    # additive softmax mask: 0 on existing edges, -1e30 elsewhere
    biases = [jnp.where(graph["masks"][e] > 0, 0.0, -1e30).astype(jnp.float32)
              for (_, e, _) in canonical]

    # rel_att/rel_msg/pri fold assumes each node type has exactly one outgoing
    # relation (true for this synthetic graph).
    out_rel = {}
    for (s, e, _) in canonical:
        sid = node_dict[s]
        assert sid not in out_rel, "fold assumes one outgoing relation per type"
        out_rel[sid] = edge_dict[e]

    adapt_w = jnp.stack(params["adapt_w"])                          # (T, in, hid)
    adapt_b = jnp.stack([b.reshape(1, hidden) for b in params["adapt_b"]])

    kqv_w_l, kqv_b_l = [], []
    a_w_l, a_b_l, ln_w_l, ln_b_l, skip_l = [], [], [], [], []
    for lp in params["layers"]:
        kqv_w_t, kqv_b_t = [], []
        for t in range(n_types):
            r = out_rel[t]
            att, msg = lp["rel_att"][r], lp["rel_msg"][r]           # (H, dk, dk)
            pri = lp["rel_pri"][r] / sqrt_dk                        # (H,)
            wk = lp["k_w"][t].reshape(hidden, n_heads, d_k)
            wk = jnp.einsum("ihd,hde->ihe", wk, att) * pri[None, :, None]
            bk = jnp.einsum("hd,hde->he",
                            lp["k_b"][t].reshape(n_heads, d_k), att) * pri[:, None]
            wv = jnp.einsum("ihd,hde->ihe",
                            lp["v_w"][t].reshape(hidden, n_heads, d_k), msg)
            bv = jnp.einsum("hd,hde->he", lp["v_b"][t].reshape(n_heads, d_k), msg)
            kqv_w_t.append(jnp.concatenate(
                [lp["q_w"][t], wk.reshape(hidden, hidden),
                 wv.reshape(hidden, hidden)], axis=1))              # (hid, 3*hid)
            kqv_b_t.append(jnp.concatenate(
                [lp["q_b"][t], bk.reshape(hidden), bv.reshape(hidden)]
            ).reshape(1, 3 * hidden))
        kqv_w_l.append(jnp.stack(kqv_w_t))
        kqv_b_l.append(jnp.stack(kqv_b_t))
        a_w_l.append(jnp.stack(lp["a_w"]))
        a_b_l.append(jnp.stack([b.reshape(1, hidden) for b in lp["a_b"]]))
        ln_w_l.append(jnp.stack([w.reshape(1, hidden) for w in lp["ln_w"]]))
        ln_b_l.append(jnp.stack([b.reshape(1, hidden) for b in lp["ln_b"]]))
        skip_l.append(lp["skip"])

    operands = (
        *[features[nt] for nt in node_types],
        *biases,
        adapt_w, adapt_b,
        jnp.stack(kqv_w_l), jnp.stack(kqv_b_l),                     # (L,T,...)
        jnp.stack(a_w_l), jnp.stack(a_b_l),
        jnp.stack(ln_w_l), jnp.stack(ln_b_l),
        jnp.stack(skip_l),                                          # (L, T)
        params["out_w"], params["out_b"].reshape(1, out_dim),
    )
    out_shape = tuple(
        jax.ShapeDtypeStruct((features[nt].shape[0], out_dim), jnp.float32)
        for nt in node_types)
    out_specs = tuple(
        pl.BlockSpec((features[nt].shape[0], out_dim), lambda i: (0, 0))
        for nt in node_types)

    kernel = functools.partial(
        _hgt_nc_fused_kernel, n_types=n_types, n_etypes=n_etypes,
        n_layers=n_layers, n_heads=n_heads, d_k=d_k, hidden=hidden,
        etype_pairs=etype_pairs)

    outs = pl.pallas_call(
        kernel,
        out_shape=out_shape,
        grid=(1,),
        in_specs=[_full_spec(x) for x in operands],
        out_specs=out_specs,
        compiler_params=pltpu.CompilerParams(
            dimension_semantics=("arbitrary",)),
    )(*operands)
    # TODO(synk): torch forward also writes g.nodes[ntype].data['w']=fc(feature);
    # it has no consumer in forward() (dead work), so it is omitted here.
    return {nt: o for nt, o in zip(node_types, outs)}


# ----------------------------------------------------------------------------
# Pure-JAX reference (mirrors the torch module directly, no folding)
# ----------------------------------------------------------------------------
def _reference_forward(params, graph, features):
    node_dict, edge_dict = graph["node_dict"], graph["edge_dict"]
    H, dk, hid = params["n_heads"], params["d_k"], params["hidden_dim"]
    sqrt_dk = math.sqrt(dk)
    h = {nt: jnp.tanh(features[nt] @ params["adapt_w"][i] + params["adapt_b"][i])
         for nt, i in node_dict.items()}
    for lp in params["layers"]:
        k = {nt: (h[nt] @ lp["k_w"][i] + lp["k_b"][i]).reshape(-1, H, dk)
             for nt, i in node_dict.items()}
        q = {nt: (h[nt] @ lp["q_w"][i] + lp["q_b"][i]).reshape(-1, H, dk)
             for nt, i in node_dict.items()}
        v = {nt: (h[nt] @ lp["v_w"][i] + lp["v_b"][i]).reshape(-1, H, dk)
             for nt, i in node_dict.items()}
        t_acc = {nt: [] for nt in node_dict}
        for (s, e, d) in graph["canonical_etypes"]:
            r = edge_dict[e]
            mask = graph["masks"][e]
            key = jnp.einsum("nhd,hde->nhe", k[s], lp["rel_att"][r])
            val = jnp.einsum("nhd,hde->nhe", v[s], lp["rel_msg"][r])
            score = jnp.einsum("mhd,nhd->hmn", q[d], key) \
                * (lp["rel_pri"][r] / sqrt_dk)[:, None, None]
            score = jnp.where(mask[None] > 0, score, -jnp.inf)
            a = jax.nn.softmax(score, axis=-1)
            t_acc[d].append(jnp.einsum("hmn,nhe->mhe", a, val).reshape(-1, hid))
        new_h = {}
        for nt, i in node_dict.items():
            t = sum(t_acc[nt]) / len(t_acc[nt])
            alpha = jax.nn.sigmoid(lp["skip"][i])
            x = (t @ lp["a_w"][i] + lp["a_b"][i]) * alpha + h[nt] * (1 - alpha)
            mu = x.mean(-1, keepdims=True)
            var = jnp.square(x - mu).mean(-1, keepdims=True)
            new_h[nt] = (x - mu) * jax.lax.rsqrt(var + 1e-5) * lp["ln_w"][i] \
                + lp["ln_b"][i]
        h = new_h
    return {nt: h[nt] @ params["out_w"] + params["out_b"] for nt in node_dict}


# ----------------------------------------------------------------------------
# Deterministic parameter / graph construction
# ----------------------------------------------------------------------------
def _xavier(key, shape):
    fan_in, fan_out = shape[-2], shape[-1]
    lim = math.sqrt(6.0 / (fan_in + fan_out))
    return jax.random.uniform(key, shape, minval=-lim, maxval=lim,
                              dtype=jnp.float32)


def init_params(key, in_dim, hidden_dim, out_dim, n_layers, n_heads,
                num_types, num_relations):
    d_k = hidden_dim // n_heads
    keys = iter(jax.random.split(key, 4096))
    nxt = lambda: next(keys)
    params = {"n_heads": n_heads, "d_k": d_k,
              "hidden_dim": hidden_dim, "out_dim": out_dim}
    params["adapt_w"] = [_xavier(nxt(), (in_dim, hidden_dim))
                         for _ in range(num_types)]
    params["adapt_b"] = [jnp.zeros((hidden_dim,), jnp.float32)
                         for _ in range(num_types)]
    layers = []
    for _ in range(n_layers):
        lp = {}
        for name in ("k", "q", "v", "a"):
            lp[name + "_w"] = [_xavier(nxt(), (hidden_dim, hidden_dim))
                               for _ in range(num_types)]
            lp[name + "_b"] = [jnp.zeros((hidden_dim,), jnp.float32)
                               for _ in range(num_types)]
        lp["ln_w"] = [jnp.ones((hidden_dim,), jnp.float32)
                      for _ in range(num_types)]
        lp["ln_b"] = [jnp.zeros((hidden_dim,), jnp.float32)
                      for _ in range(num_types)]
        lp["rel_pri"] = [jnp.ones((n_heads,), jnp.float32)
                         for _ in range(num_relations)]
        lp["rel_att"] = [_xavier(nxt(), (n_heads, d_k, d_k))
                         for _ in range(num_relations)]
        lp["rel_msg"] = [_xavier(nxt(), (n_heads, d_k, d_k))
                         for _ in range(num_relations)]
        lp["skip"] = jnp.ones((num_types,), jnp.float32)
        layers.append(lp)
    params["layers"] = layers
    params["out_w"] = _xavier(nxt(), (hidden_dim, out_dim))
    params["out_b"] = jnp.zeros((out_dim,), jnp.float32)
    return params


def make_mask(n_dst, n_src, key):
    m = (jax.random.uniform(key, (n_dst, n_src)) < 0.4).astype(jnp.float32)
    # guarantee every destination node has >= 1 incoming edge
    idx = jnp.arange(n_dst) % n_src
    m = m.at[jnp.arange(n_dst), idx].set(1.0)
    return m


if __name__ == "__main__":
    in_dim, hidden_dim, out_dim = 16, 32, 8
    n_layers, n_heads = 2, 4
    n_paper, n_author = 12, 8

    node_dict = {"paper": 0, "author": 1}
    edge_dict = {"writes": 0, "written_by": 1}
    canonical_etypes = [("author", "writes", "paper"),
                        ("paper", "written_by", "author")]

    key = jax.random.PRNGKey(0)
    k_feat, k_m1, k_m2, k_param = jax.random.split(key, 4)
    masks = {"writes": make_mask(n_paper, n_author, k_m1),
             "written_by": make_mask(n_author, n_paper, k_m2)}
    graph = {"node_dict": node_dict, "edge_dict": edge_dict,
             "canonical_etypes": canonical_etypes, "masks": masks}

    k_fp, k_fa = jax.random.split(k_feat)
    features = {
        "paper": jax.random.normal(k_fp, (n_paper, in_dim), jnp.float32),
        "author": jax.random.normal(k_fa, (n_author, in_dim), jnp.float32),
    }

    params = init_params(k_param, in_dim, hidden_dim, out_dim, n_layers,
                         n_heads, num_types=len(node_dict),
                         num_relations=len(edge_dict))

    out = hgt_nc_forward(params, graph, features)
    for arr in out.values():
        jax.block_until_ready(arr)

    ref = _reference_forward(params, graph, features)
    for nt in out:
        if not jnp.allclose(out[nt], ref[nt], rtol=1e-3, atol=1e-3):
            err = float(jnp.max(jnp.abs(out[nt] - ref[nt])))
            raise AssertionError(f"mismatch for '{nt}': max_abs_err={err}")

    print("KERNEL_OK")
</pallas_src>

<mosaic_0001>
module attributes {stable_mosaic.version = 11 : i64} {
  func.func @_hgt_nc_fused_kernel(%arg0: i32, %arg1: memref<12x16xf32, #tpu.memory_space<vmem>>, %arg2: memref<8x16xf32, #tpu.memory_space<vmem>>, %arg3: memref<12x8xf32, #tpu.memory_space<vmem>>, %arg4: memref<8x12xf32, #tpu.memory_space<vmem>>, %arg5: memref<2x16x32xf32, #tpu.memory_space<vmem>>, %arg6: memref<2x1x32xf32, #tpu.memory_space<vmem>>, %arg7: memref<2x2x32x96xf32, #tpu.memory_space<vmem>>, %arg8: memref<2x2x1x96xf32, #tpu.memory_space<vmem>>, %arg9: memref<2x2x32x32xf32, #tpu.memory_space<vmem>>, %arg10: memref<2x2x1x32xf32, #tpu.memory_space<vmem>>, %arg11: memref<2x2x1x32xf32, #tpu.memory_space<vmem>>, %arg12: memref<2x2x1x32xf32, #tpu.memory_space<vmem>>, %arg13: memref<2x2xf32, #tpu.memory_space<vmem>>, %arg14: memref<32x8xf32, #tpu.memory_space<vmem>>, %arg15: memref<1x8xf32, #tpu.memory_space<vmem>>, %arg16: memref<12x8xf32, #tpu.memory_space<vmem>>, %arg17: memref<8x8xf32, #tpu.memory_space<vmem>>) attributes {dimension_semantics = [#tpu.dimension_semantics<arbitrary>], iteration_bounds = array<i64: 1>, scalar_prefetch = 0 : i64, scratch_operands = 0 : i64, tpu.core_type = #tpu.core_type<tc>, window_params = [{pipeline_mode = #tpu.pipeline_mode<synchronous>, transform_indices = @transform_0, window_bounds = array<i64: 12, 16>}, {pipeline_mode = #tpu.pipeline_mode<synchronous>, transform_indices = @transform_1, window_bounds = array<i64: 8, 16>}, {pipeline_mode = #tpu.pipeline_mode<synchronous>, transform_indices = @transform_2, window_bounds = array<i64: 12, 8>}, {pipeline_mode = #tpu.pipeline_mode<synchronous>, transform_indices = @transform_3, window_bounds = array<i64: 8, 12>}, {pipeline_mode = #tpu.pipeline_mode<synchronous>, transform_indices = @transform_4, window_bounds = array<i64: 2, 16, 32>}, {pipeline_mode = #tpu.pipeline_mode<synchronous>, transform_indices = @transform_5, window_bounds = array<i64: 2, 1, 32>}, {pipeline_mode = #tpu.pipeline_mode<synchronous>, transform_indices = @transform_6, window_bounds = array<i64: 2, 2, 32, 96>}, {pipeline_mode = #tpu.pipeline_mode<synchronous>, transform_indices = @transform_7, window_bounds = array<i64: 2, 2, 1, 96>}, {pipeline_mode = #tpu.pipeline_mode<synchronous>, transform_indices = @transform_8, window_bounds = array<i64: 2, 2, 32, 32>}, {pipeline_mode = #tpu.pipeline_mode<synchronous>, transform_indices = @transform_9, window_bounds = array<i64: 2, 2, 1, 32>}, {pipeline_mode = #tpu.pipeline_mode<synchronous>, transform_indices = @transform_10, window_bounds = array<i64: 2, 2, 1, 32>}, {pipeline_mode = #tpu.pipeline_mode<synchronous>, transform_indices = @transform_11, window_bounds = array<i64: 2, 2, 1, 32>}, {pipeline_mode = #tpu.pipeline_mode<synchronous>, transform_indices = @transform_12, window_bounds = array<i64: 2, 2>}, {pipeline_mode = #tpu.pipeline_mode<synchronous>, transform_indices = @transform_13, window_bounds = array<i64: 32, 8>}, {pipeline_mode = #tpu.pipeline_mode<synchronous>, transform_indices = @transform_14, window_bounds = array<i64: 1, 8>}, {pipeline_mode = #tpu.pipeline_mode<synchronous>, transform_indices = @transform_15, window_bounds = array<i64: 12, 8>}, {pipeline_mode = #tpu.pipeline_mode<synchronous>, transform_indices = @transform_16, window_bounds = array<i64: 8, 8>}]} {
    %c0 = arith.constant 0 : index
    %c0_0 = arith.constant 0 : index
    %0 = vector.load %arg1[%c0, %c0_0] : memref<12x16xf32, #tpu.memory_space<vmem>>, vector<12x16xf32>
    %c0_1 = arith.constant 0 : index
    %c0_2 = arith.constant 0 : index
    %c0_3 = arith.constant 0 : index
    %1 = vector.load %arg5[%c0_1, %c0_2, %c0_3] : memref<2x16x32xf32, #tpu.memory_space<vmem>>, vector<1x16x32xf32>
    %2 = vector.shape_cast %1 : vector<1x16x32xf32> to vector<16x32xf32>
    %cst = arith.constant dense<0.000000e+00> : vector<12x32xf32>
    %3 = tpu.matmul %0, %2, %cst {dimension_numbers = #tpu.dot_dimension_numbers<[1], [0], [0], [1], [0, 0, 1, 1], [], []>} : vector<12x16xf32>, vector<16x32xf32>, vector<12x32xf32> -> vector<12x32xf32>
    %c0_4 = arith.constant 0 : index
    %c0_5 = arith.constant 0 : index
    %c0_6 = arith.constant 0 : index
    %4 = vector.load %arg6[%c0_4, %c0_5, %c0_6] : memref<2x1x32xf32, #tpu.memory_space<vmem>>, vector<1x1x32xf32>
    %5 = vector.shape_cast %4 : vector<1x1x32xf32> to vector<1x32xf32>
    %6 = vector.broadcast %5 : vector<1x32xf32> to vector<12x32xf32>
    %7 = arith.addf %3, %6 : vector<12x32xf32>
    %8 = math.tanh %7 : vector<12x32xf32>
    %c0_7 = arith.constant 0 : index
    %c0_8 = arith.constant 0 : index
    %9 = vector.load %arg2[%c0_7, %c0_8] : memref<8x16xf32, #tpu.memory_space<vmem>>, vector<8x16xf32>
    %c1 = arith.constant 1 : index
    %c0_9 = arith.constant 0 : index
    %c0_10 = arith.constant 0 : index
    %10 = vector.load %arg5[%c1, %c0_9, %c0_10] : memref<2x16x32xf32, #tpu.memory_space<vmem>>, vector<1x16x32xf32>
    %11 = vector.shape_cast %10 : vector<1x16x32xf32> to vector<16x32xf32>
    %cst_11 = arith.constant dense<0.000000e+00> : vector<8x32xf32>
    %12 = tpu.matmul %9, %11, %cst_11 {dimension_numbers = #tpu.dot_dimension_numbers<[1], [0], [0], [1], [0, 0, 1, 1], [], []>} : vector<8x16xf32>, vector<16x32xf32>, vector<8x32xf32> -> vector<8x32xf32>
    %c1_12 = arith.constant 1 : index
    %c0_13 = arith.constant 0 : index
    %c0_14 = arith.constant 0 : index
    %13 = vector.load %arg6[%c1_12, %c0_13, %c0_14] : memref<2x1x32xf32, #tpu.memory_space<vmem>>, vector<1x1x32xf32>
    %14 = vector.shape_cast %13 : vector<1x1x32xf32> to vector<1x32xf32>
    %15 = vector.broadcast %14 : vector<1x32xf32> to vector<8x32xf32>
    %16 = arith.addf %12, %15 : vector<8x32xf32>
    %17 = math.tanh %16 : vector<8x32xf32>
    %c0_15 = arith.constant 0 : index
    %c0_16 = arith.constant 0 : index
    %c0_17 = arith.constant 0 : index
    %c0_18 = arith.constant 0 : index
    %18 = vector.load %arg7[%c0_15, %c0_16, %c0_17, %c0_18] : memref<2x2x32x96xf32, #tpu.memory_space<vmem>>, vector<1x1x32x96xf32>
    %19 = vector.shape_cast %18 : vector<1x1x32x96xf32> to vector<32x96xf32>
    %cst_19 = arith.constant dense<0.000000e+00> : vector<12x96xf32>
    %20 = tpu.matmul %8, %19, %cst_19 {dimension_numbers = #tpu.dot_dimension_numbers<[1], [0], [0], [1], [0, 0, 1, 1], [], []>} : vector<12x32xf32>, vector<32x96xf32>, vector<12x96xf32> -> vector<12x96xf32>
    %c0_20 = arith.constant 0 : index
    %c0_21 = arith.constant 0 : index
    %c0_22 = arith.constant 0 : index
    %c0_23 = arith.constant 0 : index
    %21 = vector.load %arg8[%c0_20, %c0_21, %c0_22, %c0_23] : memref<2x2x1x96xf32, #tpu.memory_space<vmem>>, vector<1x1x1x96xf32>
    %22 = vector.shape_cast %21 : vector<1x1x1x96xf32> to vector<1x96xf32>
    %23 = vector.broadcast %22 : vector<1x96xf32> to vector<12x96xf32>
    %24 = arith.addf %20, %23 : vector<12x96xf32>
    %25 = vector.extract_strided_slice %24 {offsets = [0, 0], sizes = [12, 32], strides = [1, 1]} : vector<12x96xf32> to vector<12x32xf32>
    %26 = vector.extract_strided_slice %24 {offsets = [0, 32], sizes = [12, 32], strides = [1, 1]} : vector<12x96xf32> to vector<12x32xf32>
    %27 = vector.extract_strided_slice %24 {offsets = [0, 64], sizes = [12, 32], strides = [1, 1]} : vector<12x96xf32> to vector<12x32xf32>
    %c0_24 = arith.constant 0 : index
    %c1_25 = arith.constant 1 : index
    %c0_26 = arith.constant 0 : index
    %c0_27 = arith.constant 0 : index
    %28 = vector.load %arg7[%c0_24, %c1_25, %c0_26, %c0_27] : memref<2x2x32x96xf32, #tpu.memory_space<vmem>>, vector<1x1x32x96xf32>
    %29 = vector.shape_cast %28 : vector<1x1x32x96xf32> to vector<32x96xf32>
    %cst_28 = arith.constant dense<0.000000e+00> : vector<8x96xf32>
    %30 = tpu.matmul %17, %29, %cst_28 {dimension_numbers = #tpu.dot_dimension_numbers<[1], [0], [0], [1], [0, 0, 1, 1], [], []>} : vector<8x32xf32>, vector<32x96xf32>, vector<8x96xf32> -> vector<8x96xf32>
    %c0_29 = arith.constant 0 : index
    %c1_30 = arith.constant 1 : index
    %c0_31 = arith.constant 0 : index
    %c0_32 = arith.constant 0 : index
    %31 = vector.load %arg8[%c0_29, %c1_30, %c0_31, %c0_32] : memref<2x2x1x96xf32, #tpu.memory_space<vmem>>, vector<1x1x1x96xf32>
    %32 = vector.shape_cast %31 : vector<1x1x1x96xf32> to vector<1x96xf32>
    %33 = vector.broadcast %32 : vector<1x96xf32> to vector<8x96xf32>
    %34 = arith.addf %30, %33 : vector<8x96xf32>
    %35 = vector.extract_strided_slice %34 {offsets = [0, 0], sizes = [8, 32], strides = [1, 1]} : vector<8x96xf32> to vector<8x32xf32>
    %36 = vector.extract_strided_slice %34 {offsets = [0, 32], sizes = [8, 32], strides = [1, 1]} : vector<8x96xf32> to vector<8x32xf32>
    %37 = vector.extract_strided_slice %34 {offsets = [0, 64], sizes = [8, 32], strides = [1, 1]} : vector<8x96xf32> to vector<8x32xf32>
    %c0_33 = arith.constant 0 : index
    %c0_34 = arith.constant 0 : index
    %38 = vector.load %arg3[%c0_33, %c0_34] : memref<12x8xf32, #tpu.memory_space<vmem>>, vector<12x8xf32>
    %c0_35 = arith.constant 0 : index
    %c0_36 = arith.constant 0 : index
    %c0_37 = arith.constant 0 : index
    %c0_38 = arith.constant 0 : index
    %39 = vector.load %arg9[%c0_35, %c0_36, %c0_37, %c0_38] : memref<2x2x32x32xf32, #tpu.memory_space<vmem>>, vector<1x1x32x32xf32>
    %40 = vector.shape_cast %39 : vector<1x1x32x32xf32> to vector<32x32xf32>
    %41 = vector.extract_strided_slice %25 {offsets = [0, 0], sizes = [12, 8], strides = [1, 1]} : vector<12x32xf32> to vector<12x8xf32>
    %42 = vector.extract_strided_slice %36 {offsets = [0, 0], sizes = [8, 8], strides = [1, 1]} : vector<8x32xf32> to vector<8x8xf32>
    %cst_39 = arith.constant dense<0.000000e+00> : vector<12x8xf32>
    %43 = tpu.matmul %41, %42, %cst_39 {dimension_numbers = #tpu.dot_dimension_numbers<[1], [1], [0], [0], [0, 0, 1, 0], [], []>} : vector<12x8xf32>, vector<8x8xf32>, vector<12x8xf32> -> vector<12x8xf32>
    %44 = arith.addf %43, %38 : vector<12x8xf32>
    %45 = vector.extract_strided_slice %25 {offsets = [0, 8], sizes = [12, 8], strides = [1, 1]} : vector<12x32xf32> to vector<12x8xf32>
    %46 = vector.extract_strided_slice %36 {offsets = [0, 8], sizes = [8, 8], strides = [1, 1]} : vector<8x32xf32> to vector<8x8xf32>
    %cst_40 = arith.constant dense<0.000000e+00> : vector<12x8xf32>
    %47 = tpu.matmul %45, %46, %cst_40 {dimension_numbers = #tpu.dot_dimension_numbers<[1], [1], [0], [0], [0, 0, 1, 0], [], []>} : vector<12x8xf32>, vector<8x8xf32>, vector<12x8xf32> -> vector<12x8xf32>
    %48 = arith.addf %47, %38 : vector<12x8xf32>
    %49 = vector.extract_strided_slice %25 {offsets = [0, 16], sizes = [12, 8], strides = [1, 1]} : vector<12x32xf32> to vector<12x8xf32>
    %50 = vector.extract_strided_slice %36 {offsets = [0, 16], sizes = [8, 8], strides = [1, 1]} : vector<8x32xf32> to vector<8x8xf32>
    %cst_41 = arith.constant dense<0.000000e+00> : vector<12x8xf32>
    %51 = tpu.matmul %49, %50, %cst_41 {dimension_numbers = #tpu.dot_dimension_numbers<[1], [1], [0], [0], [0, 0, 1, 0], [], []>} : vector<12x8xf32>, vector<8x8xf32>, vector<12x8xf32> -> vector<12x8xf32>
    %52 = arith.addf %51, %38 : vector<12x8xf32>
    %53 = vector.extract_strided_slice %25 {offsets = [0, 24], sizes = [12, 8], strides = [1, 1]} : vector<12x32xf32> to vector<12x8xf32>
    %54 = vector.extract_strided_slice %36 {offsets = [0, 24], sizes = [8, 8], strides = [1, 1]} : vector<8x32xf32> to vector<8x8xf32>
    %cst_42 = arith.constant dense<0.000000e+00> : vector<12x8xf32>
    %55 = tpu.matmul %53, %54, %cst_42 {dimension_numbers = #tpu.dot_dimension_numbers<[1], [1], [0], [0], [0, 0, 1, 0], [], []>} : vector<12x8xf32>, vector<8x8xf32>, vector<12x8xf32> -> vector<12x8xf32>
    %56 = arith.addf %55, %38 : vector<12x8xf32>
    %57 = vector.shape_cast %44 : vector<12x8xf32> to vector<1x12x8xf32>
    %58 = vector.shape_cast %48 : vector<12x8xf32> to vector<1x12x8xf32>
    %59 = vector.shape_cast %52 : vector<12x8xf32> to vector<1x12x8xf32>
    %60 = vector.shape_cast %56 : vector<12x8xf32> to vector<1x12x8xf32>
    %61 = tpu.concatenate %57, %58, %59, %60 in 0 : vector<1x12x8xf32>, vector<1x12x8xf32>, vector<1x12x8xf32>, vector<1x12x8xf32> -> vector<4x12x8xf32>
    %cst_43 = arith.constant dense<0xFF800000> : vector<4x12xf32>
    %62 = vector.multi_reduction <maximumf>, %61, %cst_43 [2] : vector<4x12x8xf32> to vector<4x12xf32>
    %63 = vector.shape_cast %62 : vector<4x12xf32> to vector<4x12x1xf32>
    %64 = vector.broadcast %63 : vector<4x12x1xf32> to vector<4x12x8xf32>
    %65 = arith.subf %61, %64 : vector<4x12x8xf32>
    %66 = math.exp %65 : vector<4x12x8xf32>
    %cst_44 = arith.constant dense<0.000000e+00> : vector<4x12xf32>
    %67 = vector.multi_reduction <add>, %66, %cst_44 [2] : vector<4x12x8xf32> to vector<4x12xf32>
    %68 = vector.shape_cast %67 : vector<4x12xf32> to vector<4x12x1xf32>
    %69 = vector.broadcast %68 : vector<4x12x1xf32> to vector<4x12x8xf32>
    %70 = arith.divf %66, %69 : vector<4x12x8xf32>
    %71 = vector.extract_strided_slice %70 {offsets = [0, 0, 0], sizes = [1, 12, 8], strides = [1, 1, 1]} : vector<4x12x8xf32> to vector<1x12x8xf32>
    %72 = vector.shape_cast %71 : vector<1x12x8xf32> to vector<12x8xf32>
    %73 = vector.extract_strided_slice %37 {offsets = [0, 0], sizes = [8, 8], strides = [1, 1]} : vector<8x32xf32> to vector<8x8xf32>
    %cst_45 = arith.constant dense<0.000000e+00> : vector<12x8xf32>
    %74 = tpu.matmul %72, %73, %cst_45 {dimension_numbers = #tpu.dot_dimension_numbers<[1], [0], [0], [1], [0, 0, 1, 1], [], []>} : vector<12x8xf32>, vector<8x8xf32>, vector<12x8xf32> -> vector<12x8xf32>
    %75 = vector.extract_strided_slice %40 {offsets = [0, 0], sizes = [8, 32], strides = [1, 1]} : vector<32x32xf32> to vector<8x32xf32>
    %cst_46 = arith.constant dense<0.000000e+00> : vector<12x32xf32>
    %76 = tpu.matmul %74, %75, %cst_46 {dimension_numbers = #tpu.dot_dimension_numbers<[1], [0], [0], [1], [0, 0, 1, 1], [], []>} : vector<12x8xf32>, vector<8x32xf32>, vector<12x32xf32> -> vector<12x32xf32>
    %77 = vector.extract_strided_slice %70 {offsets = [1, 0, 0], sizes = [1, 12, 8], strides = [1, 1, 1]} : vector<4x12x8xf32> to vector<1x12x8xf32>
    %78 = vector.shape_cast %77 : vector<1x12x8xf32> to vector<12x8xf32>
    %79 = vector.extract_strided_slice %37 {offsets = [0, 8], sizes = [8, 8], strides = [1, 1]} : vector<8x32xf32> to vector<8x8xf32>
    %cst_47 = arith.constant dense<0.000000e+00> : vector<12x8xf32>
    %80 = tpu.matmul %78, %79, %cst_47 {dimension_numbers = #tpu.dot_dimension_numbers<[1], [0], [0], [1], [0, 0, 1, 1], [], []>} : vector<12x8xf32>, vector<8x8xf32>, vector<12x8xf32> -> vector<12x8xf32>
    %81 = vector.extract_strided_slice %40 {offsets = [8, 0], sizes = [8, 32], strides = [1, 1]} : vector<32x32xf32> to vector<8x32xf32>
    %cst_48 = arith.constant dense<0.000000e+00> : vector<12x32xf32>
    %82 = tpu.matmul %80, %81, %cst_48 {dimension_numbers = #tpu.dot_dimension_numbers<[1], [0], [0], [1], [0, 0, 1, 1], [], []>} : vector<12x8xf32>, vector<8x32xf32>, vector<12x32xf32> -> vector<12x32xf32>
    %83 = arith.addf %76, %82 : vector<12x32xf32>
    %84 = vector.extract_strided_slice %70 {offsets = [2, 0, 0], sizes = [1, 12, 8], strides = [1, 1, 1]} : vector<4x12x8xf32> to vector<1x12x8xf32>
    %85 = vector.shape_cast %84 : vector<1x12x8xf32> to vector<12x8xf32>
    %86 = vector.extract_strided_slice %37 {offsets = [0, 16], sizes = [8, 8], strides = [1, 1]} : vector<8x32xf32> to vector<8x8xf32>
    %cst_49 = arith.constant dense<0.000000e+00> : vector<12x8xf32>
    %87 = tpu.matmul %85, %86, %cst_49 {dimension_numbers = #tpu.dot_dimension_numbers<[1], [0], [0], [1], [0, 0, 1, 1], [], []>} : vector<12x8xf32>, vector<8x8xf32>, vector<12x8xf32> -> vector<12x8xf32>
    %88 = vector.extract_strided_slice %40 {offsets = [16, 0], sizes = [8, 32], strides = [1, 1]} : vector<32x32xf32> to vector<8x32xf32>
    %cst_50 = arith.constant dense<0.000000e+00> : vector<12x32xf32>
    %89 = tpu.matmul %87, %88, %cst_50 {dimension_numbers = #tpu.dot_dimension_numbers<[1], [0], [0], [1], [0, 0, 1, 1], [], []>} : vector<12x8xf32>, vector<8x32xf32>, vector<12x32xf32> -> vector<12x32xf32>
    %90 = arith.addf %83, %89 : vector<12x32xf32>
    %91 = vector.extract_strided_slice %70 {offsets = [3, 0, 0], sizes = [1, 12, 8], strides = [1, 1, 1]} : vector<4x12x8xf32> to vector<1x12x8xf32>
    %92 = vector.shape_cast %91 : vector<1x12x8xf32> to vector<12x8xf32>
    %93 = vector.extract_strided_slice %37 {offsets = [0, 24], sizes = [8, 8], strides = [1, 1]} : vector<8x32xf32> to vector<8x8xf32>
    %cst_51 = arith.constant dense<0.000000e+00> : vector<12x8xf32>
    %94 = tpu.matmul %92, %93, %cst_51 {dimension_numbers = #tpu.dot_dimension_numbers<[1], [0], [0], [1], [0, 0, 1, 1], [], []>} : vector<12x8xf32>, vector<8x8xf32>, vector<12x8xf32> -> vector<12x8xf32>
    %95 = vector.extract_strided_slice %40 {offsets = [24, 0], sizes = [8, 32], strides = [1, 1]} : vector<32x32xf32> to vector<8x32xf32>
    %cst_52 = arith.constant dense<0.000000e+00> : vector<12x32xf32>
    %96 = tpu.matmul %94, %95, %cst_52 {dimension_numbers = #tpu.dot_dimension_numbers<[1], [0], [0], [1], [0, 0, 1, 1], [], []>} : vector<12x8xf32>, vector<8x32xf32>, vector<12x32xf32> -> vector<12x32xf32>
    %97 = arith.addf %90, %96 : vector<12x32xf32>
    %c0_53 = arith.constant 0 : index
    %c0_54 = arith.constant 0 : index
    %98 = vector.load %arg4[%c0_53, %c0_54] : memref<8x12xf32, #tpu.memory_space<vmem>>, vector<8x12xf32>
    %c0_55 = arith.constant 0 : index
    %c1_56 = arith.constant 1 : index
    %c0_57 = arith.constant 0 : index
    %c0_58 = arith.constant 0 : index
    %99 = vector.load %arg9[%c0_55, %c1_56, %c0_57, %c0_58] : memref<2x2x32x32xf32, #tpu.memory_space<vmem>>, vector<1x1x32x32xf32>
    %100 = vector.shape_cast %99 : vector<1x1x32x32xf32> to vector<32x32xf32>
    %101 = vector.extract_strided_slice %35 {offsets = [0, 0], sizes = [8, 8], strides = [1, 1]} : vector<8x32xf32> to vector<8x8xf32>
    %102 = vector.extract_strided_slice %26 {offsets = [0, 0], sizes = [12, 8], strides = [1, 1]} : vector<12x32xf32> to vector<12x8xf32>
    %cst_59 = arith.constant dense<0.000000e+00> : vector<8x12xf32>
    %103 = tpu.matmul %101, %102, %cst_59 {dimension_numbers = #tpu.dot_dimension_numbers<[1], [1], [0], [0], [0, 0, 1, 0], [], []>} : vector<8x8xf32>, vector<12x8xf32>, vector<8x12xf32> -> vector<8x12xf32>
    %104 = arith.addf %103, %98 : vector<8x12xf32>
    %105 = vector.extract_strided_slice %35 {offsets = [0, 8], sizes = [8, 8], strides = [1, 1]} : vector<8x32xf32> to vector<8x8xf32>
    %106 = vector.extract_strided_slice %26 {offsets = [0, 8], sizes = [12, 8], strides = [1, 1]} : vector<12x32xf32> to vector<12x8xf32>
    %cst_60 = arith.constant dense<0.000000e+00> : vector<8x12xf32>
    %107 = tpu.matmul %105, %106, %cst_60 {dimension_numbers = #tpu.dot_dimension_numbers<[1], [1], [0], [0], [0, 0, 1, 0], [], []>} : vector<8x8xf32>, vector<12x8xf32>, vector<8x12xf32> -> vector<8x12xf32>
    %108 = arith.addf %107, %98 : vector<8x12xf32>
    %109 = vector.extract_strided_slice %35 {offsets = [0, 16], sizes = [8, 8], strides = [1, 1]} : vector<8x32xf32> to vector<8x8xf32>
    %110 = vector.extract_strided_slice %26 {offsets = [0, 16], sizes = [12, 8], strides = [1, 1]} : vector<12x32xf32> to vector<12x8xf32>
    %cst_61 = arith.constant dense<0.000000e+00> : vector<8x12xf32>
    %111 = tpu.matmul %109, %110, %cst_61 {dimension_numbers = #tpu.dot_dimension_numbers<[1], [1], [0], [0], [0, 0, 1, 0], [], []>} : vector<8x8xf32>, vector<12x8xf32>, vector<8x12xf32> -> vector<8x12xf32>
    %112 = arith.addf %111, %98 : vector<8x12xf32>
    %113 = vector.extract_strided_slice %35 {offsets = [0, 24], sizes = [8, 8], strides = [1, 1]} : vector<8x32xf32> to vector<8x8xf32>
    %114 = vector.extract_strided_slice %26 {offsets = [0, 24], sizes = [12, 8], strides = [1, 1]} : vector<12x32xf32> to vector<12x8xf32>
    %cst_62 = arith.constant dense<0.000000e+00> : vector<8x12xf32>
    %115 = tpu.matmul %113, %114, %cst_62 {dimension_numbers = #tpu.dot_dimension_numbers<[1], [1], [0], [0], [0, 0, 1, 0], [], []>} : vector<8x8xf32>, vector<12x8xf32>, vector<8x12xf32> -> vector<8x12xf32>
    %116 = arith.addf %115, %98 : vector<8x12xf32>
    %117 = vector.shape_cast %104 : vector<8x12xf32> to vector<1x8x12xf32>
    %118 = vector.shape_cast %108 : vector<8x12xf32> to vector<1x8x12xf32>
    %119 = vector.shape_cast %112 : vector<8x12xf32> to vector<1x8x12xf32>
    %120 = vector.shape_cast %116 : vector<8x12xf32> to vector<1x8x12xf32>
    %121 = tpu.concatenate %117, %118, %119, %120 in 0 : vector<1x8x12xf32>, vector<1x8x12xf32>, vector<1x8x12xf32>, vector<1x8x12xf32> -> vector<4x8x12xf32>
    %cst_63 = arith.constant dense<0xFF800000> : vector<4x8xf32>
    %122 = vector.multi_reduction <maximumf>, %121, %cst_63 [2] : vector<4x8x12xf32> to vector<4x8xf32>
    %123 = vector.shape_cast %122 : vector<4x8xf32> to vector<4x8x1xf32>
    %124 = vector.broadcast %123 : vector<4x8x1xf32> to vector<4x8x12xf32>
    %125 = arith.subf %121, %124 : vector<4x8x12xf32>
    %126 = math.exp %125 : vector<4x8x12xf32>
    %cst_64 = arith.constant dense<0.000000e+00> : vector<4x8xf32>
    %127 = vector.multi_reduction <add>, %126, %cst_64 [2] : vector<4x8x12xf32> to vector<4x8xf32>
    %128 = vector.shape_cast %127 : vector<4x8xf32> to vector<4x8x1xf32>
    %129 = vector.broadcast %128 : vector<4x8x1xf32> to vector<4x8x12xf32>
    %130 = arith.divf %126, %129 : vector<4x8x12xf32>
    %131 = vector.extract_strided_slice %130 {offsets = [0, 0, 0], sizes = [1, 8, 12], strides = [1, 1, 1]} : vector<4x8x12xf32> to vector<1x8x12xf32>
    %132 = vector.shape_cast %131 : vector<1x8x12xf32> to vector<8x12xf32>
    %133 = vector.extract_strided_slice %27 {offsets = [0, 0], sizes = [12, 8], strides = [1, 1]} : vector<12x32xf32> to vector<12x8xf32>
    %cst_65 = arith.constant dense<0.000000e+00> : vector<8x8xf32>
    %134 = tpu.matmul %132, %133, %cst_65 {dimension_numbers = #tpu.dot_dimension_numbers<[1], [0], [0], [1], [0, 0, 1, 1], [], []>} : vector<8x12xf32>, vector<12x8xf32>, vector<8x8xf32> -> vector<8x8xf32>
    %135 = vector.extract_strided_slice %100 {offsets = [0, 0], sizes = [8, 32], strides = [1, 1]} : vector<32x32xf32> to vector<8x32xf32>
    %cst_66 = arith.constant dense<0.000000e+00> : vector<8x32xf32>
    %136 = tpu.matmul %134, %135, %cst_66 {dimension_numbers = #tpu.dot_dimension_numbers<[1], [0], [0], [1], [0, 0, 1, 1], [], []>} : vector<8x8xf32>, vector<8x32xf32>, vector<8x32xf32> -> vector<8x32xf32>
    %137 = vector.extract_strided_slice %130 {offsets = [1, 0, 0], sizes = [1, 8, 12], strides = [1, 1, 1]} : vector<4x8x12xf32> to vector<1x8x12xf32>
    %138 = vector.shape_cast %137 : vector<1x8x12xf32> to vector<8x12xf32>
    %139 = vector.extract_strided_slice %27 {offsets = [0, 8], sizes = [12, 8], strides = [1, 1]} : vector<12x32xf32> to vector<12x8xf32>
    %cst_67 = arith.constant dense<0.000000e+00> : vector<8x8xf32>
    %140 = tpu.matmul %138, %139, %cst_67 {dimension_numbers = #tpu.dot_dimension_numbers<[1], [0], [0], [1], [0, 0, 1, 1], [], []>} : vector<8x12xf32>, vector<12x8xf32>, vector<8x8xf32> -> vector<8x8xf32>
    %141 = vector.extract_strided_slice %100 {offsets = [8, 0], sizes = [8, 32], strides = [1, 1]} : vector<32x32xf32> to vector<8x32xf32>
    %cst_68 = arith.constant dense<0.000000e+00> : vector<8x32xf32>
    %142 = tpu.matmul %140, %141, %cst_68 {dimension_numbers = #tpu.dot_dimension_numbers<[1], [0], [0], [1], [0, 0, 1, 1], [], []>} : vector<8x8xf32>, vector<8x32xf32>, vector<8x32xf32> -> vector<8x32xf32>
    %143 = arith.addf %136, %142 : vector<8x32xf32>
    %144 = vector.extract_strided_slice %130 {offsets = [2, 0, 0], sizes = [1, 8, 12], strides = [1, 1, 1]} : vector<4x8x12xf32> to vector<1x8x12xf32>
    %145 = vector.shape_cast %144 : vector<1x8x12xf32> to vector<8x12xf32>
    %146 = vector.extract_strided_slice %27 {offsets = [0, 16], sizes = [12, 8], strides = [1, 1]} : vector<12x32xf32> to vector<12x8xf32>
    %cst_69 = arith.constant dense<0.000000e+00> : vector<8x8xf32>
    %147 = tpu.matmul %145, %146, %cst_69 {dimension_numbers = #tpu.dot_dimension_numbers<[1], [0], [0], [1], [0, 0, 1, 1], [], []>} : vector<8x12xf32>, vector<12x8xf32>, vector<8x8xf32> -> vector<8x8xf32>
    %148 = vector.extract_strided_slice %100 {offsets = [16, 0], sizes = [8, 32], strides = [1, 1]} : vector<32x32xf32> to vector<8x32xf32>
    %cst_70 = arith.constant dense<0.000000e+00> : vector<8x32xf32>
    %149 = tpu.matmul %147, %148, %cst_70 {dimension_numbers = #tpu.dot_dimension_numbers<[1], [0], [0], [1], [0, 0, 1, 1], [], []>} : vector<8x8xf32>, vector<8x32xf32>, vector<8x32xf32> -> vector<8x32xf32>
    %150 = arith.addf %143, %149 : vector<8x32xf32>
    %151 = vector.extract_strided_slice %130 {offsets = [3, 0, 0], sizes = [1, 8, 12], strides = [1, 1, 1]} : vector<4x8x12xf32> to vector<1x8x12xf32>
    %152 = vector.shape_cast %151 : vector<1x8x12xf32> to vector<8x12xf32>
    %153 = vector.extract_strided_slice %27 {offsets = [0, 24], sizes = [12, 8], strides = [1, 1]} : vector<12x32xf32> to vector<12x8xf32>
    %cst_71 = arith.constant dense<0.000000e+00> : vector<8x8xf32>
    %154 = tpu.matmul %152, %153, %cst_71 {dimension_numbers = #tpu.dot_dimension_numbers<[1], [0], [0], [1], [0, 0, 1, 1], [], []>} : vector<8x12xf32>, vector<12x8xf32>, vector<8x8xf32> -> vector<8x8xf32>
    %155 = vector.extract_strided_slice %100 {offsets = [24, 0], sizes = [8, 32], strides = [1, 1]} : vector<32x32xf32> to vector<8x32xf32>
    %cst_72 = arith.constant dense<0.000000e+00> : vector<8x32xf32>
    %156 = tpu.matmul %154, %155, %cst_72 {dimension_numbers = #tpu.dot_dimension_numbers<[1], [0], [0], [1], [0, 0, 1, 1], [], []>} : vector<8x8xf32>, vector<8x32xf32>, vector<8x32xf32> -> vector<8x32xf32>
    %157 = arith.addf %150, %156 : vector<8x32xf32>
    %cst_73 = arith.constant 1.000000e+00 : f32
    %158 = vector.broadcast %cst_73 : f32 to vector<12x32xf32>
    %159 = arith.mulf %97, %158 : vector<12x32xf32>
    %c0_74 = arith.constant 0 : index
    %c0_75 = arith.constant 0 : index
    %c0_76 = arith.constant 0 : index
    %c0_77 = arith.constant 0 : index
    %160 = vector.load %arg10[%c0_74, %c0_75, %c0_76, %c0_77] : memref<2x2x1x32xf32, #tpu.memory_space<vmem>>, vector<1x1x1x32xf32>
    %161 = vector.shape_cast %160 : vector<1x1x1x32xf32> to vector<1x32xf32>
    %162 = vector.broadcast %161 : vector<1x32xf32> to vector<12x32xf32>
    %163 = arith.addf %159, %162 : vector<12x32xf32>
    %c0_78 = arith.constant 0 : index
    %c0_79 = arith.constant 0 : index
    %164 = vector.load %arg13[%c0_78, %c0_79] : memref<2x2xf32, #tpu.memory_space<vmem>>, vector<1x1xf32>
    %165 = arith.negf %164 : vector<1x1xf32>
    %166 = math.exp %165 : vector<1x1xf32>
    %cst_80 = arith.constant 1.000000e+00 : f32
    %167 = vector.broadcast %cst_80 : f32 to vector<1x1xf32>
    %168 = arith.addf %167, %166 : vector<1x1xf32>
    %169 = arith.divf %167, %168 : vector<1x1xf32>
    %170 = vector.broadcast %169 : vector<1x1xf32> to vector<12x32xf32>
    %171 = arith.mulf %163, %170 : vector<12x32xf32>
    %cst_81 = arith.constant 1.000000e+00 : f32
    %172 = vector.broadcast %cst_81 : f32 to vector<1x1xf32>
    %173 = arith.subf %172, %169 : vector<1x1xf32>
    %174 = vector.broadcast %173 : vector<1x1xf32> to vector<12x32xf32>
    %175 = arith.mulf %8, %174 : vector<12x32xf32>
    %176 = arith.addf %171, %175 : vector<12x32xf32>
    %cst_82 = arith.constant dense<0.000000e+00> : vector<12xf32>
    %177 = vector.multi_reduction <add>, %176, %cst_82 [1] : vector<12x32xf32> to vector<12xf32>
    %178 = vector.shape_cast %177 : vector<12xf32> to vector<12x1xf32>
    %cst_83 = arith.constant 3.200000e+01 : f32
    %179 = vector.broadcast %cst_83 : f32 to vector<12x1xf32>
    %180 = arith.divf %178, %179 : vector<12x1xf32>
    %181 = vector.broadcast %180 : vector<12x1xf32> to vector<12x32xf32>
    %182 = arith.subf %176, %181 : vector<12x32xf32>
    %183 = arith.mulf %182, %182 : vector<12x32xf32>
    %cst_84 = arith.constant dense<0.000000e+00> : vector<12xf32>
    %184 = vector.multi_reduction <add>, %183, %cst_84 [1] : vector<12x32xf32> to vector<12xf32>
    %185 = vector.shape_cast %184 : vector<12xf32> to vector<12x1xf32>
    %cst_85 = arith.constant 3.200000e+01 : f32
    %186 = vector.broadcast %cst_85 : f32 to vector<12x1xf32>
    %187 = arith.divf %185, %186 : vector<12x1xf32>
    %188 = vector.broadcast %180 : vector<12x1xf32> to vector<12x32xf32>
    %189 = arith.subf %176, %188 : vector<12x32xf32>
    %cst_86 = arith.constant 9.99999974E-6 : f32
    %190 = vector.broadcast %cst_86 : f32 to vector<12x1xf32>
    %191 = arith.addf %187, %190 : vector<12x1xf32>
    %192 = math.rsqrt %191 : vector<12x1xf32>
    %193 = vector.broadcast %192 : vector<12x1xf32> to vector<12x32xf32>
    %194 = arith.mulf %189, %193 : vector<12x32xf32>
    %c0_87 = arith.constant 0 : index
    %c0_88 = arith.constant 0 : index
    %c0_89 = arith.constant 0 : index
    %c0_90 = arith.constant 0 : index
    %195 = vector.load %arg11[%c0_87, %c0_88, %c0_89, %c0_90] : memref<2x2x1x32xf32, #tpu.memory_space<vmem>>, vector<1x1x1x32xf32>
    %196 = vector.shape_cast %195 : vector<1x1x1x32xf32> to vector<1x32xf32>
    %197 = vector.broadcast %196 : vector<1x32xf32> to vector<12x32xf32>
    %198 = arith.mulf %194, %197 : vector<12x32xf32>
    %c0_91 = arith.constant 0 : index
    %c0_92 = arith.constant 0 : index
    %c0_93 = arith.constant 0 : index
    %c0_94 = arith.constant 0 : index
    %199 = vector.load %arg12[%c0_91, %c0_92, %c0_93, %c0_94] : memref<2x2x1x32xf32, #tpu.memory_space<vmem>>, vector<1x1x1x32xf32>
    %200 = vector.shape_cast %199 : vector<1x1x1x32xf32> to vector<1x32xf32>
    %201 = vector.broadcast %200 : vector<1x32xf32> to vector<12x32xf32>
    %202 = arith.addf %198, %201 : vector<12x32xf32>
    %cst_95 = arith.constant 1.000000e+00 : f32
    %203 = vector.broadcast %cst_95 : f32 to vector<8x32xf32>
    %204 = arith.mulf %157, %203 : vector<8x32xf32>
    %c0_96 = arith.constant 0 : index
    %c1_97 = arith.constant 1 : index
    %c0_98 = arith.constant 0 : index
    %c0_99 = arith.constant 0 : index
    %205 = vector.load %arg10[%c0_96, %c1_97, %c0_98, %c0_99] : memref<2x2x1x32xf32, #tpu.memory_space<vmem>>, vector<1x1x1x32xf32>
    %206 = vector.shape_cast %205 : vector<1x1x1x32xf32> to vector<1x32xf32>
    %207 = vector.broadcast %206 : vector<1x32xf32> to vector<8x32xf32>
    %208 = arith.addf %204, %207 : vector<8x32xf32>
    %c0_100 = arith.constant 0 : index
    %c1_101 = arith.constant 1 : index
    %209 = vector.load %arg13[%c0_100, %c1_101] : memref<2x2xf32, #tpu.memory_space<vmem>>, vector<1x1xf32>
    %210 = arith.negf %209 : vector<1x1xf32>
    %211 = math.exp %210 : vector<1x1xf32>
    %cst_102 = arith.constant 1.000000e+00 : f32
    %212 = vector.broadcast %cst_102 : f32 to vector<1x1xf32>
    %213 = arith.addf %212, %211 : vector<1x1xf32>
    %214 = arith.divf %212, %213 : vector<1x1xf32>
    %215 = vector.broadcast %214 : vector<1x1xf32> to vector<8x32xf32>
    %216 = arith.mulf %208, %215 : vector<8x32xf32>
    %cst_103 = arith.constant 1.000000e+00 : f32
    %217 = vector.broadcast %cst_103 : f32 to vector<1x1xf32>
    %218 = arith.subf %217, %214 : vector<1x1xf32>
    %219 = vector.broadcast %218 : vector<1x1xf32> to vector<8x32xf32>
    %220 = arith.mulf %17, %219 : vector<8x32xf32>
    %221 = arith.addf %216, %220 : vector<8x32xf32>
    %cst_104 = arith.constant dense<0.000000e+00> : vector<8xf32>
    %222 = vector.multi_reduction <add>, %221, %cst_104 [1] : vector<8x32xf32> to vector<8xf32>
    %223 = vector.shape_cast %222 : vector<8xf32> to vector<8x1xf32>
    %cst_105 = arith.constant 3.200000e+01 : f32
    %224 = vector.broadcast %cst_105 : f32 to vector<8x1xf32>
    %225 = arith.divf %223, %224 : vector<8x1xf32>
    %226 = vector.broadcast %225 : vector<8x1xf32> to vector<8x32xf32>
    %227 = arith.subf %221, %226 : vector<8x32xf32>
    %228 = arith.mulf %227, %227 : vector<8x32xf32>
    %cst_106 = arith.constant dense<0.000000e+00> : vector<8xf32>
    %229 = vector.multi_reduction <add>, %228, %cst_106 [1] : vector<8x32xf32> to vector<8xf32>
    %230 = vector.shape_cast %229 : vector<8xf32> to vector<8x1xf32>
    %cst_107 = arith.constant 3.200000e+01 : f32
    %231 = vector.broadcast %cst_107 : f32 to vector<8x1xf32>
    %232 = arith.divf %230, %231 : vector<8x1xf32>
    %233 = vector.broadcast %225 : vector<8x1xf32> to vector<8x32xf32>
    %234 = arith.subf %221, %233 : vector<8x32xf32>
    %cst_108 = arith.constant 9.99999974E-6 : f32
    %235 = vector.broadcast %cst_108 : f32 to vector<8x1xf32>
    %236 = arith.addf %232, %235 : vector<8x1xf32>
    %237 = math.rsqrt %236 : vector<8x1xf32>
    %238 = vector.broadcast %237 : vector<8x1xf32> to vector<8x32xf32>
    %239 = arith.mulf %234, %238 : vector<8x32xf32>
    %c0_109 = arith.constant 0 : index
    %c1_110 = arith.constant 1 : index
    %c0_111 = arith.constant 0 : index
    %c0_112 = arith.constant 0 : index
    %240 = vector.load %arg11[%c0_109, %c1_110, %c0_111, %c0_112] : memref<2x2x1x32xf32, #tpu.memory_space<vmem>>, vector<1x1x1x32xf32>
    %241 = vector.shape_cast %240 : vector<1x1x1x32xf32> to vector<1x32xf32>
    %242 = vector.broadcast %241 : vector<1x32xf32> to vector<8x32xf32>
    %243 = arith.mulf %239, %242 : vector<8x32xf32>
    %c0_113 = arith.constant 0 : index
    %c1_114 = arith.constant 1 : index
    %c0_115 = arith.constant 0 : index
    %c0_116 = arith.constant 0 : index
    %244 = vector.load %arg12[%c0_113, %c1_114, %c0_115, %c0_116] : memref<2x2x1x32xf32, #tpu.memory_space<vmem>>, vector<1x1x1x32xf32>
    %245 = vector.shape_cast %244 : vector<1x1x1x32xf32> to vector<1x32xf32>
    %246 = vector.broadcast %245 : vector<1x32xf32> to vector<8x32xf32>
    %247 = arith.addf %243, %246 : vector<8x32xf32>
    %c1_117 = arith.constant 1 : index
    %c0_118 = arith.constant 0 : index
    %c0_119 = arith.constant 0 : index
    %c0_120 = arith.constant 0 : index
    %248 = vector.load %arg7[%c1_117, %c0_118, %c0_119, %c0_120] : memref<2x2x32x96xf32, #tpu.memory_space<vmem>>, vector<1x1x32x96xf32>
    %249 = vector.shape_cast %248 : vector<1x1x32x96xf32> to vector<32x96xf32>
    %cst_121 = arith.constant dense<0.000000e+00> : vector<12x96xf32>
    %250 = tpu.matmul %202, %249, %cst_121 {dimension_numbers = #tpu.dot_dimension_numbers<[1], [0], [0], [1], [0, 0, 1, 1], [], []>} : vector<12x32xf32>, vector<32x96xf32>, vector<12x96xf32> -> vector<12x96xf32>
    %c1_122 = arith.constant 1 : index
    %c0_123 = arith.constant 0 : index
    %c0_124 = arith.constant 0 : index
    %c0_125 = arith.constant 0 : index
    %251 = vector.load %arg8[%c1_122, %c0_123, %c0_124, %c0_125] : memref<2x2x1x96xf32, #tpu.memory_space<vmem>>, vector<1x1x1x96xf32>
    %252 = vector.shape_cast %251 : vector<1x1x1x96xf32> to vector<1x96xf32>
    %253 = vector.broadcast %252 : vector<1x96xf32> to vector<12x96xf32>
    %254 = arith.addf %250, %253 : vector<12x96xf32>
    %255 = vector.extract_strided_slice %254 {offsets = [0, 0], sizes = [12, 32], strides = [1, 1]} : vector<12x96xf32> to vector<12x32xf32>
    %256 = vector.extract_strided_slice %254 {offsets = [0, 32], sizes = [12, 32], strides = [1, 1]} : vector<12x96xf32> to vector<12x32xf32>
    %257 = vector.extract_strided_slice %254 {offsets = [0, 64], sizes = [12, 32], strides = [1, 1]} : vector<12x96xf32> to vector<12x32xf32>
    %c1_126 = arith.constant 1 : index
    %c1_127 = arith.constant 1 : index
    %c0_128 = arith.constant 0 : index
    %c0_129 = arith.constant 0 : index
    %258 = vector.load %arg7[%c1_126, %c1_127, %c0_128, %c0_129] : memref<2x2x32x96xf32, #tpu.memory_space<vmem>>, vector<1x1x32x96xf32>
    %259 = vector.shape_cast %258 : vector<1x1x32x96xf32> to vector<32x96xf32>
    %cst_130 = arith.constant dense<0.000000e+00> : vector<8x96xf32>
    %260 = tpu.matmul %247, %259, %cst_130 {dimension_numbers = #tpu.dot_dimension_numbers<[1], [0], [0], [1], [0, 0, 1, 1], [], []>} : vector<8x32xf32>, vector<32x96xf32>, vector<8x96xf32> -> vector<8x96xf32>
    %c1_131 = arith.constant 1 : index
    %c1_132 = arith.constant 1 : index
    %c0_133 = arith.constant 0 : index
    %c0_134 = arith.constant 0 : index
    %261 = vector.load %arg8[%c1_131, %c1_132, %c0_133, %c0_134] : memref<2x2x1x96xf32, #tpu.memory_space<vmem>>, vector<1x1x1x96xf32>
    %262 = vector.shape_cast %261 : vector<1x1x1x96xf32> to vector<1x96xf32>
    %263 = vector.broadcast %262 : vector<1x96xf32> to vector<8x96xf32>
    %264 = arith.addf %260, %263 : vector<8x96xf32>
    %265 = vector.extract_strided_slice %264 {offsets = [0, 0], sizes = [8, 32], strides = [1, 1]} : vector<8x96xf32> to vector<8x32xf32>
    %266 = vector.extract_strided_slice %264 {offsets = [0, 32], sizes = [8, 32], strides = [1, 1]} : vector<8x96xf32> to vector<8x32xf32>
    %267 = vector.extract_strided_slice %264 {offsets = [0, 64], sizes = [8, 32], strides = [1, 1]} : vector<8x96xf32> to vector<8x32xf32>
    %c0_135 = arith.constant 0 : index
    %c0_136 = arith.constant 0 : index
    %268 = vector.load %arg3[%c0_135, %c0_136] : memref<12x8xf32, #tpu.memory_space<vmem>>, vector<12x8xf32>
    %c1_137 = arith.constant 1 : index
    %c0_138 = arith.constant 0 : index
    %c0_139 = arith.constant 0 : index
    %c0_140 = arith.constant 0 : index
    %269 = vector.load %arg9[%c1_137, %c0_138, %c0_139, %c0_140] : memref<2x2x32x32xf32, #tpu.memory_space<vmem>>, vector<1x1x32x32xf32>
    %270 = vector.shape_cast %269 : vector<1x1x32x32xf32> to vector<32x32xf32>
    %271 = vector.extract_strided_slice %255 {offsets = [0, 0], sizes = [12, 8], strides = [1, 1]} : vector<12x32xf32> to vector<12x8xf32>
    %272 = vector.extract_strided_slice %266 {offsets = [0, 0], sizes = [8, 8], strides = [1, 1]} : vector<8x32xf32> to vector<8x8xf32>
    %cst_141 = arith.constant dense<0.000000e+00> : vector<12x8xf32>
    %273 = tpu.matmul %271, %272, %cst_141 {dimension_numbers = #tpu.dot_dimension_numbers<[1], [1], [0], [0], [0, 0, 1, 0], [], []>} : vector<12x8xf32>, vector<8x8xf32>, vector<12x8xf32> -> vector<12x8xf32>
    %274 = arith.addf %273, %268 : vector<12x8xf32>
    %275 = vector.extract_strided_slice %255 {offsets = [0, 8], sizes = [12, 8], strides = [1, 1]} : vector<12x32xf32> to vector<12x8xf32>
    %276 = vector.extract_strided_slice %266 {offsets = [0, 8], sizes = [8, 8], strides = [1, 1]} : vector<8x32xf32> to vector<8x8xf32>
    %cst_142 = arith.constant dense<0.000000e+00> : vector<12x8xf32>
    %277 = tpu.matmul %275, %276, %cst_142 {dimension_numbers = #tpu.dot_dimension_numbers<[1], [1], [0], [0], [0, 0, 1, 0], [], []>} : vector<12x8xf32>, vector<8x8xf32>, vector<12x8xf32> -> vector<12x8xf32>
    %278 = arith.addf %277, %268 : vector<12x8xf32>
    %279 = vector.extract_strided_slice %255 {offsets = [0, 16], sizes = [12, 8], strides = [1, 1]} : vector<12x32xf32> to vector<12x8xf32>
    %280 = vector.extract_strided_slice %266 {offsets = [0, 16], sizes = [8, 8], strides = [1, 1]} : vector<8x32xf32> to vector<8x8xf32>
    %cst_143 = arith.constant dense<0.000000e+00> : vector<12x8xf32>
    %281 = tpu.matmul %279, %280, %cst_143 {dimension_numbers = #tpu.dot_dimension_numbers<[1], [1], [0], [0], [0, 0, 1, 0], [], []>} : vector<12x8xf32>, vector<8x8xf32>, vector<12x8xf32> -> vector<12x8xf32>
    %282 = arith.addf %281, %268 : vector<12x8xf32>
    %283 = vector.extract_strided_slice %255 {offsets = [0, 24], sizes = [12, 8], strides = [1, 1]} : vector<12x32xf32> to vector<12x8xf32>
    %284 = vector.extract_strided_slice %266 {offsets = [0, 24], sizes = [8, 8], strides = [1, 1]} : vector<8x32xf32> to vector<8x8xf32>
    %cst_144 = arith.constant dense<0.000000e+00> : vector<12x8xf32>
    %285 = tpu.matmul %283, %284, %cst_144 {dimension_numbers = #tpu.dot_dimension_numbers<[1], [1], [0], [0], [0, 0, 1, 0], [], []>} : vector<12x8xf32>, vector<8x8xf32>, vector<12x8xf32> -> vector<12x8xf32>
    %286 = arith.addf %285, %268 : vector<12x8xf32>
    %287 = vector.shape_cast %274 : vector<12x8xf32> to vector<1x12x8xf32>
    %288 = vector.shape_cast %278 : vector<12x8xf32> to vector<1x12x8xf32>
    %289 = vector.shape_cast %282 : vector<12x8xf32> to vector<1x12x8xf32>
    %290 = vector.shape_cast %286 : vector<12x8xf32> to vector<1x12x8xf32>
    %291 = tpu.concatenate %287, %288, %289, %290 in 0 : vector<1x12x8xf32>, vector<1x12x8xf32>, vector<1x12x8xf32>, vector<1x12x8xf32> -> vector<4x12x8xf32>
    %cst_145 = arith.constant dense<0xFF800000> : vector<4x12xf32>
    %292 = vector.multi_reduction <maximumf>, %291, %cst_145 [2] : vector<4x12x8xf32> to vector<4x12xf32>
    %293 = vector.shape_cast %292 : vector<4x12xf32> to vector<4x12x1xf32>
    %294 = vector.broadcast %293 : vector<4x12x1xf32> to vector<4x12x8xf32>
    %295 = arith.subf %291, %294 : vector<4x12x8xf32>
    %296 = math.exp %295 : vector<4x12x8xf32>
    %cst_146 = arith.constant dense<0.000000e+00> : vector<4x12xf32>
    %297 = vector.multi_reduction <add>, %296, %cst_146 [2] : vector<4x12x8xf32> to vector<4x12xf32>
    %298 = vector.shape_cast %297 : vector<4x12xf32> to vector<4x12x1xf32>
    %299 = vector.broadcast %298 : vector<4x12x1xf32> to vector<4x12x8xf32>
    %300 = arith.divf %296, %299 : vector<4x12x8xf32>
    %301 = vector.extract_strided_slice %300 {offsets = [0, 0, 0], sizes = [1, 12, 8], strides = [1, 1, 1]} : vector<4x12x8xf32> to vector<1x12x8xf32>
    %302 = vector.shape_cast %301 : vector<1x12x8xf32> to vector<12x8xf32>
    %303 = vector.extract_strided_slice %267 {offsets = [0, 0], sizes = [8, 8], strides = [1, 1]} : vector<8x32xf32> to vector<8x8xf32>
    %cst_147 = arith.constant dense<0.000000e+00> : vector<12x8xf32>
    %304 = tpu.matmul %302, %303, %cst_147 {dimension_numbers = #tpu.dot_dimension_numbers<[1], [0], [0], [1], [0, 0, 1, 1], [], []>} : vector<12x8xf32>, vector<8x8xf32>, vector<12x8xf32> -> vector<12x8xf32>
    %305 = vector.extract_strided_slice %270 {offsets = [0, 0], sizes = [8, 32], strides = [1, 1]} : vector<32x32xf32> to vector<8x32xf32>
    %cst_148 = arith.constant dense<0.000000e+00> : vector<12x32xf32>
    %306 = tpu.matmul %304, %305, %cst_148 {dimension_numbers = #tpu.dot_dimension_numbers<[1], [0], [0], [1], [0, 0, 1, 1], [], []>} : vector<12x8xf32>, vector<8x32xf32>, vector<12x32xf32> -> vector<12x32xf32>
    %307 = vector.extract_strided_slice %300 {offsets = [1, 0, 0], sizes = [1, 12, 8], strides = [1, 1, 1]} : vector<4x12x8xf32> to vector<1x12x8xf32>
    %308 = vector.shape_cast %307 : vector<1x12x8xf32> to vector<12x8xf32>
    %309 = vector.extract_strided_slice %267 {offsets = [0, 8], sizes = [8, 8], strides = [1, 1]} : vector<8x32xf32> to vector<8x8xf32>
    %cst_149 = arith.constant dense<0.000000e+00> : vector<12x8xf32>
    %310 = tpu.matmul %308, %309, %cst_149 {dimension_numbers = #tpu.dot_dimension_numbers<[1], [0], [0], [1], [0, 0, 1, 1], [], []>} : vector<12x8xf32>, vector<8x8xf32>, vector<12x8xf32> -> vector<12x8xf32>
    %311 = vector.extract_strided_slice %270 {offsets = [8, 0], sizes = [8, 32], strides = [1, 1]} : vector<32x32xf32> to vector<8x32xf32>
    %cst_150 = arith.constant dense<0.000000e+00> : vector<12x32xf32>
    %312 = tpu.matmul %310, %311, %cst_150 {dimension_numbers = #tpu.dot_dimension_numbers<[1], [0], [0], [1], [0, 0, 1, 1], [], []>} : vector<12x8xf32>, vector<8x32xf32>, vector<12x32xf32> -> vector<12x32xf32>
    %313 = arith.addf %306, %312 : vector<12x32xf32>
    %314 = vector.extract_strided_slice %300 {offsets = [2, 0, 0], sizes = [1, 12, 8], strides = [1, 1, 1]} : vector<4x12x8xf32> to vector<1x12x8xf32>
    %315 = vector.shape_cast %314 : vector<1x12x8xf32> to vector<12x8xf32>
    %316 = vector.extract_strided_slice %267 {offsets = [0, 16], sizes = [8, 8], strides = [1, 1]} : vector<8x32xf32> to vector<8x8xf32>
    %cst_151 = arith.constant dense<0.000000e+00> : vector<12x8xf32>
    %317 = tpu.matmul %315, %316, %cst_151 {dimension_numbers = #tpu.dot_dimension_numbers<[1], [0], [0], [1], [0, 0, 1, 1], [], []>} : vector<12x8xf32>, vector<8x8xf32>, vector<12x8xf32> -> vector<12x8xf32>
    %318 = vector.extract_strided_slice %270 {offsets = [16, 0], sizes = [8, 32], strides = [1, 1]} : vector<32x32xf32> to vector<8x32xf32>
    %cst_152 = arith.constant dense<0.000000e+00> : vector<12x32xf32>
    %319 = tpu.matmul %317, %318, %cst_152 {dimension_numbers = #tpu.dot_dimension_numbers<[1], [0], [0], [1], [0, 0, 1, 1], [], []>} : vector<12x8xf32>, vector<8x32xf32>, vector<12x32xf32> -> vector<12x32xf32>
    %320 = arith.addf %313, %319 : vector<12x32xf32>
    %321 = vector.extract_strided_slice %300 {offsets = [3, 0, 0], sizes = [1, 12, 8], strides = [1, 1, 1]} : vector<4x12x8xf32> to vector<1x12x8xf32>
    %322 = vector.shape_cast %321 : vector<1x12x8xf32> to vector<12x8xf32>
    %323 = vector.extract_strided_slice %267 {offsets = [0, 24], sizes = [8, 8], strides = [1, 1]} : vector<8x32xf32> to vector<8x8xf32>
    %cst_153 = arith.constant dense<0.000000e+00> : vector<12x8xf32>
    %324 = tpu.matmul %322, %323, %cst_153 {dimension_numbers = #tpu.dot_dimension_numbers<[1], [0], [0], [1], [0, 0, 1, 1], [], []>} : vector<12x8xf32>, vector<8x8xf32>, vector<12x8xf32> -> vector<12x8xf32>
    %325 = vector.extract_strided_slice %270 {offsets = [24, 0], sizes = [8, 32], strides = [1, 1]} : vector<32x32xf32> to vector<8x32xf32>
    %cst_154 = arith.constant dense<0.000000e+00> : vector<12x32xf32>
    %326 = tpu.matmul %324, %325, %cst_154 {dimension_numbers = #tpu.dot_dimension_numbers<[1], [0], [0], [1], [0, 0, 1, 1], [], []>} : vector<12x8xf32>, vector<8x32xf32>, vector<12x32xf32> -> vector<12x32xf32>
    %327 = arith.addf %320, %326 : vector<12x32xf32>
    %c0_155 = arith.constant 0 : index
    %c0_156 = arith.constant 0 : index
    %328 = vector.load %arg4[%c0_155, %c0_156] : memref<8x12xf32, #tpu.memory_space<vmem>>, vector<8x12xf32>
    %c1_157 = arith.constant 1 : index
    %c1_158 = arith.constant 1 : index
    %c0_159 = arith.constant 0 : index
    %c0_160 = arith.constant 0 : index
    %329 = vector.load %arg9[%c1_157, %c1_158, %c0_159, %c0_160] : memref<2x2x32x32xf32, #tpu.memory_space<vmem>>, vector<1x1x32x32xf32>
    %330 = vector.shape_cast %329 : vector<1x1x32x32xf32> to vector<32x32xf32>
    %331 = vector.extract_strided_slice %265 {offsets = [0, 0], sizes = [8, 8], strides = [1, 1]} : vector<8x32xf32> to vector<8x8xf32>
    %332 = vector.extract_strided_slice %256 {offsets = [0, 0], sizes = [12, 8], strides = [1, 1]} : vector<12x32xf32> to vector<12x8xf32>
    %cst_161 = arith.constant dense<0.000000e+00> : vector<8x12xf32>
    %333 = tpu.matmul %331, %332, %cst_161 {dimension_numbers = #tpu.dot_dimension_numbers<[1], [1], [0], [0], [0, 0, 1, 0], [], []>} : vector<8x8xf32>, vector<12x8xf32>, vector<8x12xf32> -> vector<8x12xf32>
    %334 = arith.addf %333, %328 : vector<8x12xf32>
    %335 = vector.extract_strided_slice %265 {offsets = [0, 8], sizes = [8, 8], strides = [1, 1]} : vector<8x32xf32> to vector<8x8xf32>
    %336 = vector.extract_strided_slice %256 {offsets = [0, 8], sizes = [12, 8], strides = [1, 1]} : vector<12x32xf32> to vector<12x8xf32>
    %cst_162 = arith.constant dense<0.000000e+00> : vector<8x12xf32>
    %337 = tpu.matmul %335, %336, %cst_162 {dimension_numbers = #tpu.dot_dimension_numbers<[1], [1], [0], [0], [0, 0, 1, 0], [], []>} : vector<8x8xf32>, vector<12x8xf32>, vector<8x12xf32> -> vector<8x12xf32>
    %338 = arith.addf %337, %328 : vector<8x12xf32>
    %339 = vector.extract_strided_slice %265 {offsets = [0, 16], sizes = [8, 8], strides = [1, 1]} : vector<8x32xf32> to vector<8x8xf32>
    %340 = vector.extract_strided_slice %256 {offsets = [0, 16], sizes = [12, 8], strides = [1, 1]} : vector<12x32xf32> to vector<12x8xf32>
    %cst_163 = arith.constant dense<0.000000e+00> : vector<8x12xf32>
    %341 = tpu.matmul %339, %340, %cst_163 {dimension_numbers = #tpu.dot_dimension_numbers<[1], [1], [0], [0], [0, 0, 1, 0], [], []>} : vector<8x8xf32>, vector<12x8xf32>, vector<8x12xf32> -> vector<8x12xf32>
    %342 = arith.addf %341, %328 : vector<8x12xf32>
    %343 = vector.extract_strided_slice %265 {offsets = [0, 24], sizes = [8, 8], strides = [1, 1]} : vector<8x32xf32> to vector<8x8xf32>
    %344 = vector.extract_strided_slice %256 {offsets = [0, 24], sizes = [12, 8], strides = [1, 1]} : vector<12x32xf32> to vector<12x8xf32>
    %cst_164 = arith.constant dense<0.000000e+00> : vector<8x12xf32>
    %345 = tpu.matmul %343, %344, %cst_164 {dimension_numbers = #tpu.dot_dimension_numbers<[1], [1], [0], [0], [0, 0, 1, 0], [], []>} : vector<8x8xf32>, vector<12x8xf32>, vector<8x12xf32> -> vector<8x12xf32>
    %346 = arith.addf %345, %328 : vector<8x12xf32>
    %347 = vector.shape_cast %334 : vector<8x12xf32> to vector<1x8x12xf32>
    %348 = vector.shape_cast %338 : vector<8x12xf32> to vector<1x8x12xf32>
    %349 = vector.shape_cast %342 : vector<8x12xf32> to vector<1x8x12xf32>
    %350 = vector.shape_cast %346 : vector<8x12xf32> to vector<1x8x12xf32>
    %351 = tpu.concatenate %347, %348, %349, %350 in 0 : vector<1x8x12xf32>, vector<1x8x12xf32>, vector<1x8x12xf32>, vector<1x8x12xf32> -> vector<4x8x12xf32>
    %cst_165 = arith.constant dense<0xFF800000> : vector<4x8xf32>
    %352 = vector.multi_reduction <maximumf>, %351, %cst_165 [2] : vector<4x8x12xf32> to vector<4x8xf32>
    %353 = vector.shape_cast %352 : vector<4x8xf32> to vector<4x8x1xf32>
    %354 = vector.broadcast %353 : vector<4x8x1xf32> to vector<4x8x12xf32>
    %355 = arith.subf %351, %354 : vector<4x8x12xf32>
    %356 = math.exp %355 : vector<4x8x12xf32>
    %cst_166 = arith.constant dense<0.000000e+00> : vector<4x8xf32>
    %357 = vector.multi_reduction <add>, %356, %cst_166 [2] : vector<4x8x12xf32> to vector<4x8xf32>
    %358 = vector.shape_cast %357 : vector<4x8xf32> to vector<4x8x1xf32>
    %359 = vector.broadcast %358 : vector<4x8x1xf32> to vector<4x8x12xf32>
    %360 = arith.divf %356, %359 : vector<4x8x12xf32>
    %361 = vector.extract_strided_slice %360 {offsets = [0, 0, 0], sizes = [1, 8, 12], strides = [1, 1, 1]} : vector<4x8x12xf32> to vector<1x8x12xf32>
    %362 = vector.shape_cast %361 : vector<1x8x12xf32> to vector<8x12xf32>
    %363 = vector.extract_strided_slice %257 {offsets = [0, 0], sizes = [12, 8], strides = [1, 1]} : vector<12x32xf32> to vector<12x8xf32>
    %cst_167 = arith.constant dense<0.000000e+00> : vector<8x8xf32>
    %364 = tpu.matmul %362, %363, %cst_167 {dimension_numbers = #tpu.dot_dimension_numbers<[1], [0], [0], [1], [0, 0, 1, 1], [], []>} : vector<8x12xf32>, vector<12x8xf32>, vector<8x8xf32> -> vector<8x8xf32>
    %365 = vector.extract_strided_slice %330 {offsets = [0, 0], sizes = [8, 32], strides = [1, 1]} : vector<32x32xf32> to vector<8x32xf32>
    %cst_168 = arith.constant dense<0.000000e+00> : vector<8x32xf32>
    %366 = tpu.matmul %364, %365, %cst_168 {dimension_numbers = #tpu.dot_dimension_numbers<[1], [0], [0], [1], [0, 0, 1, 1], [], []>} : vector<8x8xf32>, vector<8x32xf32>, vector<8x32xf32> -> vector<8x32xf32>
    %367 = vector.extract_strided_slice %360 {offsets = [1, 0, 0], sizes = [1, 8, 12], strides = [1, 1, 1]} : vector<4x8x12xf32> to vector<1x8x12xf32>
    %368 = vector.shape_cast %367 : vector<1x8x12xf32> to vector<8x12xf32>
    %369 = vector.extract_strided_slice %257 {offsets = [0, 8], sizes = [12, 8], strides = [1, 1]} : vector<12x32xf32> to vector<12x8xf32>
    %cst_169 = arith.constant dense<0.000000e+00> : vector<8x8xf32>
    %370 = tpu.matmul %368, %369, %cst_169 {dimension_numbers = #tpu.dot_dimension_numbers<[1], [0], [0], [1], [0, 0, 1, 1], [], []>} : vector<8x12xf32>, vector<12x8xf32>, vector<8x8xf32> -> vector<8x8xf32>
    %371 = vector.extract_strided_slice %330 {offsets = [8, 0], sizes = [8, 32], strides = [1, 1]} : vector<32x32xf32> to vector<8x32xf32>
    %cst_170 = arith.constant dense<0.000000e+00> : vector<8x32xf32>
    %372 = tpu.matmul %370, %371, %cst_170 {dimension_numbers = #tpu.dot_dimension_numbers<[1], [0], [0], [1], [0, 0, 1, 1], [], []>} : vector<8x8xf32>, vector<8x32xf32>, vector<8x32xf32> -> vector<8x32xf32>
    %373 = arith.addf %366, %372 : vector<8x32xf32>
    %374 = vector.extract_strided_slice %360 {offsets = [2, 0, 0], sizes = [1, 8, 12], strides = [1, 1, 1]} : vector<4x8x12xf32> to vector<1x8x12xf32>
    %375 = vector.shape_cast %374 : vector<1x8x12xf32> to vector<8x12xf32>
    %376 = vector.extract_strided_slice %257 {offsets = [0, 16], sizes = [12, 8], strides = [1, 1]} : vector<12x32xf32> to vector<12x8xf32>
    %cst_171 = arith.constant dense<0.000000e+00> : vector<8x8xf32>
    %377 = tpu.matmul %375, %376, %cst_171 {dimension_numbers = #tpu.dot_dimension_numbers<[1], [0], [0], [1], [0, 0, 1, 1], [], []>} : vector<8x12xf32>, vector<12x8xf32>, vector<8x8xf32> -> vector<8x8xf32>
    %378 = vector.extract_strided_slice %330 {offsets = [16, 0], sizes = [8, 32], strides = [1, 1]} : vector<32x32xf32> to vector<8x32xf32>
    %cst_172 = arith.constant dense<0.000000e+00> : vector<8x32xf32>
    %379 = tpu.matmul %377, %378, %cst_172 {dimension_numbers = #tpu.dot_dimension_numbers<[1], [0], [0], [1], [0, 0, 1, 1], [], []>} : vector<8x8xf32>, vector<8x32xf32>, vector<8x32xf32> -> vector<8x32xf32>
    %380 = arith.addf %373, %379 : vector<8x32xf32>
    %381 = vector.extract_strided_slice %360 {offsets = [3, 0, 0], sizes = [1, 8, 12], strides = [1, 1, 1]} : vector<4x8x12xf32> to vector<1x8x12xf32>
    %382 = vector.shape_cast %381 : vector<1x8x12xf32> to vector<8x12xf32>
    %383 = vector.extract_strided_slice %257 {offsets = [0, 24], sizes = [12, 8], strides = [1, 1]} : vector<12x32xf32> to vector<12x8xf32>
    %cst_173 = arith.constant dense<0.000000e+00> : vector<8x8xf32>
    %384 = tpu.matmul %382, %383, %cst_173 {dimension_numbers = #tpu.dot_dimension_numbers<[1], [0], [0], [1], [0, 0, 1, 1], [], []>} : vector<8x12xf32>, vector<12x8xf32>, vector<8x8xf32> -> vector<8x8xf32>
    %385 = vector.extract_strided_slice %330 {offsets = [24, 0], sizes = [8, 32], strides = [1, 1]} : vector<32x32xf32> to vector<8x32xf32>
    %cst_174 = arith.constant dense<0.000000e+00> : vector<8x32xf32>
    %386 = tpu.matmul %384, %385, %cst_174 {dimension_numbers = #tpu.dot_dimension_numbers<[1], [0], [0], [1], [0, 0, 1, 1], [], []>} : vector<8x8xf32>, vector<8x32xf32>, vector<8x32xf32> -> vector<8x32xf32>
    %387 = arith.addf %380, %386 : vector<8x32xf32>
    %cst_175 = arith.constant 1.000000e+00 : f32
    %388 = vector.broadcast %cst_175 : f32 to vector<12x32xf32>
    %389 = arith.mulf %327, %388 : vector<12x32xf32>
    %c1_176 = arith.constant 1 : index
    %c0_177 = arith.constant 0 : index
    %c0_178 = arith.constant 0 : index
    %c0_179 = arith.constant 0 : index
    %390 = vector.load %arg10[%c1_176, %c0_177, %c0_178, %c0_179] : memref<2x2x1x32xf32, #tpu.memory_space<vmem>>, vector<1x1x1x32xf32>
    %391 = vector.shape_cast %390 : vector<1x1x1x32xf32> to vector<1x32xf32>
    %392 = vector.broadcast %391 : vector<1x32xf32> to vector<12x32xf32>
    %393 = arith.addf %389, %392 : vector<12x32xf32>
    %c1_180 = arith.constant 1 : index
    %c0_181 = arith.constant 0 : index
    %394 = vector.load %arg13[%c1_180, %c0_181] : memref<2x2xf32, #tpu.memory_space<vmem>>, vector<1x1xf32>
    %395 = arith.negf %394 : vector<1x1xf32>
    %396 = math.exp %395 : vector<1x1xf32>
    %cst_182 = arith.constant 1.000000e+00 : f32
    %397 = vector.broadcast %cst_182 : f32 to vector<1x1xf32>
    %398 = arith.addf %397, %396 : vector<1x1xf32>
    %399 = arith.divf %397, %398 : vector<1x1xf32>
    %400 = vector.broadcast %399 : vector<1x1xf32> to vector<12x32xf32>
    %401 = arith.mulf %393, %400 : vector<12x32xf32>
    %cst_183 = arith.constant 1.000000e+00 : f32
    %402 = vector.broadcast %cst_183 : f32 to vector<1x1xf32>
    %403 = arith.subf %402, %399 : vector<1x1xf32>
    %404 = vector.broadcast %403 : vector<1x1xf32> to vector<12x32xf32>
    %405 = arith.mulf %202, %404 : vector<12x32xf32>
    %406 = arith.addf %401, %405 : vector<12x32xf32>
    %cst_184 = arith.constant dense<0.000000e+00> : vector<12xf32>
    %407 = vector.multi_reduction <add>, %406, %cst_184 [1] : vector<12x32xf32> to vector<12xf32>
    %408 = vector.shape_cast %407 : vector<12xf32> to vector<12x1xf32>
    %cst_185 = arith.constant 3.200000e+01 : f32
    %409 = vector.broadcast %cst_185 : f32 to vector<12x1xf32>
    %410 = arith.divf %408, %409 : vector<12x1xf32>
    %411 = vector.broadcast %410 : vector<12x1xf32> to vector<12x32xf32>
    %412 = arith.subf %406, %411 : vector<12x32xf32>
    %413 = arith.mulf %412, %412 : vector<12x32xf32>
    %cst_186 = arith.constant dense<0.000000e+00> : vector<12xf32>
    %414 = vector.multi_reduction <add>, %413, %cst_186 [1] : vector<12x32xf32> to vector<12xf32>
    %415 = vector.shape_cast %414 : vector<12xf32> to vector<12x1xf32>
    %cst_187 = arith.constant 3.200000e+01 : f32
    %416 = vector.broadcast %cst_187 : f32 to vector<12x1xf32>
    %417 = arith.divf %415, %416 : vector<12x1xf32>
    %418 = vector.broadcast %410 : vector<12x1xf32> to vector<12x32xf32>
    %419 = arith.subf %406, %418 : vector<12x32xf32>
    %cst_188 = arith.constant 9.99999974E-6 : f32
    %420 = vector.broadcast %cst_188 : f32 to vector<12x1xf32>
    %421 = arith.addf %417, %420 : vector<12x1xf32>
    %422 = math.rsqrt %421 : vector<12x1xf32>
    %423 = vector.broadcast %422 : vector<12x1xf32> to vector<12x32xf32>
    %424 = arith.mulf %419, %423 : vector<12x32xf32>
    %c1_189 = arith.constant 1 : index
    %c0_190 = arith.constant 0 : index
    %c0_191 = arith.constant 0 : index
    %c0_192 = arith.constant 0 : index
    %425 = vector.load %arg11[%c1_189, %c0_190, %c0_191, %c0_192] : memref<2x2x1x32xf32, #tpu.memory_space<vmem>>, vector<1x1x1x32xf32>
    %426 = vector.shape_cast %425 : vector<1x1x1x32xf32> to vector<1x32xf32>
    %427 = vector.broadcast %426 : vector<1x32xf32> to vector<12x32xf32>
    %428 = arith.mulf %424, %427 : vector<12x32xf32>
    %c1_193 = arith.constant 1 : index
    %c0_194 = arith.constant 0 : index
    %c0_195 = arith.constant 0 : index
    %c0_196 = arith.constant 0 : index
    %429 = vector.load %arg12[%c1_193, %c0_194, %c0_195, %c0_196] : memref<2x2x1x32xf32, #tpu.memory_space<vmem>>, vector<1x1x1x32xf32>
    %430 = vector.shape_cast %429 : vector<1x1x1x32xf32> to vector<1x32xf32>
    %431 = vector.broadcast %430 : vector<1x32xf32> to vector<12x32xf32>
    %432 = arith.addf %428, %431 : vector<12x32xf32>
    %cst_197 = arith.constant 1.000000e+00 : f32
    %433 = vector.broadcast %cst_197 : f32 to vector<8x32xf32>
    %434 = arith.mulf %387, %433 : vector<8x32xf32>
    %c1_198 = arith.constant 1 : index
    %c1_199 = arith.constant 1 : index
    %c0_200 = arith.constant 0 : index
    %c0_201 = arith.constant 0 : index
    %435 = vector.load %arg10[%c1_198, %c1_199, %c0_200, %c0_201] : memref<2x2x1x32xf32, #tpu.memory_space<vmem>>, vector<1x1x1x32xf32>
    %436 = vector.shape_cast %435 : vector<1x1x1x32xf32> to vector<1x32xf32>
    %437 = vector.broadcast %436 : vector<1x32xf32> to vector<8x32xf32>
    %438 = arith.addf %434, %437 : vector<8x32xf32>
    %c1_202 = arith.constant 1 : index
    %c1_203 = arith.constant 1 : index
    %439 = vector.load %arg13[%c1_202, %c1_203] : memref<2x2xf32, #tpu.memory_space<vmem>>, vector<1x1xf32>
    %440 = arith.negf %439 : vector<1x1xf32>
    %441 = math.exp %440 : vector<1x1xf32>
    %cst_204 = arith.constant 1.000000e+00 : f32
    %442 = vector.broadcast %cst_204 : f32 to vector<1x1xf32>
    %443 = arith.addf %442, %441 : vector<1x1xf32>
    %444 = arith.divf %442, %443 : vector<1x1xf32>
    %445 = vector.broadcast %444 : vector<1x1xf32> to vector<8x32xf32>
    %446 = arith.mulf %438, %445 : vector<8x32xf32>
    %cst_205 = arith.constant 1.000000e+00 : f32
    %447 = vector.broadcast %cst_205 : f32 to vector<1x1xf32>
    %448 = arith.subf %447, %444 : vector<1x1xf32>
    %449 = vector.broadcast %448 : vector<1x1xf32> to vector<8x32xf32>
    %450 = arith.mulf %247, %449 : vector<8x32xf32>
    %451 = arith.addf %446, %450 : vector<8x32xf32>
    %cst_206 = arith.constant dense<0.000000e+00> : vector<8xf32>
    %452 = vector.multi_reduction <add>, %451, %cst_206 [1] : vector<8x32xf32> to vector<8xf32>
    %453 = vector.shape_cast %452 : vector<8xf32> to vector<8x1xf32>
    %cst_207 = arith.constant 3.200000e+01 : f32
    %454 = vector.broadcast %cst_207 : f32 to vector<8x1xf32>
    %455 = arith.divf %453, %454 : vector<8x1xf32>
    %456 = vector.broadcast %455 : vector<8x1xf32> to vector<8x32xf32>
    %457 = arith.subf %451, %456 : vector<8x32xf32>
    %458 = arith.mulf %457, %457 : vector<8x32xf32>
    %cst_208 = arith.constant dense<0.000000e+00> : vector<8xf32>
    %459 = vector.multi_reduction <add>, %458, %cst_208 [1] : vector<8x32xf32> to vector<8xf32>
    %460 = vector.shape_cast %459 : vector<8xf32> to vector<8x1xf32>
    %cst_209 = arith.constant 3.200000e+01 : f32
    %461 = vector.broadcast %cst_209 : f32 to vector<8x1xf32>
    %462 = arith.divf %460, %461 : vector<8x1xf32>
    %463 = vector.broadcast %455 : vector<8x1xf32> to vector<8x32xf32>
    %464 = arith.subf %451, %463 : vector<8x32xf32>
    %cst_210 = arith.constant 9.99999974E-6 : f32
    %465 = vector.broadcast %cst_210 : f32 to vector<8x1xf32>
    %466 = arith.addf %462, %465 : vector<8x1xf32>
    %467 = math.rsqrt %466 : vector<8x1xf32>
    %468 = vector.broadcast %467 : vector<8x1xf32> to vector<8x32xf32>
    %469 = arith.mulf %464, %468 : vector<8x32xf32>
    %c1_211 = arith.constant 1 : index
    %c1_212 = arith.constant 1 : index
    %c0_213 = arith.constant 0 : index
    %c0_214 = arith.constant 0 : index
    %470 = vector.load %arg11[%c1_211, %c1_212, %c0_213, %c0_214] : memref<2x2x1x32xf32, #tpu.memory_space<vmem>>, vector<1x1x1x32xf32>
    %471 = vector.shape_cast %470 : vector<1x1x1x32xf32> to vector<1x32xf32>
    %472 = vector.broadcast %471 : vector<1x32xf32> to vector<8x32xf32>
    %473 = arith.mulf %469, %472 : vector<8x32xf32>
    %c1_215 = arith.constant 1 : index
    %c1_216 = arith.constant 1 : index
    %c0_217 = arith.constant 0 : index
    %c0_218 = arith.constant 0 : index
    %474 = vector.load %arg12[%c1_215, %c1_216, %c0_217, %c0_218] : memref<2x2x1x32xf32, #tpu.memory_space<vmem>>, vector<1x1x1x32xf32>
    %475 = vector.shape_cast %474 : vector<1x1x1x32xf32> to vector<1x32xf32>
    %476 = vector.broadcast %475 : vector<1x32xf32> to vector<8x32xf32>
    %477 = arith.addf %473, %476 : vector<8x32xf32>
    %c0_219 = arith.constant 0 : index
    %c0_220 = arith.constant 0 : index
    %478 = vector.load %arg14[%c0_219, %c0_220] : memref<32x8xf32, #tpu.memory_space<vmem>>, vector<32x8xf32>
    %cst_221 = arith.constant dense<0.000000e+00> : vector<12x8xf32>
    %479 = tpu.matmul %432, %478, %cst_221 {dimension_numbers = #tpu.dot_dimension_numbers<[1], [0], [0], [1], [0, 0, 1, 1], [], []>} : vector<12x32xf32>, vector<32x8xf32>, vector<12x8xf32> -> vector<12x8xf32>
    %c0_222 = arith.constant 0 : index
    %c0_223 = arith.constant 0 : index
    %480 = vector.load %arg15[%c0_222, %c0_223] : memref<1x8xf32, #tpu.memory_space<vmem>>, vector<1x8xf32>
    %481 = vector.broadcast %480 : vector<1x8xf32> to vector<12x8xf32>
    %482 = arith.addf %479, %481 : vector<12x8xf32>
    %c0_224 = arith.constant 0 : index
    %c0_225 = arith.constant 0 : index
    %483 = vector.load %arg16[%c0_224, %c0_225] : memref<12x8xf32, #tpu.memory_space<vmem>>, vector<12x8xf32>
    tpu.vector_store %arg16[%c0_224, %c0_225], %482 {strides = array<i32>} : memref<12x8xf32, #tpu.memory_space<vmem>>, vector<12x8xf32>,
    %c0_226 = arith.constant 0 : index
    %c0_227 = arith.constant 0 : index
    %484 = vector.load %arg14[%c0_226, %c0_227] : memref<32x8xf32, #tpu.memory_space<vmem>>, vector<32x8xf32>
    %cst_228 = arith.constant dense<0.000000e+00> : vector<8x8xf32>
    %485 = tpu.matmul %477, %484, %cst_228 {dimension_numbers = #tpu.dot_dimension_numbers<[1], [0], [0], [1], [0, 0, 1, 1], [], []>} : vector<8x32xf32>, vector<32x8xf32>, vector<8x8xf32> -> vector<8x8xf32>
    %c0_229 = arith.constant 0 : index
    %c0_230 = arith.constant 0 : index
    %486 = vector.load %arg15[%c0_229, %c0_230] : memref<1x8xf32, #tpu.memory_space<vmem>>, vector<1x8xf32>
    %487 = vector.broadcast %486 : vector<1x8xf32> to vector<8x8xf32>
    %488 = arith.addf %485, %487 : vector<8x8xf32>
    %c0_231 = arith.constant 0 : index
    %c0_232 = arith.constant 0 : index
    %489 = vector.load %arg17[%c0_231, %c0_232] : memref<8x8xf32, #tpu.memory_space<vmem>>, vector<8x8xf32>
    tpu.vector_store %arg17[%c0_231, %c0_232], %488 {strides = array<i32>} : memref<8x8xf32, #tpu.memory_space<vmem>>, vector<8x8xf32>,
    return
  }
  func.func @transform_0(%arg0: i32) -> (i32, i32) {
    %c0_i32 = arith.constant 0 : i32
    %c0_i32_0 = arith.constant 0 : i32
    %c0_i32_1 = arith.constant 0 : i32
    return %c0_i32, %c0_i32_0 : i32, i32
  }
  func.func @transform_1(%arg0: i32) -> (i32, i32) {
    %c0_i32 = arith.constant 0 : i32
    %c0_i32_0 = arith.constant 0 : i32
    %c0_i32_1 = arith.constant 0 : i32
    return %c0_i32, %c0_i32_0 : i32, i32
  }
  func.func @transform_2(%arg0: i32) -> (i32, i32) {
    %c0_i32 = arith.constant 0 : i32
    %c0_i32_0 = arith.constant 0 : i32
    %c0_i32_1 = arith.constant 0 : i32
    return %c0_i32, %c0_i32_0 : i32, i32
  }
  func.func @transform_3(%arg0: i32) -> (i32, i32) {
    %c0_i32 = arith.constant 0 : i32
    %c0_i32_0 = arith.constant 0 : i32
    %c0_i32_1 = arith.constant 0 : i32
    return %c0_i32, %c0_i32_0 : i32, i32
  }
  func.func @transform_4(%arg0: i32) -> (i32, i32, i32) {
    %c0_i32 = arith.constant 0 : i32
    %c0_i32_0 = arith.constant 0 : i32
    %c0_i32_1 = arith.constant 0 : i32
    %c0_i32_2 = arith.constant 0 : i32
    return %c0_i32, %c0_i32_0, %c0_i32_1 : i32, i32, i32
  }
  func.func @transform_5(%arg0: i32) -> (i32, i32, i32) {
    %c0_i32 = arith.constant 0 : i32
    %c0_i32_0 = arith.constant 0 : i32
    %c0_i32_1 = arith.constant 0 : i32
    %c0_i32_2 = arith.constant 0 : i32
    return %c0_i32, %c0_i32_0, %c0_i32_1 : i32, i32, i32
  }
  func.func @transform_6(%arg0: i32) -> (i32, i32, i32, i32) {
    %c0_i32 = arith.constant 0 : i32
    %c0_i32_0 = arith.constant 0 : i32
    %c0_i32_1 = arith.constant 0 : i32
    %c0_i32_2 = arith.constant 0 : i32
    %c0_i32_3 = arith.constant 0 : i32
    return %c0_i32, %c0_i32_0, %c0_i32_1, %c0_i32_2 : i32, i32, i32, i32
  }
  func.func @transform_7(%arg0: i32) -> (i32, i32, i32, i32) {
    %c0_i32 = arith.constant 0 : i32
    %c0_i32_0 = arith.constant 0 : i32
    %c0_i32_1 = arith.constant 0 : i32
    %c0_i32_2 = arith.constant 0 : i32
    %c0_i32_3 = arith.constant 0 : i32
    return %c0_i32, %c0_i32_0, %c0_i32_1, %c0_i32_2 : i32, i32, i32, i32
  }
  func.func @transform_8(%arg0: i32) -> (i32, i32, i32, i32) {
    %c0_i32 = arith.constant 0 : i32
    %c0_i32_0 = arith.constant 0 : i32
    %c0_i32_1 = arith.constant 0 : i32
    %c0_i32_2 = arith.constant 0 : i32
    %c0_i32_3 = arith.constant 0 : i32
    return %c0_i32, %c0_i32_0, %c0_i32_1, %c0_i32_2 : i32, i32, i32, i32
  }
  func.func @transform_9(%arg0: i32) -> (i32, i32, i32, i32) {
    %c0_i32 = arith.constant 0 : i32
    %c0_i32_0 = arith.constant 0 : i32
    %c0_i32_1 = arith.constant 0 : i32
    %c0_i32_2 = arith.constant 0 : i32
    %c0_i32_3 = arith.constant 0 : i32
    return %c0_i32, %c0_i32_0, %c0_i32_1, %c0_i32_2 : i32, i32, i32, i32
  }
  func.func @transform_10(%arg0: i32) -> (i32, i32, i32, i32) {
    %c0_i32 = arith.constant 0 : i32
    %c0_i32_0 = arith.constant 0 : i32
    %c0_i32_1 = arith.constant 0 : i32
    %c0_i32_2 = arith.constant 0 : i32
    %c0_i32_3 = arith.constant 0 : i32
    return %c0_i32, %c0_i32_0, %c0_i32_1, %c0_i32_2 : i32, i32, i32, i32
  }
  func.func @transform_11(%arg0: i32) -> (i32, i32, i32, i32) {
    %c0_i32 = arith.constant 0 : i32
    %c0_i32_0 = arith.constant 0 : i32
    %c0_i32_1 = arith.constant 0 : i32
    %c0_i32_2 = arith.constant 0 : i32
    %c0_i32_3 = arith.constant 0 : i32
    return %c0_i32, %c0_i32_0, %c0_i32_1, %c0_i32_2 : i32, i32, i32, i32
  }
  func.func @transform_12(%arg0: i32) -> (i32, i32) {
    %c0_i32 = arith.constant 0 : i32
    %c0_i32_0 = arith.constant 0 : i32
    %c0_i32_1 = arith.constant 0 : i32
    return %c0_i32, %c0_i32_0 : i32, i32
  }
  func.func @transform_13(%arg0: i32) -> (i32, i32) {
    %c0_i32 = arith.constant 0 : i32
    %c0_i32_0 = arith.constant 0 : i32
    %c0_i32_1 = arith.constant 0 : i32
    return %c0_i32, %c0_i32_0 : i32, i32
  }
  func.func @transform_14(%arg0: i32) -> (i32, i32) {
    %c0_i32 = arith.constant 0 : i32
    %c0_i32_0 = arith.constant 0 : i32
    %c0_i32_1 = arith.constant 0 : i32
    return %c0_i32, %c0_i32_0 : i32, i32
  }
  func.func @transform_15(%arg0: i32) -> (i32, i32) {
    %c0_i32 = arith.constant 0 : i32
    %c0_i32_0 = arith.constant 0 : i32
    %c0_i32_1 = arith.constant 0 : i32
    return %c0_i32, %c0_i32_0 : i32, i32
  }
  func.func @transform_16(%arg0: i32) -> (i32, i32) {
    %c0_i32 = arith.constant 0 : i32
    %c0_i32_0 = arith.constant 0 : i32
    %c0_i32_1 = arith.constant 0 : i32
    return %c0_i32, %c0_i32_0 : i32, i32
  }
}

</mosaic_0001>

<bundles_post_ra>
// kernel: tpu_custom_call.1
= control target key start
LH: loop header
LB: loop body
LE: loop exit
PB: predicated region body
PF: predicated region fallthrough
CT: control target
= control target key end

     0   :  { %s7057_s0 = inlined_call_operand.vmem [shape: f32[12,16], index: 0, kind: input, shape index: {}]   ;;  %s7058_s1 = inlined_call_operand.vmem [shape: f32[8,16], index: 1, kind: input, shape index: {}]   ;;  %s7059_s2 = inlined_call_operand.vmem [shape: f32[12,8], index: 2, kind: input, shape index: {}]   ;;  %s7060_s3 = inlined_call_operand.hbm [shape: f32[8,12], index: 3, kind: input, shape index: {}]   ;;  %s7061_s4 = inlined_call_operand.vmem [shape: f32[2,16,32], index: 4, kind: input, shape index: {}]   ;;  %s7062_s5 = inlined_call_operand.hbm [shape: f32[2,1,32], index: 5, kind: input, shape index: {}]   ;;  %s7063_s6 = inlined_call_operand.hbm [shape: f32[2,2,32,96], index: 6, kind: input, shape index: {}]   ;;  %s7064_s7 = inlined_call_operand.vmem [shape: f32[2,2,1,96], index: 7, kind: input, shape index: {}]   ;;  %s7065_s8 = inlined_call_operand.hbm [shape: f32[2,2,32,32], index: 8, kind: input, shape index: {}]   ;;  %s7066_s9 = inlined_call_operand.vmem [shape: f32[2,2,1,32], index: 9, kind: input, shape index: {}]   ;;  %s7067_s10 = inlined_call_operand.vmem [shape: f32[2,2,1,32], index: 10, kind: input, shape index: {}]   ;;  %s7068_s11 = inlined_call_operand.vmem [shape: f32[2,2,1,32], index: 11, kind: input, shape index: {}]   ;;  %s7069_s12 = inlined_call_operand.vmem [shape: f32[2,2], index: 12, kind: input, shape index: {}]   ;;  %s7070_s13 = inlined_call_operand.vmem [shape: f32[32,8], index: 13, kind: input, shape index: {}]   ;;  %s7071_s14 = inlined_call_operand.vmem [shape: f32[1,8], index: 14, kind: input, shape index: {}]   ;;  %s7072_s15 = inlined_call_operand.vmem [shape: f32[12,8], index: 15, kind: output, shape index: {0}]   ;;  %s7073_s16 = inlined_call_operand.hbm [shape: f32[8,8], index: 16, kind: output, shape index: {1}]  }
   0x1   :  { %7075 = sst [smem:[#allocation15_spill]] %s7057_s0 }
   0x2   :  { %22 = vsyncpa [#allocation3], 0 }
   0x3   :  { %23 = vsyncpa [#allocation6], 0 }
   0x4   :  { %24 = vsyncpa [#allocation9], 0 }
   0x5   :  { %25 = vsyncpa [#allocation4], 0  ;;  %s6251_s21 = smov [#allocation5]  }
   0x6   :  { %s49_s22 = sshll.u32 %s6251_s21, 4  ;;  %s50_s22 = int_to_ptr.vmem [resolvable:$true] %s49_s22 }
   0x7   :  { %s6151_s23 = scalar_lea.vmem %s50_s22, 32  ;;  %p6156_p1 = scmp.lt.s32.totalorder %s50_s22, %s50_s22 }
   0x8   :  { %p6152_p0 = scmp.ne.s32.totalorder %s50_s22, %s6151_s23  ;;  %p6157_p2 = scmp.lt.s32.totalorder %s6151_s23, %s6151_s23 }
   0xa   :  { %p6158_p3 = por %p6157_p2, %p6156_p1 }
   0xc   :  { %p6159_p4 = pnand %p6158_p3, %p6152_p0 }
   0xe   :  { %6162 = shalt.err (!%p6159_p4)
}
   0xf   :  { %s6252_s24 = smov 16   ;;  %s6253_s25 = smov 1  }
  0x10   :  { %55 = dma.hbm_to_vmem [thread:$0]  %s7062_s5, 32, %s50_s22, [#allocation6], %s6252_s24, %s6252_s24, %s6253_s25  }
  0x11   :  { %s6254_s28 = smov [#allocation2]   ;;  %s6255_s30 = smov [#allocation7]  }
  0x12   :  { %s38_s29 = sshll.u32 %s6254_s28, 4  ;;  %s61_s0 = sshll.u32 %s6255_s30, 4  ;;  %s39_s29 = int_to_ptr.vmem [resolvable:$true] %s38_s29  ;;  %s62_s0 = int_to_ptr.vmem [resolvable:$true] %s61_s0 }
  0x13   :  { %s6171_s17 = scalar_lea.vmem %s39_s29, 128  ;;  %p6176_p6 = scmp.lt.s32.totalorder %s39_s29, %s39_s29 }
  0x14   :  { %p6172_p5 = scmp.ne.s32.totalorder %s39_s29, %s6171_s17  ;;  %p6177_p7 = scmp.lt.s32.totalorder %s6171_s17, %s6171_s17 }
  0x16   :  { %p6178_p8 = por %p6177_p7, %p6176_p6 }
  0x18   :  { %p6179_p9 = pnand %p6178_p8, %p6172_p5 }
  0x1a   :  { %6182 = shalt.err (!%p6179_p9)
}
  0x1b   :  { %41 = dma.hbm_to_vmem [thread:$0]  %s7060_s3, 128, %s39_s29, [#allocation3]  }
  0x1c   :  { %s6191_s20 = scalar_lea.vmem %s62_s0, 2048  ;;  %p6196_p11 = scmp.lt.s32.totalorder %s62_s0, %s62_s0 }
  0x1d   :  { %p6192_p10 = scmp.ne.s32.totalorder %s62_s0, %s6191_s20  ;;  %p6197_p12 = scmp.lt.s32.totalorder %s6191_s20, %s6191_s20 }
  0x1f   :  { %p6198_p13 = por %p6197_p12, %p6196_p11 }
  0x21   :  { %p6199_p0 = pnand %p6198_p13, %p6192_p10 }
  0x23   :  { %6202 = shalt.err (!%p6199_p0)
}
  0x24   :  { %s6256_s5 = smov 128   ;;  %s6257_s21 = smov 8  }
  0x25   :  { %67 = dma.hbm_to_vmem [thread:$0]  %s7063_s6, 2048, %s62_s0, [#allocation6], %s6256_s5, %s6256_s5, %s6257_s21  }
  0x26   :  { %s6258_s24 = smov [#allocation8]  }
  0x27   :  { %s75_s25 = sshll.u32 %s6258_s24, 4  ;;  %s76_s25 = int_to_ptr.vmem [resolvable:$true] %s75_s25 }
  0x28   :  { %s6211_s26 = scalar_lea.vmem %s76_s25, 2048  ;;  %p6216_p2 = scmp.lt.s32.totalorder %s76_s25, %s76_s25 }
  0x29   :  { %p6212_p1 = scmp.ne.s32.totalorder %s76_s25, %s6211_s26  ;;  %p6217_p3 = scmp.lt.s32.totalorder %s6211_s26, %s6211_s26 }
  0x2b   :  { %p6218_p4 = por %p6217_p3, %p6216_p2 }
  0x2d   :  { %p6219_p5 = pnand %p6218_p4, %p6212_p1 }
  0x2f   :  { %6222 = shalt.err (!%p6219_p5)
}
  0x30   :  { %81 = dma.hbm_to_vmem [thread:$0]  %s7065_s8, 2048, %s76_s25, [#allocation9], %s6256_s5, %s6256_s5, %s6257_s21  }
  0x31   :  { %6243 = dma.done.wait [#allocation3], 128  }
  0x32   :  { %6244 = vsyncadd [#allocation3], 4294967168 }
  0x33   :  { %6245 = dma.done.wait [#allocation6], 2080  }
  0x34   :  { %6246 = vsyncadd [#allocation6], 4294965216 }
  0x35   :  { %6247 = dma.done.wait [#allocation9], 2048  }
  0x36   :  { %6248 = vsyncadd [#allocation9], 4294965248  ;;  %v6259_v0 = vmov 0.0   ;;  %vm6260_vm0 = vmmov 0   ;;  %v109_v1 = vld [vmem:[%s7061_s4 + $0x8] sm:$0xff]  ;;  %v5303_v2 = vld [vmem:[%s7061_s4 + $0x18] sm:$0xff] }
  0x37   :  { %5634 = vmatprep.subr.mxu1 %v6259_v0  ;;  %5638 = vmatprep.mubr.msk.f32.mxu1 %vm6260_vm0, %v6259_v0  ;;  %v108_v3 = vld [vmem:[%s7061_s4] sm:$0xff]  ;;  %v5302_v4 = vld [vmem:[%s7061_s4 + $0x10] sm:$0xff]  ;;  %s7076_s5 = sld [smem:[#allocation15_spill]]  ;;  %vm117_vm1 = vcmask 130048   ;;  %v5304_v22 = vld [vmem:[#allocation5 + $0x1] ss:$0 sm:$0xff] }
  0x38   :  { %5627 = vmatprep.subr.mxu0 %v109_v1  ;;  %5635 = vmatpush3.msra.mxu1 %v5303_v2  ;;  %v201_v6 = vld [vmem:[%s7058_s1] sm:$0xff]  ;;  %v382_v18 = vld [vmem:[#allocation7 + $0x28] sm:$0xff]  ;;  %v381_v19 = vld [vmem:[#allocation7 + $0x20] sm:$0xff]  ;;  %vm298_vm2 = vcmask 261120   ;;  %s6261_s6 = smov 88   ;;  %vm475_vm3 = vcmask 64512  }
  0x39   :  { %5628 = vmatpush3.msra.mxu0 %v109_v1  ;;  %5636 = vmatprep.subr.mxu1 %v6259_v0  ;;  %v2574_v8 = vld [vmem:[%s7069_s12] sm:$0x1]  ;;  %v384_v14 = vld [vmem:[#allocation7 + $0x38] sm:$0xff]  ;;  %v288_v20 = vld [vmem:[#allocation7 + $0x8] sm:$0xff]  ;;  %s6262_s28 = smov 120   ;;  %s6263_s29 = smov 96  }
  0x3a   :  { %5629 = vmatprep.subr.mxu0 %v108_v3  ;;  %5637 = vmatpush3.msra.mxu1 %v5302_v4  ;;  %v5365_v9 = vmul.f32 -1.442695, %v2574_v8  ;;  %v383_v15 = vld [vmem:[#allocation7 + $0x30] sm:$0xff]  ;;  %v290_v16 = vld [vmem:[#allocation7 + $0x18] sm:$0xff]  ;;  %v287_v21 = vld [vmem:[#allocation7] sm:$0xff]  ;;  %s6264_s30 = smov 80  }
  0x3b   :  { %5630 = vmatpush3.msra.mxu0 %v108_v3  ;;  %5639 = vmatmul.mubr.msk.f32.vlgmr.msra.gmra.mxu1 %vm117_vm1, %v201_v6  ;;  %v289_v17 = vld [vmem:[#allocation7 + $0x10] sm:$0xff]  ;;  %v5299_v23 = vld [vmem:[#allocation5] ss:$0 sm:$0xff]  ;;  %s6265_s8 = smov 112   ;;  %s6266_s0 = smov 72   ;;  %vm823_vm4 = vcmask 60416  }
  0x3c   :  { %6018 = vpow2.f32 %v5365_v9  ;;  %5652 = vmatprep.subr.mxu1 %v6259_v0  ;;  %5660 = vmatprep.mubr.msk.f32.mxu1 %vm6260_vm0, %v6259_v0  ;;  %v5310_v34 = vld [vmem:[%s7064_s7 + $0x1] ss:$0 sm:$0xff]  ;;  %v5306_v37 = vld [vmem:[%s7064_s7] ss:$0 sm:$0xff]  ;;  %s6267_s17 = smov 104   ;;  %s6268_s21 = smov 56  }
  0x3d   :  { %v106_v5 = vld [vmem:[%s7076_s5] sm:$0xff]  ;;  %v107_v7 = vld [vmem:[%s7076_s5 + $0x8] sm:$0xf]  ;;  %5653 = vmatpush3.msra.mxu1 %v384_v14  ;;  %5641 = vmatprep.subr.mxu0 %v290_v16  ;;  %s6269_s22 = smov 48   ;;  %s6270_s23 = smov 64   ;;  %vm1905_vm5 = vcmask 97280  }
  0x3e   :  { %5631 = vmatprep.mubr.msk.f32.mxu0 %vm117_vm1, %v106_v5  ;;  %5654 = vmatprep.subr.mxu1 %v6259_v0  ;;  %v467_v53 = vld [vmem:[%s7059_s2 + $0x8] sm:$0xf]  ;;  %v466_v55 = vld [vmem:[%s7059_s2] sm:$0xff]  ;;  %s6271_s24 = smov 40   ;;  %vm1958_vm6 = vcmask 1043456   ;;  %s6272_s3 = smov 127  }
  0x3f   :  { %5632 = vmatmul.mubr.msk.f32.vlgmr.msra.gmra.mxu0 %vm117_vm1, %v107_v7  ;;  %5655 = vmatpush3.msra.mxu1 %v383_v15  ;;  %vm2599_vm7 = vcmask 257024  }
  0x40   :  { %5642 = vmatpush3.msra.mxu0 %v290_v16  ;;  %5656 = vmatprep.subr.mxu1 %v6259_v0 }
  0x41   :  { %5643 = vmatprep.subr.mxu0 %v289_v17  ;;  %5657 = vmatpush3.msra.mxu1 %v382_v18 }
  0x42   :  { %5644 = vmatpush3.msra.mxu0 %v289_v17  ;;  %5658 = vmatprep.subr.mxu1 %v6259_v0 }
  0x43   :  { %5659 = vmatpush3.msra.mxu1 %v381_v19  ;;  %5645 = vmatprep.subr.mxu0 %v288_v20 }
  0x44   :  { %5646 = vmatpush3.msra.mxu0 %v288_v20 }
  0x45   :  { %5647 = vmatprep.subr.mxu0 %v287_v21 }
  0x46   :  { %5648 = vmatpush3.msra.mxu0 %v287_v21 }
  0x49   :  { %v6019_v10 = vpop.eup %6018 }
  0x4a   :  { %v2578_v11 = vadd.f32 1.0, %v6019_v10 }
  0x4c   :  { %6020 = vrcp.f32 %v2578_v11 }
  0x59   :  { %v6402_v12 = vpop.eup %6020 }
  0x5a   :  { %5979 = vpush %v6402_v12  ;;  %v2587_v13 = vsub.f32 1.0, %v6402_v12 }
  0x5c   :  { %5981 = vpush %v2587_v13 }
  0x8b   :  { %s5980_s25 = spop %5979 }
  0x8d   :  { %s5982_s26 = spop %5981 }
  0xfb   :  { %v282_v24 = vpop.f32.mrf.mxu1 }
  0xfc   :  { %v283_v26 = vadd.f32 %v5304_v22, %v282_v24 }
  0xfd   :  { %v5640_v28 = vpop.f32.mrf.mxu1 }
  0xfe   :  { %6022 = vtanh.f32 %v283_v26 }
  0xff   :  { %v5633_v25 = vpop.f32.mrf.mxu0 }
 0x100   :  { %v196_v27 = vadd.f32 %v5633_v25, %v5299_v23 }
 0x101   :  { %v190_v29 = vpop.f32.mrf.mxu0 }
 0x102   :  { %v191_v30 = vadd.f32 %v5299_v23, %v190_v29 }
 0x104   :  { %6024 = vtanh.f32 %v191_v30 }
 0x105   :  { %6026 = vtanh.f32 %v196_v27 }
 0x10b   :  { %v6411_v31 = vpop.eup %6022 }
 0x10c   :  { %5661 = vmatmul.mubr.msk.f32.vlgmr.msra.gmra.mxu1 %vm298_vm2, %v6411_v31 }
 0x111   :  { %v6415_v32 = vpop.eup %6024 }
 0x112   :  { %v6417_v33 = vpop.eup %6026  ;;  %5649 = vmatprep.mubr.msk.f32.mxu0 %vm298_vm2, %v6415_v32 }
 0x113   :  { %5650 = vmatmul.mubr.msk.f32.vlgmr.msra.gmra.mxu0 %vm298_vm2, %v6417_v33 }
 0x1cc   :  { %v462_v35 = vpop.f32.mrf.mxu1 }
 0x1cd   :  { %v6426_v36 = vadd.f32 %v5310_v34, %v462_v35 }
 0x1ce   :  { %v5662_v38 = vpop.f32.mrf.mxu1 }
 0x1cf   :  { %563 = vrot.lane.b32.xlu0 %v6426_v36, %s6261_s6 }
 0x1d3   :  { %v5651_v39 = vpop.f32.mrf.mxu0 }
 0x1d4   :  { %v6433_v40 = vadd.f32 %v5651_v39, %v5306_v37 }
 0x1d5   :  { %v371_v41 = vpop.f32.mrf.mxu0 }
 0x1d6   :  { %v6435_v42 = vadd.f32 %v5306_v37, %v371_v41  ;;  %561 = vrot.lane.b32.xlu1 %v6433_v40, %s6262_s28 }
 0x1d8   :  { %559 = vrot.lane.b32.xlu0 %v6435_v42, %s6262_s28  ;;  %5665 = vmatprep.mubr.msk.f32.mxu0 %vm475_vm3, %v6435_v42 }
 0x1da   :  { %473 = vrot.lane.b32.xlu1 %v6426_v36, %s6263_s29 }
 0x1dc   :  { %650 = vrot.lane.b32.xlu0 %v6426_v36, %s6264_s30 }
 0x1de   :  { %646 = vrot.lane.b32.xlu1 %v6435_v42, %s6265_s8 }
 0x1e0   :  { %648 = vrot.lane.b32.xlu0 %v6433_v40, %s6265_s8 }
 0x1e2   :  { %737 = vrot.lane.b32.xlu1 %v6426_v36, %s6266_s0 }
 0x1e4   :  { %733 = vrot.lane.b32.xlu0 %v6435_v42, %s6267_s17 }
 0x1e6   :  { %735 = vrot.lane.b32.xlu1 %v6433_v40, %s6267_s17 }
 0x241   :  { %v564_v43 = vpop.permute.xlu0 %563 }
 0x242   :  { %5668 = vmatprep.subr.msk.mxu1 %vm475_vm3, %v564_v43 }
 0x243   :  { %5669 = vmatpush3.xpose.msk.msra.mxu1 %vm475_vm3, %v564_v43 }
 0x248   :  { %v562_v44 = vpop.permute.xlu1 %561 }
 0x24a   :  { %v560_v45 = vpop.permute.xlu0 %559 }
 0x24b   :  { %5670 = vmatprep.mubr.msk.f32.mxu1 %vm475_vm3, %v560_v45 }
 0x24c   :  { %v474_v46 = vpop.permute.xlu1 %473  ;;  %5671 = vmatmul.mubr.msk.f32.vlgmr.msra.gmra.mxu1 %vm475_vm3, %v562_v44 }
 0x24d   :  { %5663 = vmatprep.subr.msk.mxu0 %vm475_vm3, %v474_v46 }
 0x24e   :  { %5664 = vmatpush3.xpose.msk.msra.mxu0 %vm475_vm3, %v474_v46  ;;  %v651_v47 = vpop.permute.xlu0 %650 }
 0x24f   :  { %5673 = vmatprep.subr.msk.mxu0 %vm475_vm3, %v651_v47 }
 0x250   :  { %v647_v48 = vpop.permute.xlu1 %646 }
 0x251   :  { %5666 = vmatmul.mubr.msk.f32.vlgmr.msra.gmra.mxu0 %vm475_vm3, %v6433_v40 }
 0x252   :  { %v649_v49 = vpop.permute.xlu0 %648  ;;  %5674 = vmatpush3.xpose.msk.msra.mxu0 %vm475_vm3, %v651_v47  ;;  %5675 = vmatprep.mubr.msk.f32.mxu0 %vm475_vm3, %v647_v48 }
 0x254   :  { %v738_v50 = vpop.permute.xlu1 %737 }
 0x255   :  { %5676 = vmatmul.mubr.msk.f32.vlgmr.msra.gmra.mxu0 %vm475_vm3, %v649_v49  ;;  %5678 = vmatprep.subr.msk.mxu1 %vm475_vm3, %v738_v50 }
 0x256   :  { %5679 = vmatpush3.xpose.msk.msra.mxu1 %vm475_vm3, %v738_v50  ;;  %v734_v51 = vpop.permute.xlu0 %733 }
 0x257   :  { %5680 = vmatprep.mubr.msk.f32.mxu1 %vm475_vm3, %v734_v51 }
 0x258   :  { %v736_v52 = vpop.permute.xlu1 %735 }
 0x259   :  { %5681 = vmatmul.mubr.msk.f32.vlgmr.msra.gmra.mxu1 %vm475_vm3, %v736_v52 }
 0x30c   :  { %v5672_v54 = vpop.f32.mrf.mxu1 }
 0x30d   :  { %v643_v56 = vadd.f32 %v5672_v54, %v467_v53 }
 0x30e   :  { %v637_v57 = vpop.f32.mrf.mxu1 }
 0x30f   :  { %v638_v58 = vadd.f32 %v637_v57, %v466_v55  ;;  %v830_v59 = vsel %vm823_vm4, %v643_v56, -inf }
 0x310   :  { %831 = vmax.xlane.f32.xlu1 %v830_v59 }
 0x311   :  { %v827_v60 = vsel %vm475_vm3, %v638_v58, -inf  ;;  %v5667_v9 = vpop.f32.mrf.mxu0 }
 0x312   :  { %828 = vmax.xlane.f32.xlu0 %v827_v60  ;;  %v556_v19 = vadd.f32 %v5667_v9, %v467_v53 }
 0x313   :  { %v550_v15 = vpop.f32.mrf.mxu0 }
 0x314   :  { %v551_v16 = vadd.f32 %v550_v15, %v466_v55  ;;  %v824_v23 = vsel %vm823_vm4, %v556_v19, -inf }
 0x315   :  { %v5677_v18 = vpop.f32.mrf.mxu0 }
 0x316   :  { %v820_v20 = vsel %vm475_vm3, %v551_v16, -inf  ;;  %v730_v24 = vadd.f32 %v5677_v18, %v467_v53 }
 0x317   :  { %v724_v21 = vpop.f32.mrf.mxu0 }
 0x318   :  { %v725_v22 = vadd.f32 %v724_v21, %v466_v55  ;;  %v836_v27 = vsel %vm823_vm4, %v730_v24, -inf }
 0x319   :  { %v5682_v61 = vpop.f32.mrf.mxu1 }
 0x31a   :  { %v833_v25 = vsel %vm475_vm3, %v725_v22, -inf  ;;  %v817_v26 = vadd.f32 %v5682_v61, %v467_v53 }
 0x31b   :  { %v811_v62 = vpop.f32.mrf.mxu1 }
 0x31c   :  { %v6483_v63 = vadd.f32 %v811_v62, %v466_v55  ;;  %v842_v28 = vsel %vm823_vm4, %v817_v26, -inf }
 0x31e   :  { %v839_v1 = vsel %vm475_vm3, %v6483_v63, -inf }
 0x321   :  { %993 = vrot.lane.b32.xlu1 %v6426_v36, %s6268_s21 }
 0x345   :  { %840 = vmax.xlane.f32.xlu1 %v839_v1 }
 0x356   :  { %1239 = vrot.lane.b32.xlu1 %v6426_v36, %s6269_s22 }
 0x35a   :  { %1663 = vrot.lane.b32.xlu1 %v6433_v40, %s6261_s6 }
 0x35e   :  { %1659 = vrot.lane.b32.xlu1 %v6426_v36, %s6262_s28 }
 0x362   :  { %1579 = vrot.lane.b32.xlu1 %v6435_v42, %s6263_s29 }
 0x366   :  { %1743 = vrot.lane.b32.xlu1 %v6435_v42, %s6264_s30 }
 0x36a   :  { %1741 = vrot.lane.b32.xlu1 %v6426_v36, %s6265_s8 }
 0x36e   :  { %1823 = vrot.lane.b32.xlu1 %v6426_v36, %s6267_s17 }
 0x399   :  { %v832_v2 = vpop.xlane.xlu1 %831 }
 0x39a   :  { %v848_v3 = vsub.f32 %v643_v56, %v832_v2 }
 0x39b   :  { %v829_v4 = vpop.xlane.xlu0 %828 }
 0x39c   :  { %v847_v5 = vsub.f32 %v638_v58, %v829_v4  ;;  %v859_v7 = vmul.f32 1.442695, %v848_v3 }
 0x39d   :  { %v994_v6 = vpop.permute.xlu1 %993 }
 0x39e   :  { %v857_v8 = vmul.f32 1.442695, %v847_v5  ;;  %5688 = vmatprep.subr.mxu1 %v994_v6 }
 0x39f   :  { %5689 = vmatpush3.msra.mxu1 %v994_v6 }
 0x3a0   :  { %6028 = vpow2.f32 %v857_v8 }
 0x3a1   :  { %6030 = vpow2.f32 %v859_v7 }
 0x3ad   :  { %v6029_v10 = vpop.eup %6028 }
 0x3ae   :  { %v875_v11 = vsel %vm475_vm3, %v6029_v10, 0.0  ;;  %v6031_v14 = vpop.eup %6030 }
 0x3af   :  { %876 = vadd.xlane.f32.xlu0 %v875_v11  ;;  %v878_v17 = vsel %vm823_vm4, %v6031_v14, 0.0 }
 0x3b3   :  { %879 = vadd.xlane.f32.xlu0 %v878_v17 }
 0x3b7   :  { %821 = vmax.xlane.f32.xlu0 %v820_v20 }
 0x3bb   :  { %825 = vmax.xlane.f32.xlu0 %v824_v23 }
 0x3bf   :  { %834 = vmax.xlane.f32.xlu0 %v833_v25 }
 0x3c3   :  { %837 = vmax.xlane.f32.xlu0 %v836_v27 }
 0x3c7   :  { %843 = vmax.xlane.f32.xlu0 %v842_v28 }
 0x3ce   :  { %v841_v61 = vpop.xlane.xlu1 %840 }
 0x3cf   :  { %v851_v62 = vsub.f32 %v6483_v63, %v841_v61 }
 0x3d1   :  { %v865_v2 = vmul.f32 1.442695, %v851_v62 }
 0x438   :  { %v877_v29 = vpop.xlane.xlu0 %876 }
 0x439   :  { %6032 = vrcp.f32 %v877_v29 }
 0x43c   :  { %v880_v30 = vpop.xlane.xlu0 %879 }
 0x43d   :  { %6034 = vrcp.f32 %v880_v30 }
 0x440   :  { %v822_v34 = vpop.xlane.xlu0 %821 }
 0x441   :  { %v845_v35 = vsub.f32 %v551_v16, %v822_v34  ;;  %v469_v16 = vld [vmem:[#allocation8 + $0x8] sm:$0xff] }
 0x443   :  { %v853_v37 = vmul.f32 1.442695, %v845_v35 }
 0x444   :  { %v826_v38 = vpop.xlane.xlu0 %825 }
 0x445   :  { %6036 = vpow2.f32 %v853_v37  ;;  %v846_v39 = vsub.f32 %v556_v19, %v826_v38  ;;  %v1240_v19 = vpop.permute.xlu1 %1239  ;;  %v468_v38 = vld [vmem:[#allocation8] sm:$0xff] }
 0x446   :  { %v6033_v41 = vpop.eup %6032  ;;  %5698 = vmatprep.subr.mxu1 %v468_v38 }
 0x447   :  { %v855_v43 = vmul.f32 1.442695, %v846_v39  ;;  %v898_v44 = vmul.f32 %v6033_v41, %v6029_v10 }
 0x448   :  { %v835_v45 = vpop.xlane.xlu0 %834 }
 0x449   :  { %6038 = vpow2.f32 %v855_v43  ;;  %5690 = vmatprep.mubr.msk.f32.mxu1 %vm475_vm3, %v898_v44  ;;  %v849_v57 = vsub.f32 %v725_v22, %v835_v45  ;;  %v1664_v30 = vpop.permute.xlu1 %1663 }
 0x44a   :  { %v6035_v46 = vpop.eup %6034 }
 0x44b   :  { %v900_v47 = vmul.f32 %v6035_v46, %v6031_v14  ;;  %v861_v59 = vmul.f32 1.442695, %v849_v57 }
 0x44c   :  { %v838_v48 = vpop.xlane.xlu0 %837 }
 0x44d   :  { %v850_v49 = vsub.f32 %v730_v24, %v838_v48  ;;  %5691 = vmatmul.mubr.msk.f32.vlgmr.msra.gmra.mxu1 %vm475_vm3, %v900_v47  ;;  %v1660_v39 = vpop.permute.xlu1 %1659 }
 0x44e   :  { %5699 = vmatpush3.msra.mxu1 %v468_v38 }
 0x44f   :  { %v863_v50 = vmul.f32 1.442695, %v850_v49  ;;  %v470_v49 = vld [vmem:[#allocation8 + $0x10] sm:$0xff] }
 0x450   :  { %v844_v58 = vpop.xlane.xlu0 %843  ;;  %5708 = vmatprep.subr.mxu1 %v470_v49 }
 0x451   :  { %6040 = vpow2.f32 %v863_v50  ;;  %v852_v60 = vsub.f32 %v817_v26, %v844_v58  ;;  %v1580_v45 = vpop.permute.xlu1 %1579 }
 0x452   :  { %v6037_v51 = vpop.eup %6036  ;;  %6042 = vpow2.f32 %v861_v59 }
 0x453   :  { %v869_v52 = vsel %vm475_vm3, %v6037_v51, 0.0  ;;  %v867_v1 = vmul.f32 1.442695, %v852_v60 }
 0x454   :  { %870 = vadd.xlane.f32.xlu0 %v869_v52 }
 0x455   :  { %6044 = vpow2.f32 %v867_v1  ;;  %v1744_v47 = vpop.permute.xlu1 %1743 }
 0x456   :  { %v6039_v53 = vpop.eup %6038  ;;  %6046 = vpow2.f32 %v865_v2 }
 0x457   :  { %v872_v54 = vsel %vm823_vm4, %v6039_v53, 0.0 }
 0x458   :  { %873 = vadd.xlane.f32.xlu0 %v872_v54 }
 0x459   :  { %v1742_v48 = vpop.permute.xlu1 %1741 }
 0x45d   :  { %v1824_v2 = vpop.permute.xlu1 %1823 }
 0x45e   :  { %v6512_v55 = vpop.eup %6040 }
 0x45f   :  { %v884_v56 = vsel %vm823_vm4, %v6512_v55, 0.0  ;;  %v6043_v3 = vpop.eup %6042 }
 0x460   :  { %885 = vadd.xlane.f32.xlu0 %v884_v56  ;;  %v881_v4 = vsel %vm475_vm3, %v6043_v3, 0.0 }
 0x462   :  { %v6520_v5 = vpop.eup %6044 }
 0x463   :  { %v890_v6 = vsel %vm823_vm4, %v6520_v5, 0.0  ;;  %v6047_v7 = vpop.eup %6046 }
 0x464   :  { %v887_v8 = vsel %vm475_vm3, %v6047_v7, 0.0 }
 0x476   :  { %909 = vrot.lane.b32.xlu0 %v6426_v36, %s6270_s23 }
 0x495   :  { %882 = vadd.xlane.f32.xlu0 %v881_v4 }
 0x499   :  { %891 = vadd.xlane.f32.xlu0 %v890_v6 }
 0x49d   :  { %888 = vadd.xlane.f32.xlu0 %v887_v8 }
 0x4b3   :  { %1406 = vrot.lane.b32.xlu0 %v6426_v36, %s6271_s24 }
 0x4b7   :  { %1661 = vrot.lane.b32.xlu0 %v6435_v42, %s6261_s6 }
 0x4bb   :  { %1581 = vrot.lane.b32.xlu0 %v6433_v40, %s6263_s29 }
 0x4bf   :  { %1745 = vrot.lane.b32.xlu0 %v6433_v40, %s6264_s30 }
 0x4c3   :  { %1827 = vrot.lane.b32.xlu0 %v6433_v40, %s6266_s0 }
 0x4c7   :  { %1825 = vrot.lane.b32.xlu0 %v6435_v42, %s6266_s0 }
 0x4dd   :  { %v871_v63 = vpop.xlane.xlu0 %870 }
 0x4de   :  { %6048 = vrcp.f32 %v871_v63 }
 0x4e1   :  { %v874_v9 = vpop.xlane.xlu0 %873 }
 0x4e2   :  { %6050 = vrcp.f32 %v874_v9 }
 0x4e9   :  { %v886_v10 = vpop.xlane.xlu0 %885 }
 0x4ea   :  { %6052 = vrcp.f32 %v886_v10 }
 0x4eb   :  { %v6049_v11 = vpop.eup %6048 }
 0x4ec   :  { %v894_v14 = vmul.f32 %v6049_v11, %v6037_v51  ;;  %v471_v51 = vld [vmem:[#allocation8 + $0x18] sm:$0xff]  ;;  %v5364_v11 = vld [vmem:[%s7066_s9] ss:$0 sm:$0xff] }
 0x4ed   :  { %v910_v15 = vpop.permute.xlu0 %909 }
 0x4ee   :  { %5683 = vmatprep.subr.mxu0 %v910_v15  ;;  %5685 = vmatprep.mubr.msk.f32.mxu0 %vm475_vm3, %v894_v14 }
 0x4ef   :  { %v6051_v17 = vpop.eup %6050  ;;  %5684 = vmatpush3.msra.mxu0 %v910_v15  ;;  %v2583_v15 = vstv %s5980_s25 }
 0x4f0   :  { %5693 = vmatprep.subr.mxu0 %v469_v16  ;;  %v896_v18 = vmul.f32 %v6051_v17, %v6039_v53 }
 0x4f2   :  { %5686 = vmatmul.mubr.msk.f32.vlgmr.msra.gmra.mxu0 %vm475_vm3, %v896_v18 }
 0x4f3   :  { %5694 = vmatpush3.msra.mxu0 %v469_v16  ;;  %v2590_v16 = vstv %s5982_s26 }
 0x4f4   :  { %5703 = vmatprep.subr.mxu0 %v1240_v19 }
 0x4f7   :  { %v6053_v26 = vpop.eup %6052 }
 0x4f8   :  { %v904_v29 = vmul.f32 %v6053_v26, %v6512_v55  ;;  %v1573_v26 = vld [vmem:[#allocation2] sm:$0xff] }
 0x50d   :  { %v5692_v20 = vpop.f32.mrf.mxu1 }
 0x50f   :  { %v1068_v21 = vpop.f32.mrf.mxu1 }
 0x510   :  { %5695 = vmatprep.mubr.msk.f32.mxu0 %vm475_vm3, %v1068_v21 }
 0x511   :  { %5696 = vmatmul.mubr.msk.f32.vlgmr.msra.gmra.mxu0 %vm475_vm3, %v5692_v20  ;;  %v2593_v20 = vmul.f32 %v6417_v33, %v2590_v16 }
 0x512   :  { %5704 = vmatpush3.msra.mxu0 %v1240_v19 }
 0x51e   :  { %v883_v22 = vpop.xlane.xlu0 %882 }
 0x51f   :  { %6054 = vrcp.f32 %v883_v22 }
 0x522   :  { %v892_v23 = vpop.xlane.xlu0 %891 }
 0x523   :  { %6056 = vrcp.f32 %v892_v23  ;;  %v2592_v23 = vmul.f32 %v6415_v32, %v2590_v16 }
 0x526   :  { %v889_v24 = vpop.xlane.xlu0 %888 }
 0x527   :  { %6058 = vrcp.f32 %v889_v24 }
 0x52a   :  { %v1407_v25 = vpop.permute.xlu0 %1406 }
 0x52b   :  { %5713 = vmatprep.subr.mxu0 %v1407_v25 }
 0x52c   :  { %v6055_v27 = vpop.eup %6054 }
 0x52d   :  { %v902_v28 = vmul.f32 %v6055_v27, %v6043_v3 }
 0x52e   :  { %v1662_v34 = vpop.permute.xlu0 %1661 }
 0x52f   :  { %5705 = vmatprep.mubr.msk.f32.mxu0 %vm475_vm3, %v902_v28 }
 0x530   :  { %5706 = vmatmul.mubr.msk.f32.vlgmr.msra.gmra.mxu0 %vm475_vm3, %v904_v29  ;;  %v6057_v35 = vpop.eup %6056 }
 0x531   :  { %5714 = vmatpush3.msra.mxu0 %v1407_v25  ;;  %v908_v43 = vmul.f32 %v6057_v35, %v6520_v5 }
 0x532   :  { %5723 = vmatprep.subr.mxu0 %v6259_v0  ;;  %v1582_v44 = vpop.permute.xlu0 %1581 }
 0x534   :  { %v6059_v37 = vpop.eup %6058 }
 0x535   :  { %v906_v41 = vmul.f32 %v6059_v37, %v6047_v7 }
 0x536   :  { %v1746_v46 = vpop.permute.xlu0 %1745 }
 0x537   :  { %5715 = vmatprep.mubr.msk.f32.mxu0 %vm475_vm3, %v906_v41 }
 0x538   :  { %5716 = vmatmul.mubr.msk.f32.vlgmr.msra.gmra.mxu0 %vm475_vm3, %v908_v43 }
 0x539   :  { %5724 = vmatpush3.xpose.msk.msra.mxu0 %vm475_vm3, %v1582_v44  ;;  %5727 = vmatprep.mubr.msk.f32.mxu0 %vm6260_vm0, %v6259_v0 }
 0x53a   :  { %5725 = vmatprep.subr.mxu0 %v6259_v0  ;;  %v1828_v59 = vpop.permute.xlu0 %1827 }
 0x53d   :  { %5726 = vmatpush3.xpose.msk.msra.mxu0 %vm475_vm3, %v1580_v45 }
 0x53e   :  { %5737 = vmatprep.subr.mxu0 %v6259_v0  ;;  %v1826_v61 = vpop.permute.xlu0 %1825 }
 0x540   :  { %5728 = vmatmul.mubr.msk.f32.vlgmr.msra.gmra.mxu0 %vm475_vm3, %v6426_v36 }
 0x541   :  { %5738 = vmatpush3.xpose.msk.msra.mxu0 %vm475_vm3, %v1746_v46  ;;  %5741 = vmatprep.mubr.msk.f32.mxu0 %vm6260_vm0, %v6259_v0 }
 0x542   :  { %5739 = vmatprep.subr.mxu0 %v6259_v0 }
 0x545   :  { %5740 = vmatpush3.xpose.msk.msra.mxu0 %vm475_vm3, %v1744_v47 }
 0x546   :  { %5751 = vmatprep.subr.mxu0 %v6259_v0 }
 0x548   :  { %5742 = vmatmul.mubr.msk.f32.vlgmr.msra.gmra.mxu0 %vm475_vm3, %v1742_v48 }
 0x549   :  { %5755 = vmatprep.mubr.msk.f32.mxu0 %vm6260_vm0, %v6259_v0 }
 0x5b2   :  { %v5687_v36 = vpop.f32.mrf.mxu0 }
 0x5b4   :  { %v984_v50 = vpop.f32.mrf.mxu0 }
 0x5b5   :  { %5700 = vmatprep.mubr.msk.f32.mxu1 %vm475_vm3, %v984_v50 }
 0x5b6   :  { %5701 = vmatmul.mubr.msk.f32.vlgmr.msra.gmra.mxu1 %vm475_vm3, %v5687_v36 }
 0x5b7   :  { %5709 = vmatpush3.msra.mxu1 %v470_v49 }
 0x5b8   :  { %5718 = vmatprep.subr.mxu1 %v471_v51 }
 0x5d1   :  { %v5697_v52 = vpop.f32.mrf.mxu0 }
 0x5d3   :  { %v1149_v53 = vpop.f32.mrf.mxu0 }
 0x5f0   :  { %v5707_v54 = vpop.f32.mrf.mxu0 }
 0x5f2   :  { %v1314_v55 = vpop.f32.mrf.mxu0 }
 0x5f3   :  { %5710 = vmatprep.mubr.msk.f32.mxu1 %vm475_vm3, %v1314_v55 }
 0x5f4   :  { %5711 = vmatmul.mubr.msk.f32.vlgmr.msra.gmra.mxu1 %vm475_vm3, %v5707_v54 }
 0x5f5   :  { %5719 = vmatpush3.msra.mxu1 %v471_v51 }
 0x5f6   :  { %5730 = vmatprep.subr.mxu1 %v6259_v0 }
 0x5f8   :  { %v5717_v56 = vpop.f32.mrf.mxu0 }
 0x5fa   :  { %v1481_v57 = vpop.f32.mrf.mxu0 }
 0x5fb   :  { %5720 = vmatprep.mubr.msk.f32.mxu1 %vm475_vm3, %v1481_v57 }
 0x5fc   :  { %5721 = vmatmul.mubr.msk.f32.vlgmr.msra.gmra.mxu1 %vm475_vm3, %v5717_v56 }
 0x5fd   :  { %5731 = vmatpush3.xpose.msk.msra.mxu1 %vm475_vm3, %v1664_v30  ;;  %5734 = vmatprep.mubr.msk.f32.mxu1 %vm6260_vm0, %v6259_v0 }
 0x5fe   :  { %5732 = vmatprep.subr.mxu1 %v6259_v0 }
 0x600   :  { %v1655_v58 = vpop.f32.mrf.mxu0 }
 0x601   :  { %5733 = vmatpush3.xpose.msk.msra.mxu1 %vm475_vm3, %v1662_v34  ;;  %v1656_v33 = vadd.f32 %v1655_v58, %v1573_v26 }
 0x602   :  { %v5729_v60 = vpop.f32.mrf.mxu0  ;;  %5744 = vmatprep.subr.mxu1 %v6259_v0 }
 0x603   :  { %v1906_v38 = vsel %vm1905_vm5, %v1656_v33, -inf }
 0x604   :  { %5735 = vmatmul.mubr.msk.f32.vlgmr.msra.gmra.mxu1 %vm475_vm3, %v1660_v39 }
 0x605   :  { %5745 = vmatpush3.xpose.msk.msra.mxu1 %vm475_vm3, %v1828_v59  ;;  %5748 = vmatprep.mubr.msk.f32.mxu1 %vm6260_vm0, %v6259_v0 }
 0x606   :  { %5746 = vmatprep.subr.mxu1 %v6259_v0 }
 0x608   :  { %v6583_v62 = vpop.f32.mrf.mxu0 }
 0x609   :  { %5747 = vmatpush3.xpose.msk.msra.mxu1 %vm475_vm3, %v1826_v61  ;;  %v1820_v50 = vadd.f32 %v6583_v62, %v1573_v26 }
 0x60a   :  { %v5743_v1 = vpop.f32.mrf.mxu0  ;;  %5758 = vmatprep.subr.mxu1 %v6259_v0 }
 0x60c   :  { %5749 = vmatmul.mubr.msk.f32.vlgmr.msra.gmra.mxu1 %vm475_vm3, %v1824_v2 }
 0x60d   :  { %5762 = vmatprep.mubr.msk.f32.mxu1 %vm6260_vm0, %v6259_v0 }
 0x676   :  { %v5702_v3 = vpop.f32.mrf.mxu1 }
 0x677   :  { %v1236_v5 = vadd.f32 %v5702_v3, %v5697_v52  ;;  %v1912_v52 = vsel %vm1905_vm5, %v1820_v50, -inf }
 0x678   :  { %v1230_v4 = vpop.f32.mrf.mxu1 }
 0x679   :  { %v1231_v7 = vadd.f32 %v1230_v4, %v1149_v53 }
 0x6b4   :  { %v5712_v6 = vpop.f32.mrf.mxu1 }
 0x6b5   :  { %v1405_v8 = vadd.f32 %v5712_v6, %v1236_v5 }
 0x6b6   :  { %v1395_v63 = vpop.f32.mrf.mxu1 }
 0x6b7   :  { %v1404_v9 = vadd.f32 %v1395_v63, %v1231_v7 }
 0x6bc   :  { %v5722_v10 = vpop.f32.mrf.mxu1 }
 0x6bd   :  { %v1572_v14 = vadd.f32 %v5722_v10, %v1405_v8 }
 0x6be   :  { %v1562_v17 = vpop.f32.mrf.mxu1 }
 0x6bf   :  { %v2573_v18 = vadd.f32 %v5364_v11, %v1572_v14  ;;  %v1571_v19 = vadd.f32 %v1562_v17, %v1404_v9 }
 0x6c1   :  { %v2572_v21 = vadd.f32 %v5364_v11, %v1571_v19  ;;  %v2586_v22 = vmul.f32 %v2583_v15, %v2573_v18 }
 0x6c3   :  { %v2585_v24 = vmul.f32 %v2583_v15, %v2572_v21  ;;  %v6595_v25 = vadd.f32 %v2593_v20, %v2586_v22  ;;  %v4978_v20 = vld [vmem:[%s7069_s12 + $0x1] sm:$0x1] }
 0x6c4   :  { %v1737_v27 = vpop.f32.mrf.mxu1  ;;  %v5435_v21 = vmul.f32 -1.442695, %v4978_v20 }
 0x6c5   :  { %v1738_v28 = vadd.f32 %v1737_v27, %v1573_v26  ;;  %v6597_v29 = vadd.f32 %v2592_v23, %v2585_v24  ;;  %v2600_v2 = vsel %vm2599_vm7, %v6595_v25, 0.0 }
 0x6c6   :  { %v5736_v30 = vpop.f32.mrf.mxu1 }
 0x6c7   :  { %v1909_v34 = vsel %vm1905_vm5, %v1738_v28, -inf  ;;  %v2596_v1 = vsel %vm298_vm2, %v6597_v29, 0.0  ;;  %v1576_v30 = vld [vmem:[#allocation8 + $0x28] sm:$0xff] }
 0x6c8   :  { %1910 = vmax.xlane.f32.xlu0 %v1909_v34 }
 0x6cc   :  { %v1901_v35 = vpop.f32.mrf.mxu1 }
 0x6cd   :  { %v1902_v32 = vadd.f32 %v1901_v35, %v1573_v26 }
 0x6ce   :  { %v5750_v37 = vpop.f32.mrf.mxu1 }
 0x6cf   :  { %v1915_v39 = vsel %vm1905_vm5, %v1902_v32, -inf }
 0x6de   :  { %2033 = vrot.lane.b32.xlu0 %v6433_v40, %s6268_s21 }
 0x6fd   :  { %1907 = vmax.xlane.f32.xlu0 %v1906_v38 }
 0x701   :  { %1916 = vmax.xlane.f32.xlu0 %v1915_v39 }
 0x751   :  { %v1911_v41 = vpop.xlane.xlu0 %1910 }
 0x752   :  { %v1919_v43 = vsub.f32 %v1738_v28, %v1911_v41  ;;  %v2699_v41 = vld [vmem:[#allocation7 + $0x58] sm:$0xff] }
 0x754   :  { %v1924_v44 = vmul.f32 1.442695, %v1919_v43 }
 0x755   :  { %v2034_v45 = vpop.permute.xlu0 %2033 }
 0x756   :  { %6060 = vpow2.f32 %v1924_v44  ;;  %5759 = vmatpush3.msk.msra.mxu1 %vm1958_vm6, %v2034_v45 }
 0x757   :  { %5760 = vmatprep.subr.mxu1 %v6259_v0 }
 0x763   :  { %v6061_v46 = vpop.eup %6060 }
 0x764   :  { %v1933_v47 = vsel %vm1905_vm5, %v6061_v46, 0.0 }
 0x765   :  { %1934 = vadd.xlane.f32.xlu1 %v1933_v47  ;;  %v2697_v47 = vld [vmem:[#allocation7 + $0x48] sm:$0xff] }
 0x776   :  { %2031 = vrot.lane.b32.xlu1 %v6435_v42, %s6268_s21 }
 0x786   :  { %v1908_v48 = vpop.xlane.xlu0 %1907 }
 0x787   :  { %v1918_v49 = vsub.f32 %v1656_v33, %v1908_v48  ;;  %v2696_v48 = vld [vmem:[#allocation7 + $0x40] sm:$0xff] }
 0x789   :  { %v1922_v36 = vmul.f32 1.442695, %v1918_v49  ;;  %v1575_v49 = vld [vmem:[#allocation8 + $0x20] sm:$0xff] }
 0x78a   :  { %v1917_v54 = vpop.xlane.xlu0 %1916 }
 0x78b   :  { %6062 = vpow2.f32 %v1922_v36  ;;  %v1921_v55 = vsub.f32 %v1902_v32, %v1917_v54 }
 0x78d   :  { %v1928_v56 = vmul.f32 1.442695, %v1921_v55 }
 0x78f   :  { %6064 = vpow2.f32 %v1928_v56  ;;  %v5366_v56 = vld [vmem:[%s7067_s10] ss:$0 sm:$0xff] }
 0x798   :  { %v6610_v51 = vpop.eup %6062 }
 0x799   :  { %v1930_v53 = vsel %vm1905_vm5, %v6610_v51, 0.0 }
 0x79a   :  { %1913 = vmax.xlane.f32.xlu1 %v1912_v52  ;;  %1931 = vadd.xlane.f32.xlu0 %v1930_v53 }
 0x79c   :  { %v6617_v57 = vpop.eup %6064 }
 0x79d   :  { %v1939_v58 = vsel %vm1905_vm5, %v6617_v57, 0.0 }
 0x7b0   :  { %1950 = vrot.lane.b32.xlu0 %v6435_v42, %s6270_s23 }
 0x7cf   :  { %1940 = vadd.xlane.f32.xlu0 %v1939_v58  ;;  %v5367_v58 = vld [vmem:[%s7068_s11] ss:$0 sm:$0xff] }
 0x7e5   :  { %2413 = vrot.lane.b32.xlu0 %v6433_v40, %s6271_s24 }
 0x7e9   :  { %2651 = vrot.lane.b32.xlu0 %v6402_v12, %s6272_s3 }
 0x7ee   :  { %v1935_v59 = vpop.xlane.xlu1 %1934 }
 0x7ef   :  { %6066 = vrcp.f32 %v1935_v59 }
 0x7f2   :  { %v2032_v60 = vpop.permute.xlu1 %2031 }
 0x7f3   :  { %5761 = vmatpush3.msra.mxu1 %v2032_v60 }
 0x7f4   :  { %5770 = vmatprep.subr.mxu1 %v6259_v0 }
 0x7fc   :  { %v6067_v61 = vpop.eup %6066 }
 0x7fd   :  { %v1945_v62 = vmul.f32 %v6067_v61, %v6061_v46  ;;  %v2698_v46 = vld [vmem:[#allocation7 + $0x50] sm:$0xff] }
 0x7ff   :  { %5763 = vmatmul.mubr.msk.f32.vlgmr.msra.gmra.mxu1 %vm1905_vm5, %v1945_v62 }
 0x800   :  { %5772 = vmatprep.mubr.msk.f32.mxu1 %vm6260_vm0, %v6259_v0  ;;  %5771 = vmatpush3.msra.mxu1 %v1575_v49 }
 0x801   :  { %5782 = vmatprep.subr.mxu1 %v6259_v0 }
 0x808   :  { %2597 = vadd.xlane.f32.xlu0 %v2596_v1 }
 0x80c   :  { %2601 = vadd.xlane.f32.xlu0 %v2600_v2 }
 0x823   :  { %v1914_v3 = vpop.xlane.xlu1 %1913  ;;  %v1932_v8 = vpop.xlane.xlu0 %1931 }
 0x824   :  { %v1920_v4 = vsub.f32 %v1820_v50, %v1914_v3 }
 0x826   :  { %v1926_v5 = vmul.f32 1.442695, %v1920_v4 }
 0x827   :  { %v1951_v63 = vpop.permute.xlu0 %1950 }
 0x828   :  { %6068 = vpow2.f32 %v1926_v5  ;;  %v1577_v5 = vld [vmem:[#allocation8 + $0x30] sm:$0xff] }
 0x829   :  { %6070 = vpow2.f32 %v5435_v21 }
 0x82a   :  { %6072 = vrcp.f32 %v1932_v8 }
 0x835   :  { %v6069_v6 = vpop.eup %6068 }
 0x836   :  { %v1936_v7 = vsel %vm1905_vm5, %v6069_v6, 0.0  ;;  %v6071_v22 = vpop.eup %6070 }
 0x837   :  { %1937 = vadd.xlane.f32.xlu1 %v1936_v7  ;;  %v4982_v24 = vadd.f32 1.0, %v6071_v22  ;;  %v6073_v27 = vpop.eup %6072 }
 0x848   :  { %1952 = vrot.lane.b32.xlu1 %v6433_v40, %s6270_s23 }
 0x84c   :  { %2259 = vrot.lane.b32.xlu1 %v6433_v40, %s6269_s22 }
 0x850   :  { %2257 = vrot.lane.b32.xlu1 %v6435_v42, %s6269_s22 }
 0x854   :  { %2411 = vrot.lane.b32.xlu1 %v6435_v42, %s6271_s24 }
 0x858   :  { %v1941_v9 = vpop.xlane.xlu0 %1940  ;;  %2657 = vrot.lane.b32.xlu1 %v2587_v13, %s6272_s3 }
 0x85c   :  { %v2414_v10 = vpop.permute.xlu0 %2413 }
 0x860   :  { %v2652_v11 = vpop.permute.xlu0 %2651 }
 0x861   :  { %5983 = vpush %v2652_v11 }
 0x891   :  { %v2598_v14 = vpop.xlane.xlu0 %2597 }
 0x892   :  { %v2604_v15 = vmul.f32 0.03125, %v2598_v14  ;;  %s6692_s20 = spop %5983 }
 0x894   :  { %v6646_v40 = vsub.f32 %v6597_v29, %v2604_v15  ;;  %v1943_v29 = vmul.f32 %v6073_v27, %v6610_v51 }
 0x895   :  { %v2602_v16 = vpop.xlane.xlu0 %2601 }
 0x896   :  { %v2605_v17 = vmul.f32 0.03125, %v2602_v16  ;;  %v2608_v18 = vmul.f32 %v6646_v40, %v6646_v40 }
 0x898   :  { %v6651_v42 = vsub.f32 %v6595_v25, %v2605_v17  ;;  %v2610_v19 = vsel %vm298_vm2, %v2608_v18, 0.0 }
 0x899   :  { %2611 = vadd.xlane.f32.xlu0 %v2610_v19 }
 0x89a   :  { %v2609_v12 = vmul.f32 %v6651_v42, %v6651_v42 }
 0x89c   :  { %v2613_v13 = vsel %vm2599_vm7, %v2609_v12, 0.0 }
 0x89d   :  { %2614 = vadd.xlane.f32.xlu0 %v2613_v13 }
 0x8bf   :  { %v2107_v23 = vpop.f32.mrf.mxu1 }
 0x8c0   :  { %v1938_v25 = vpop.xlane.xlu1 %1937 }
 0x8c1   :  { %6074 = vrcp.f32 %v1938_v25  ;;  %v5764_v26 = vpop.f32.mrf.mxu1 }
 0x8c2   :  { %6076 = vrcp.f32 %v1941_v9  ;;  %v1578_v9 = vld [vmem:[#allocation8 + $0x38] sm:$0xff]  ;;  %v2654_v26 = vstv %s6692_s20 }
 0x8c3   :  { %6078 = vrcp.f32 %v4982_v24  ;;  %v5369_v24 = vld [vmem:[%s7066_s9 + $0x1] ss:$0 sm:$0xff] }
 0x8c4   :  { %v1953_v28 = vpop.permute.xlu1 %1952 }
 0x8c5   :  { %5752 = vmatpush3.msk.msra.mxu0 %vm1958_vm6, %v1953_v28 }
 0x8c6   :  { %5753 = vmatprep.subr.mxu0 %v6259_v0 }
 0x8c7   :  { %5754 = vmatpush3.msra.mxu0 %v1951_v63 }
 0x8c8   :  { %v2260_v34 = vpop.permute.xlu1 %2259  ;;  %5756 = vmatmul.mubr.msk.f32.vlgmr.msra.gmra.mxu0 %vm1905_vm5, %v1943_v29  ;;  %5765 = vmatprep.subr.mxu0 %v6259_v0 }
 0x8c9   :  { %5766 = vmatpush3.msra.mxu0 %v1576_v30  ;;  %5767 = vmatprep.mubr.msk.f32.mxu0 %vm6260_vm0, %v6259_v0 }
 0x8ca   :  { %5775 = vmatprep.subr.mxu0 %v6259_v0 }
 0x8cc   :  { %v2258_v35 = vpop.permute.xlu1 %2257  ;;  %5768 = vmatmul.mubr.msk.f32.vlgmr.msra.gmra.mxu0 %vm475_vm3, %v2107_v23 }
 0x8cd   :  { %5776 = vmatpush3.msk.msra.mxu0 %vm1958_vm6, %v2260_v34  ;;  %5779 = vmatprep.mubr.msk.f32.mxu0 %vm6260_vm0, %v6259_v0 }
 0x8ce   :  { %v6075_v37 = vpop.eup %6074  ;;  %5777 = vmatprep.subr.mxu0 %v6259_v0 }
 0x8cf   :  { %v6077_v33 = vpop.eup %6076  ;;  %5778 = vmatpush3.msra.mxu0 %v2258_v35  ;;  %v1947_v32 = vmul.f32 %v6075_v37, %v6069_v6 }
 0x8d0   :  { %v6673_v38 = vpop.eup %6078  ;;  %v2412_v39 = vpop.permute.xlu1 %2411  ;;  %5787 = vmatprep.subr.mxu0 %v6259_v0  ;;  %v1949_v43 = vmul.f32 %v6077_v33, %v6617_v57 }
 0x8d1   :  { %5780 = vmatmul.mubr.msk.f32.vlgmr.msra.gmra.mxu0 %vm1905_vm5, %v1947_v32  ;;  %v4991_v44 = vsub.f32 1.0, %v6673_v38 }
 0x8d2   :  { %5788 = vmatpush3.msk.msra.mxu0 %vm1958_vm6, %v2414_v10  ;;  %5791 = vmatprep.mubr.msk.f32.mxu0 %vm6260_vm0, %v6259_v0 }
 0x8d3   :  { %5789 = vmatprep.subr.mxu0 %v6259_v0 }
 0x8d4   :  { %5790 = vmatpush3.msra.mxu0 %v2412_v39  ;;  %v2658_v45 = vpop.permute.xlu1 %2657 }
 0x8d5   :  { %5792 = vmatmul.mubr.msk.f32.vlgmr.msra.gmra.mxu0 %vm1905_vm5, %v1949_v43  ;;  %5985 = vpush %v2658_v45  ;;  %5799 = vmatprep.subr.mxu0 %v2699_v41  ;;  %v2793_v45 = vld [vmem:[#allocation7 + $0x78] sm:$0xff] }
 0x8d6   :  { %5987 = vpush %v6673_v38  ;;  %5800 = vmatpush3.msra.mxu0 %v2699_v41 }
 0x8d7   :  { %5989 = vpush %v4991_v44  ;;  %5801 = vmatprep.subr.mxu0 %v2698_v46 }
 0x8d8   :  { %5802 = vmatpush3.msra.mxu0 %v2698_v46  ;;  %v2792_v46 = vld [vmem:[#allocation7 + $0x70] sm:$0xff] }
 0x8d9   :  { %5803 = vmatprep.subr.mxu0 %v2697_v47 }
 0x8da   :  { %5804 = vmatpush3.msra.mxu0 %v2697_v47  ;;  %v2791_v47 = vld [vmem:[#allocation7 + $0x68] sm:$0xff] }
 0x8db   :  { %5805 = vmatprep.subr.mxu0 %v2696_v48 }
 0x8dc   :  { %5806 = vmatpush3.msra.mxu0 %v2696_v48 }
 0x906   :  { %s6697_s26 = spop %5985 }
 0x907   :  { %s6699_s1 = spop %5987  ;;  %v2660_v27 = vstv %s6697_s26 }
 0x908   :  { %s6704_s4 = spop %5989  ;;  %v2662_v30 = vmul.f32 %v6411_v31, %v2660_v27  ;;  %v2790_v31 = vld [vmem:[#allocation7 + $0x60] sm:$0xff] }
 0x909   :  { %v4994_v3 = vstv %s6704_s4 }
 0x922   :  { %v2612_v36 = vpop.xlane.xlu0 %2611 }
 0x923   :  { %v2616_v50 = vmul.f32 0.03125, %v2612_v36 }
 0x925   :  { %v2618_v51 = vadd.f32 1e-05, %v2616_v50 }
 0x926   :  { %v2615_v52 = vpop.xlane.xlu0 %2614 }
 0x927   :  { %6080 = vrsqrt.f32 %v2618_v51  ;;  %v2617_v53 = vmul.f32 0.03125, %v2615_v52  ;;  %v5371_v51 = vld [vmem:[%s7067_s10 + $0x1] ss:$0 sm:$0xff] }
 0x929   :  { %v2619_v54 = vadd.f32 1e-05, %v2617_v53  ;;  %v5373_v53 = vld [vmem:[%s7068_s11 + $0x1] ss:$0 sm:$0xff] }
 0x92b   :  { %6082 = vrsqrt.f32 %v2619_v54 }
 0x934   :  { %v6081_v55 = vpop.eup %6080 }
 0x935   :  { %v2622_v57 = vmul.f32 %v6081_v55, %v6646_v40  ;;  %v5375_v40 = vld [vmem:[%s7064_s7 + $0x2] ss:$0 sm:$0xff] }
 0x937   :  { %v2631_v59 = vmul.f32 %v5366_v56, %v2622_v57  ;;  %v5379_v57 = vld [vmem:[%s7064_s7 + $0x3] ss:$0 sm:$0xff] }
 0x938   :  { %v6083_v60 = vpop.eup %6082 }
 0x939   :  { %v2623_v61 = vmul.f32 %v6083_v60, %v6651_v42  ;;  %v6702_v62 = vadd.f32 %v5367_v58, %v2631_v59 }
 0x93b   :  { %v2632_v1 = vmul.f32 %v5366_v56, %v2623_v61  ;;  %5807 = vmatprep.mubr.msk.f32.mxu0 %vm298_vm2, %v6702_v62 }
 0x93d   :  { %v2641_v2 = vadd.f32 %v5367_v58, %v2632_v1 }
 0x93f   :  { %v6711_v4 = vmul.f32 %v4994_v3, %v2641_v2  ;;  %5808 = vmatmul.mubr.msk.f32.vlgmr.msra.gmra.mxu0 %vm298_vm2, %v2641_v2 }
 0x988   :  { %v2027_v6 = vpop.f32.mrf.mxu0 }
 0x989   :  { %5773 = vmatmul.mubr.msk.f32.vlgmr.msra.gmra.mxu1 %vm475_vm3, %v2027_v6 }
 0x98a   :  { %v5757_v7 = vpop.f32.mrf.mxu0  ;;  %5783 = vmatpush3.msra.mxu1 %v1577_v5  ;;  %5784 = vmatprep.mubr.msk.f32.mxu1 %vm6260_vm0, %v6259_v0 }
 0x98b   :  { %5794 = vmatprep.subr.mxu1 %v6259_v0 }
 0x98c   :  { %v2180_v8 = vpop.f32.mrf.mxu0 }
 0x98e   :  { %v5769_v63 = vpop.f32.mrf.mxu0 }
 0x991   :  { %v2333_v10 = vpop.f32.mrf.mxu0 }
 0x992   :  { %5785 = vmatmul.mubr.msk.f32.vlgmr.msra.gmra.mxu1 %vm475_vm3, %v2333_v10 }
 0x993   :  { %v5781_v11 = vpop.f32.mrf.mxu0  ;;  %5795 = vmatpush3.msra.mxu1 %v1578_v9  ;;  %5796 = vmatprep.mubr.msk.f32.mxu1 %vm6260_vm0, %v6259_v0 }
 0x994   :  { %5810 = vmatprep.subr.mxu1 %v6259_v0  ;;  %v6140_v11 = vld [vmem:[%s7059_s2 + $0x8] sm:$0xf] }
 0x995   :  { %v2487_v14 = vpop.f32.mrf.mxu0 }
 0x996   :  { %5797 = vmatmul.mubr.msk.f32.vlgmr.msra.gmra.mxu1 %vm475_vm3, %v2487_v14 }
 0x997   :  { %v5793_v15 = vpop.f32.mrf.mxu0  ;;  %5818 = vmatprep.mubr.msk.f32.mxu1 %vm6260_vm0, %v6259_v0  ;;  %5811 = vmatpush3.msra.mxu1 %v2793_v45 }
 0x998   :  { %5812 = vmatprep.subr.mxu1 %v6259_v0 }
 0x999   :  { %5813 = vmatpush3.msra.mxu1 %v2792_v46 }
 0x99a   :  { %5814 = vmatprep.subr.mxu1 %v6259_v0 }
 0x99b   :  { %5815 = vmatpush3.msra.mxu1 %v2791_v47 }
 0x99c   :  { %5816 = vmatprep.subr.mxu1 %v6259_v0 }
 0x99d   :  { %5817 = vmatpush3.msra.mxu1 %v2790_v31 }
 0x9ff   :  { %v5809_v16 = vpop.f32.mrf.mxu0 }
 0xa00   :  { %v6728_v17 = vadd.f32 %v5809_v16, %v5375_v40 }
 0xa01   :  { %v2780_v18 = vpop.f32.mrf.mxu0 }
 0xa02   :  { %v6730_v42 = vadd.f32 %v5375_v40, %v2780_v18  ;;  %v6141_v40 = vld [vmem:[%s7059_s2] sm:$0xff]  ;;  %s6273_s2 = smov [#allocation10]  }
 0xa04   :  { %2966 = vrot.lane.b32.xlu0 %v6730_v42, %s6262_s28  ;;  %5823 = vmatprep.mubr.msk.f32.mxu0 %vm475_vm3, %v6730_v42 }
 0xa49   :  { %v2253_v19 = vpop.f32.mrf.mxu1 }
 0xa4a   :  { %v2254_v20 = vadd.f32 %v2253_v19, %v2180_v8 }
 0xa4b   :  { %v5774_v12 = vpop.f32.mrf.mxu1 }
 0xa52   :  { %v2406_v13 = vpop.f32.mrf.mxu1 }
 0xa53   :  { %v2410_v22 = vadd.f32 %v2406_v13, %v2254_v20 }
 0xa54   :  { %v5786_v21 = vpop.f32.mrf.mxu1 }
 0xa56   :  { %v2560_v23 = vpop.f32.mrf.mxu1 }
 0xa57   :  { %v2564_v25 = vadd.f32 %v2560_v23, %v2410_v22 }
 0xa58   :  { %v5798_v28 = vpop.f32.mrf.mxu1 }
 0xa59   :  { %v2650_v29 = vadd.f32 %v5369_v24, %v2564_v25 }
 0xa5b   :  { %v2656_v34 = vmul.f32 %v2654_v26, %v2650_v29 }
 0xa5d   :  { %v2663_v35 = vadd.f32 %v2662_v30, %v2656_v34 }
 0xa5f   :  { %v2664_v37 = vsel %vm298_vm2, %v2663_v35, 0.0 }
 0xa60   :  { %2665 = vadd.xlane.f32.xlu1 %v2664_v37 }
 0xa76   :  { %v2967_v56 = vpop.permute.xlu0 %2966 }
 0xae9   :  { %v2666_v33 = vpop.xlane.xlu1 %2665 }
 0xaea   :  { %v2667_v32 = vmul.f32 0.03125, %v2666_v33 }
 0xaec   :  { %v2668_v39 = vsub.f32 %v2663_v35, %v2667_v32 }
 0xaee   :  { %v2669_v41 = vmul.f32 %v2668_v39, %v2668_v39 }
 0xaf0   :  { %v2670_v43 = vsel %vm298_vm2, %v2669_v41, 0.0 }
 0xaf1   :  { %2671 = vadd.xlane.f32.xlu1 %v2670_v43 }
 0xb7a   :  { %v2672_v48 = vpop.xlane.xlu1 %2671 }
 0xb7b   :  { %v2673_v49 = vmul.f32 0.03125, %v2672_v48 }
 0xb7d   :  { %v2674_v36 = vadd.f32 1e-05, %v2673_v49 }
 0xb7f   :  { %6084 = vrsqrt.f32 %v2674_v36 }
 0xb8c   :  { %v6085_v50 = vpop.eup %6084 }
 0xb8d   :  { %v2676_v52 = vmul.f32 %v6085_v50, %v2668_v39 }
 0xb8f   :  { %v2685_v54 = vmul.f32 %v5371_v51, %v2676_v52 }
 0xb91   :  { %v6753_v55 = vadd.f32 %v5373_v53, %v2685_v54 }
 0xb93   :  { %5819 = vmatmul.mubr.msk.f32.vlgmr.msra.gmra.mxu1 %vm298_vm2, %v6753_v55 }
 0xb94   :  { %5828 = vmatprep.mubr.msk.f32.mxu1 %vm475_vm3, %v2967_v56 }
 0xc53   :  { %v2871_v58 = vpop.f32.mrf.mxu1 }
 0xc54   :  { %v6761_v59 = vadd.f32 %v5379_v57, %v2871_v58 }
 0xc55   :  { %v5820_v60 = vpop.f32.mrf.mxu1 }
 0xc56   :  { %2970 = vrot.lane.b32.xlu1 %v6761_v59, %s6261_s6  ;;  %3057 = vrot.lane.b32.xlu0 %v6761_v59, %s6264_s30 }
 0xc5a   :  { %2968 = vrot.lane.b32.xlu1 %v6728_v17, %s6262_s28  ;;  %3055 = vrot.lane.b32.xlu0 %v6728_v17, %s6265_s8 }
 0xc5e   :  { %2881 = vrot.lane.b32.xlu1 %v6761_v59, %s6263_s29  ;;  %3140 = vrot.lane.b32.xlu0 %v6730_v42, %s6267_s17 }
 0xc62   :  { %3053 = vrot.lane.b32.xlu1 %v6730_v42, %s6265_s8 }
 0xc66   :  { %3144 = vrot.lane.b32.xlu1 %v6761_v59, %s6266_s0 }
 0xc6a   :  { %3142 = vrot.lane.b32.xlu1 %v6728_v17, %s6267_s17 }
 0xcc8   :  { %v2971_v61 = vpop.permute.xlu1 %2970  ;;  %v3058_v1 = vpop.permute.xlu0 %3057 }
 0xcc9   :  { %5826 = vmatprep.subr.msk.mxu1 %vm475_vm3, %v2971_v61 }
 0xcca   :  { %5827 = vmatpush3.xpose.msk.msra.mxu1 %vm475_vm3, %v2971_v61 }
 0xccc   :  { %v2969_v2 = vpop.permute.xlu1 %2968  ;;  %v3056_v5 = vpop.permute.xlu0 %3055 }
 0xccd   :  { %5829 = vmatmul.mubr.msk.f32.vlgmr.msra.gmra.mxu1 %vm475_vm3, %v2969_v2 }
 0xcd0   :  { %v2882_v6 = vpop.permute.xlu1 %2881  ;;  %v3141_v7 = vpop.permute.xlu0 %3140 }
 0xcd1   :  { %5821 = vmatprep.subr.msk.mxu0 %vm475_vm3, %v2882_v6  ;;  %5838 = vmatprep.mubr.msk.f32.mxu1 %vm475_vm3, %v3141_v7 }
 0xcd2   :  { %5822 = vmatpush3.xpose.msk.msra.mxu0 %vm475_vm3, %v2882_v6 }
 0xcd3   :  { %5831 = vmatprep.subr.msk.mxu0 %vm475_vm3, %v3058_v1 }
 0xcd4   :  { %v3054_v8 = vpop.permute.xlu1 %3053 }
 0xcd5   :  { %5824 = vmatmul.mubr.msk.f32.vlgmr.msra.gmra.mxu0 %vm475_vm3, %v6728_v17 }
 0xcd6   :  { %5832 = vmatpush3.xpose.msk.msra.mxu0 %vm475_vm3, %v3058_v1  ;;  %5833 = vmatprep.mubr.msk.f32.mxu0 %vm475_vm3, %v3054_v8 }
 0xcd8   :  { %v3145_v63 = vpop.permute.xlu1 %3144 }
 0xcd9   :  { %5834 = vmatmul.mubr.msk.f32.vlgmr.msra.gmra.mxu0 %vm475_vm3, %v3056_v5  ;;  %5836 = vmatprep.subr.msk.mxu1 %vm475_vm3, %v3145_v63 }
 0xcda   :  { %5837 = vmatpush3.xpose.msk.msra.mxu1 %vm475_vm3, %v3145_v63 }
 0xcdc   :  { %v3143_v9 = vpop.permute.xlu1 %3142 }
 0xcdd   :  { %5839 = vmatmul.mubr.msk.f32.vlgmr.msra.gmra.mxu1 %vm475_vm3, %v3143_v9 }
 0xd8d   :  { %v5830_v10 = vpop.f32.mrf.mxu1 }
 0xd8e   :  { %v3050_v14 = vadd.f32 %v6140_v11, %v5830_v10 }
 0xd8f   :  { %v3044_v15 = vpop.f32.mrf.mxu1 }
 0xd90   :  { %v3045_v16 = vadd.f32 %v6141_v40, %v3044_v15  ;;  %v3236_v18 = vsel %vm823_vm4, %v3050_v14, -inf }
 0xd91   :  { %3237 = vmax.xlane.f32.xlu1 %v3236_v18 }
 0xd92   :  { %v3233_v19 = vsel %vm475_vm3, %v3045_v16, -inf }
 0xd93   :  { %3234 = vmax.xlane.f32.xlu0 %v3233_v19 }
 0xd95   :  { %v5825_v29 = vpop.f32.mrf.mxu0 }
 0xd96   :  { %v2963_v41 = vadd.f32 %v6140_v11, %v5825_v29 }
 0xd97   :  { %v2957_v37 = vpop.f32.mrf.mxu0 }
 0xd98   :  { %v2958_v33 = vadd.f32 %v6141_v40, %v2957_v37  ;;  %v3230_v47 = vsel %vm823_vm4, %v2963_v41, -inf }
 0xd99   :  { %v5835_v39 = vpop.f32.mrf.mxu0 }
 0xd9a   :  { %v3227_v43 = vsel %vm475_vm3, %v2958_v33, -inf  ;;  %v3137_v31 = vadd.f32 %v6140_v11, %v5835_v39 }
 0xd9b   :  { %v3131_v45 = vpop.f32.mrf.mxu0 }
 0xd9c   :  { %v3132_v46 = vadd.f32 %v6141_v40, %v3131_v45  ;;  %v3242_v36 = vsel %vm823_vm4, %v3137_v31, -inf }
 0xd9d   :  { %v5840_v12 = vpop.f32.mrf.mxu1 }
 0xd9e   :  { %v3239_v48 = vsel %vm475_vm3, %v3132_v46, -inf  ;;  %v3224_v49 = vadd.f32 %v6140_v11, %v5840_v12 }
 0xd9f   :  { %v3218_v13 = vpop.f32.mrf.mxu1 }
 0xda0   :  { %v6806_v20 = vadd.f32 %v6141_v40, %v3218_v13  ;;  %v3248_v50 = vsel %vm823_vm4, %v3224_v49, -inf }
 0xda2   :  { %3399 = vrot.lane.b32.xlu1 %v6761_v59, %s6268_s21  ;;  %v3245_v21 = vsel %vm475_vm3, %v6806_v20, -inf }
 0xdc6   :  { %3246 = vmax.xlane.f32.xlu1 %v3245_v21 }
 0xdd7   :  { %3645 = vrot.lane.b32.xlu1 %v6761_v59, %s6269_s22 }
 0xddb   :  { %4068 = vrot.lane.b32.xlu1 %v6728_v17, %s6261_s6 }
 0xddf   :  { %4064 = vrot.lane.b32.xlu1 %v6761_v59, %s6262_s28 }
 0xde3   :  { %3984 = vrot.lane.b32.xlu1 %v6730_v42, %s6263_s29 }
 0xde7   :  { %4148 = vrot.lane.b32.xlu1 %v6730_v42, %s6264_s30 }
 0xdeb   :  { %4146 = vrot.lane.b32.xlu1 %v6761_v59, %s6265_s8 }
 0xdef   :  { %4228 = vrot.lane.b32.xlu1 %v6761_v59, %s6267_s17 }
 0xe1a   :  { %v3238_v22 = vpop.xlane.xlu1 %3237 }
 0xe1b   :  { %v3254_v23 = vsub.f32 %v3050_v14, %v3238_v22 }
 0xe1c   :  { %v3235_v24 = vpop.xlane.xlu0 %3234 }
 0xe1d   :  { %v3253_v25 = vsub.f32 %v3045_v16, %v3235_v24  ;;  %v3265_v27 = vmul.f32 1.442695, %v3254_v23 }
 0xe1e   :  { %v3400_v26 = vpop.permute.xlu1 %3399 }
 0xe1f   :  { %v3263_v28 = vmul.f32 1.442695, %v3253_v25  ;;  %5846 = vmatprep.subr.mxu1 %v3400_v26 }
 0xe20   :  { %5847 = vmatpush3.msra.mxu1 %v3400_v26 }
 0xe21   :  { %6086 = vpow2.f32 %v3263_v28 }
 0xe22   :  { %6088 = vpow2.f32 %v3265_v27 }
 0xe2e   :  { %v6087_v30 = vpop.eup %6086 }
 0xe2f   :  { %v3281_v34 = vsel %vm475_vm3, %v6087_v30, 0.0  ;;  %v6089_v35 = vpop.eup %6088 }
 0xe30   :  { %3282 = vadd.xlane.f32.xlu0 %v3281_v34  ;;  %v3284_v32 = vsel %vm823_vm4, %v6089_v35, 0.0  ;;  %v2877_v34 = vld [vmem:[#allocation8 + $0x48] sm:$0xff] }
 0xe34   :  { %3285 = vadd.xlane.f32.xlu0 %v3284_v32 }
 0xe38   :  { %3228 = vmax.xlane.f32.xlu0 %v3227_v43 }
 0xe3c   :  { %3231 = vmax.xlane.f32.xlu0 %v3230_v47 }
 0xe40   :  { %3240 = vmax.xlane.f32.xlu0 %v3239_v48 }
 0xe44   :  { %3243 = vmax.xlane.f32.xlu0 %v3242_v36 }
 0xe48   :  { %3249 = vmax.xlane.f32.xlu0 %v3248_v50 }
 0xe4f   :  { %v3247_v16 = vpop.xlane.xlu1 %3246 }
 0xe50   :  { %v3257_v18 = vsub.f32 %v6806_v20, %v3247_v16 }
 0xe52   :  { %v3271_v12 = vmul.f32 1.442695, %v3257_v18 }
 0xe53   :  { %v3646_v48 = vpop.permute.xlu1 %3645 }
 0xe57   :  { %v4069_v50 = vpop.permute.xlu1 %4068 }
 0xeb9   :  { %v3283_v51 = vpop.xlane.xlu0 %3282 }
 0xeba   :  { %6090 = vrcp.f32 %v3283_v51 }
 0xebd   :  { %v3286_v52 = vpop.xlane.xlu0 %3285 }
 0xebe   :  { %6092 = vrcp.f32 %v3286_v52 }
 0xec1   :  { %v3229_v53 = vpop.xlane.xlu0 %3228 }
 0xec2   :  { %v3251_v8 = vsub.f32 %v2958_v33, %v3229_v53 }
 0xec4   :  { %v3259_v63 = vmul.f32 1.442695, %v3251_v8  ;;  %v2876_v8 = vld [vmem:[#allocation8 + $0x40] sm:$0xff] }
 0xec5   :  { %v3232_v54 = vpop.xlane.xlu0 %3231  ;;  %5856 = vmatprep.subr.mxu1 %v2876_v8 }
 0xec6   :  { %v3252_v56 = vsub.f32 %v2963_v41, %v3232_v54 }
 0xec7   :  { %v6091_v57 = vpop.eup %6090 }
 0xec8   :  { %v3261_v58 = vmul.f32 1.442695, %v3252_v56  ;;  %v3304_v60 = vmul.f32 %v6091_v57, %v6087_v30 }
 0xec9   :  { %v3241_v6 = vpop.xlane.xlu0 %3240 }
 0xeca   :  { %6094 = vpow2.f32 %v3261_v58  ;;  %5848 = vmatprep.mubr.msk.f32.mxu1 %vm475_vm3, %v3304_v60  ;;  %v3255_v15 = vsub.f32 %v3132_v46, %v3241_v6  ;;  %v4065_v58 = vpop.permute.xlu1 %4064 }
 0xecb   :  { %v6093_v61 = vpop.eup %6092  ;;  %6096 = vpow2.f32 %v3259_v63 }
 0xecc   :  { %v3306_v1 = vmul.f32 %v6093_v61, %v6089_v35  ;;  %v3267_v19 = vmul.f32 1.442695, %v3255_v15 }
 0xecd   :  { %v3244_v7 = vpop.xlane.xlu0 %3243 }
 0xece   :  { %5849 = vmatmul.mubr.msk.f32.vlgmr.msra.gmra.mxu1 %vm475_vm3, %v3306_v1  ;;  %v3256_v9 = vsub.f32 %v3137_v31, %v3244_v7 }
 0xecf   :  { %5857 = vmatpush3.msra.mxu1 %v2876_v8 }
 0xed0   :  { %v3269_v11 = vmul.f32 1.442695, %v3256_v9 }
 0xed1   :  { %v3250_v10 = vpop.xlane.xlu0 %3249 }
 0xed2   :  { %v3258_v14 = vsub.f32 %v3224_v49, %v3250_v10  ;;  %6098 = vpow2.f32 %v3269_v11  ;;  %v2879_v10 = vld [vmem:[#allocation8 + $0x58] sm:$0xff] }
 0xed4   :  { %v3273_v40 = vmul.f32 1.442695, %v3258_v14 }
 0xed6   :  { %6100 = vpow2.f32 %v3273_v40 }
 0xed7   :  { %v6833_v2 = vpop.eup %6094  ;;  %6102 = vpow2.f32 %v3267_v19 }
 0xed8   :  { %v3278_v5 = vsel %vm823_vm4, %v6833_v2, 0.0  ;;  %v6097_v13 = vpop.eup %6096  ;;  %6104 = vpow2.f32 %v3271_v12 }
 0xed9   :  { %3279 = vadd.xlane.f32.xlu0 %v3278_v5  ;;  %v3275_v21 = vsel %vm475_vm3, %v6097_v13, 0.0 }
 0xedf   :  { %v6099_v22 = vpop.eup %6098 }
 0xee0   :  { %v3290_v23 = vsel %vm823_vm4, %v6099_v22, 0.0 }
 0xee3   :  { %v6842_v24 = vpop.eup %6100 }
 0xee4   :  { %v3296_v25 = vsel %vm823_vm4, %v6842_v24, 0.0  ;;  %v6103_v26 = vpop.eup %6102 }
 0xee5   :  { %v3287_v20 = vsel %vm475_vm3, %v6103_v26, 0.0  ;;  %v6105_v27 = vpop.eup %6104 }
 0xee6   :  { %v3293_v28 = vsel %vm475_vm3, %v6105_v27, 0.0 }
 0xeef   :  { %3315 = vrot.lane.b32.xlu0 %v6761_v59, %s6270_s23 }
 0xf0e   :  { %3276 = vadd.xlane.f32.xlu0 %v3275_v21 }
 0xf12   :  { %3291 = vadd.xlane.f32.xlu0 %v3290_v23 }
 0xf16   :  { %3297 = vadd.xlane.f32.xlu0 %v3296_v25 }
 0xf1a   :  { %3288 = vadd.xlane.f32.xlu0 %v3287_v20 }
 0xf1e   :  { %3294 = vadd.xlane.f32.xlu0 %v3293_v28 }
 0xf34   :  { %3812 = vrot.lane.b32.xlu0 %v6761_v59, %s6271_s24 }
 0xf38   :  { %4066 = vrot.lane.b32.xlu0 %v6730_v42, %s6261_s6  ;;  %s5286_s6 = sshll.u32 %s6273_s2, 4  ;;  %s5287_s6 = int_to_ptr.vmem [resolvable:$true] %s5286_s6 }
 0xf39   :  { %p6228_p7 = scmp.lt.s32.totalorder %s5287_s6, %s5287_s6 }
 0xf3c   :  { %3986 = vrot.lane.b32.xlu0 %v6728_v17, %s6263_s29 }
 0xf40   :  { %4150 = vrot.lane.b32.xlu0 %v6728_v17, %s6264_s30 }
 0xf44   :  { %4232 = vrot.lane.b32.xlu0 %v6728_v17, %s6266_s0 }
 0xf48   :  { %4230 = vrot.lane.b32.xlu0 %v6730_v42, %s6266_s0 }
 0xf62   :  { %v3280_v29 = vpop.xlane.xlu0 %3279 }
 0xf63   :  { %6106 = vrcp.f32 %v3280_v29 }
 0xf66   :  { %v3316_v30 = vpop.permute.xlu0 %3315 }
 0xf67   :  { %5841 = vmatprep.subr.mxu0 %v3316_v30 }
 0xf68   :  { %5842 = vmatpush3.msra.mxu0 %v3316_v30 }
 0xf69   :  { %5851 = vmatprep.subr.mxu0 %v2877_v34 }
 0xf70   :  { %v6107_v39 = vpop.eup %6106 }
 0xf71   :  { %v3302_v47 = vmul.f32 %v6107_v39, %v6833_v2  ;;  %v3985_v2 = vpop.permute.xlu1 %3984 }
 0xf75   :  { %v4149_v6 = vpop.permute.xlu1 %4148 }
 0xf79   :  { %v4147_v7 = vpop.permute.xlu1 %4146 }
 0xf8e   :  { %v5850_v43 = vpop.f32.mrf.mxu1 }
 0xf90   :  { %v3474_v31 = vpop.f32.mrf.mxu1 }
 0xf97   :  { %v3277_v35 = vpop.xlane.xlu0 %3276 }
 0xf98   :  { %6108 = vrcp.f32 %v3277_v35 }
 0xf9b   :  { %v3292_v37 = vpop.xlane.xlu0 %3291 }
 0xf9c   :  { %6110 = vrcp.f32 %v3292_v37  ;;  %v5434_v37 = vld [vmem:[%s7066_s9 + $0x2] ss:$0 sm:$0xff] }
 0xf9f   :  { %v3298_v33 = vpop.xlane.xlu0 %3297 }
 0xfa3   :  { %v3289_v32 = vpop.xlane.xlu0 %3288 }
 0xfa4   :  { %6112 = vrcp.f32 %v3289_v32  ;;  %v4987_v32 = vstv %s6699_s1 }
 0xfa5   :  { %v6109_v41 = vpop.eup %6108  ;;  %6114 = vrcp.f32 %v3298_v33 }
 0xfa6   :  { %v3300_v45 = vmul.f32 %v6109_v41, %v6097_v13 }
 0xfa7   :  { %v3295_v46 = vpop.xlane.xlu0 %3294 }
 0xfa8   :  { %6116 = vrcp.f32 %v3295_v46  ;;  %5843 = vmatprep.mubr.msk.f32.mxu0 %vm475_vm3, %v3300_v45 }
 0xfa9   :  { %5844 = vmatmul.mubr.msk.f32.vlgmr.msra.gmra.mxu0 %vm475_vm3, %v3302_v47  ;;  %v6111_v36 = vpop.eup %6110  ;;  %v4996_v47 = vmul.f32 %v4994_v3, %v6702_v62 }
 0xfaa   :  { %5852 = vmatpush3.msra.mxu0 %v2877_v34  ;;  %5853 = vmatprep.mubr.msk.f32.mxu0 %vm475_vm3, %v3474_v31  ;;  %v3310_v54 = vmul.f32 %v6111_v36, %v6099_v22  ;;  %v6142_v36 = vld [vmem:[#allocation2] sm:$0xff] }
 0xfab   :  { %5861 = vmatprep.subr.mxu0 %v3646_v48  ;;  %v3813_v49 = vpop.permute.xlu0 %3812 }
 0xfad   :  { %5854 = vmatmul.mubr.msk.f32.vlgmr.msra.gmra.mxu0 %vm475_vm3, %v5850_v43 }
 0xfae   :  { %5862 = vmatpush3.msra.mxu0 %v3646_v48 }
 0xfaf   :  { %5871 = vmatprep.subr.mxu0 %v3813_v49  ;;  %v4067_v53 = vpop.permute.xlu0 %4066 }
 0xfb1   :  { %v6113_v51 = vpop.eup %6112 }
 0xfb2   :  { %v3308_v52 = vmul.f32 %v6113_v51, %v6103_v26  ;;  %v6115_v56 = vpop.eup %6114 }
 0xfb3   :  { %v3314_v61 = vmul.f32 %v6115_v56, %v6842_v24  ;;  %v3987_v1 = vpop.permute.xlu0 %3986  ;;  %v4229_v24 = vpop.permute.xlu1 %4228 }
 0xfb4   :  { %5863 = vmatprep.mubr.msk.f32.mxu0 %vm475_vm3, %v3308_v52 }
 0xfb5   :  { %v6117_v57 = vpop.eup %6116  ;;  %5864 = vmatmul.mubr.msk.f32.vlgmr.msra.gmra.mxu0 %vm475_vm3, %v3310_v54 }
 0xfb6   :  { %5872 = vmatpush3.msra.mxu0 %v3813_v49  ;;  %v3312_v60 = vmul.f32 %v6117_v57, %v6105_v27 }
 0xfb7   :  { %5881 = vmatprep.subr.mxu0 %v6259_v0  ;;  %v4151_v5 = vpop.permute.xlu0 %4150 }
 0xfb8   :  { %5873 = vmatprep.mubr.msk.f32.mxu0 %vm475_vm3, %v3312_v60 }
 0xfb9   :  { %5874 = vmatmul.mubr.msk.f32.vlgmr.msra.gmra.mxu0 %vm475_vm3, %v3314_v61 }
 0xfba   :  { %5882 = vmatpush3.xpose.msk.msra.mxu0 %vm475_vm3, %v3987_v1  ;;  %5885 = vmatprep.mubr.msk.f32.mxu0 %vm6260_vm0, %v6259_v0 }
 0xfbb   :  { %5883 = vmatprep.subr.mxu0 %v6259_v0  ;;  %v4233_v12 = vpop.permute.xlu0 %4232 }
 0xfbe   :  { %5884 = vmatpush3.xpose.msk.msra.mxu0 %vm475_vm3, %v3985_v2 }
 0xfbf   :  { %5895 = vmatprep.subr.mxu0 %v6259_v0  ;;  %v4231_v21 = vpop.permute.xlu0 %4230 }
 0xfc1   :  { %5886 = vmatmul.mubr.msk.f32.vlgmr.msra.gmra.mxu0 %vm475_vm3, %v6761_v59  ;;  %v2878_v59 = vld [vmem:[#allocation8 + $0x50] sm:$0xff] }
 0xfc2   :  { %5896 = vmatpush3.xpose.msk.msra.mxu0 %vm475_vm3, %v4151_v5  ;;  %5899 = vmatprep.mubr.msk.f32.mxu0 %vm6260_vm0, %v6259_v0 }
 0xfc3   :  { %5897 = vmatprep.subr.mxu0 %v6259_v0  ;;  %5866 = vmatprep.subr.mxu1 %v2878_v59 }
 0xfc6   :  { %5898 = vmatpush3.xpose.msk.msra.mxu0 %vm475_vm3, %v4149_v6 }
 0xfc7   :  { %5909 = vmatprep.subr.mxu0 %v6259_v0 }
 0xfc9   :  { %5900 = vmatmul.mubr.msk.f32.vlgmr.msra.gmra.mxu0 %vm475_vm3, %v4147_v7 }
 0xfca   :  { %5913 = vmatprep.mubr.msk.f32.mxu0 %vm6260_vm0, %v6259_v0 }
0x1069   :  { %v5845_v63 = vpop.f32.mrf.mxu0 }
0x106b   :  { %v3390_v9 = vpop.f32.mrf.mxu0 }
0x106c   :  { %5858 = vmatprep.mubr.msk.f32.mxu1 %vm475_vm3, %v3390_v9 }
0x106d   :  { %5859 = vmatmul.mubr.msk.f32.vlgmr.msra.gmra.mxu1 %vm475_vm3, %v5845_v63  ;;  %v5855_v11 = vpop.f32.mrf.mxu0 }
0x106e   :  { %5867 = vmatpush3.msra.mxu1 %v2878_v59 }
0x106f   :  { %5876 = vmatprep.subr.mxu1 %v2879_v10  ;;  %v3555_v14 = vpop.f32.mrf.mxu0 }
0x1075   :  { %v5865_v15 = vpop.f32.mrf.mxu0 }
0x1077   :  { %v3720_v40 = vpop.f32.mrf.mxu0 }
0x1078   :  { %5868 = vmatprep.mubr.msk.f32.mxu1 %vm475_vm3, %v3720_v40 }
0x1079   :  { %5869 = vmatmul.mubr.msk.f32.vlgmr.msra.gmra.mxu1 %vm475_vm3, %v5865_v15  ;;  %v5875_v16 = vpop.f32.mrf.mxu0 }
0x107a   :  { %5877 = vmatpush3.msra.mxu1 %v2879_v10 }
0x107b   :  { %v3887_v18 = vpop.f32.mrf.mxu0  ;;  %5888 = vmatprep.subr.mxu1 %v6259_v0 }
0x107c   :  { %5878 = vmatprep.mubr.msk.f32.mxu1 %vm475_vm3, %v3887_v18 }
0x107d   :  { %5879 = vmatmul.mubr.msk.f32.vlgmr.msra.gmra.mxu1 %vm475_vm3, %v5875_v16 }
0x107e   :  { %5889 = vmatpush3.xpose.msk.msra.mxu1 %vm475_vm3, %v4069_v50  ;;  %5892 = vmatprep.mubr.msk.f32.mxu1 %vm6260_vm0, %v6259_v0 }
0x107f   :  { %5890 = vmatprep.subr.mxu1 %v6259_v0 }
0x1081   :  { %v4060_v19 = vpop.f32.mrf.mxu0 }
0x1082   :  { %5891 = vmatpush3.xpose.msk.msra.mxu1 %vm475_vm3, %v4067_v53  ;;  %v4061_v57 = vadd.f32 %v6142_v36, %v4060_v19 }
0x1083   :  { %v5887_v13 = vpop.f32.mrf.mxu0  ;;  %5902 = vmatprep.subr.mxu1 %v6259_v0 }
0x1084   :  { %v4310_v3 = vsel %vm1905_vm5, %v4061_v57, -inf }
0x1085   :  { %5893 = vmatmul.mubr.msk.f32.vlgmr.msra.gmra.mxu1 %vm475_vm3, %v4065_v58 }
0x1086   :  { %5903 = vmatpush3.xpose.msk.msra.mxu1 %vm475_vm3, %v4233_v12  ;;  %5906 = vmatprep.mubr.msk.f32.mxu1 %vm6260_vm0, %v6259_v0 }
0x1087   :  { %5904 = vmatprep.subr.mxu1 %v6259_v0 }
0x1089   :  { %v4224_v22 = vpop.f32.mrf.mxu0 }
0x108a   :  { %5905 = vmatpush3.xpose.msk.msra.mxu1 %vm475_vm3, %v4231_v21  ;;  %v4225_v59 = vadd.f32 %v6142_v36, %v4224_v22 }
0x108b   :  { %v5901_v23 = vpop.f32.mrf.mxu0  ;;  %5916 = vmatprep.subr.mxu1 %v6259_v0 }
0x108c   :  { %v4316_v9 = vsel %vm1905_vm5, %v4225_v59, -inf }
0x108d   :  { %5907 = vmatmul.mubr.msk.f32.vlgmr.msra.gmra.mxu1 %vm475_vm3, %v4229_v24 }
0x108e   :  { %5920 = vmatprep.mubr.msk.f32.mxu1 %vm6260_vm0, %v6259_v0 }
0x112d   :  { %v5860_v25 = vpop.f32.mrf.mxu1 }
0x112e   :  { %v3642_v20 = vadd.f32 %v5860_v25, %v5855_v11 }
0x112f   :  { %v3636_v26 = vpop.f32.mrf.mxu1 }
0x1130   :  { %v3637_v28 = vadd.f32 %v3636_v26, %v3555_v14 }
0x1139   :  { %v5870_v27 = vpop.f32.mrf.mxu1 }
0x113a   :  { %v3811_v29 = vadd.f32 %v5870_v27, %v3642_v20 }
0x113b   :  { %v3801_v30 = vpop.f32.mrf.mxu1 }
0x113c   :  { %v3810_v34 = vadd.f32 %v3801_v30, %v3637_v28 }
0x113d   :  { %v5880_v35 = vpop.f32.mrf.mxu1 }
0x113e   :  { %v3978_v33 = vadd.f32 %v5880_v35, %v3811_v29 }
0x113f   :  { %v3968_v39 = vpop.f32.mrf.mxu1 }
0x1140   :  { %v4977_v41 = vadd.f32 %v5434_v37, %v3978_v33  ;;  %v3977_v43 = vadd.f32 %v3968_v39, %v3810_v34 }
0x1142   :  { %v4990_v45 = vmul.f32 %v4987_v32, %v4977_v41  ;;  %v4976_v46 = vadd.f32 %v5434_v37, %v3977_v43 }
0x1144   :  { %v4989_v31 = vmul.f32 %v4987_v32, %v4976_v46  ;;  %v6919_v48 = vadd.f32 %v6711_v4, %v4990_v45 }
0x1145   :  { %v4142_v49 = vpop.f32.mrf.mxu1 }
0x1146   :  { %v4143_v50 = vadd.f32 %v6142_v36, %v4142_v49  ;;  %v6921_v51 = vadd.f32 %v4996_v47, %v4989_v31  ;;  %v5003_v34 = vsel %vm2599_vm7, %v6919_v48, 0.0 }
0x1147   :  { %v5894_v52 = vpop.f32.mrf.mxu1 }
0x1148   :  { %v4313_v53 = vsel %vm1905_vm5, %v4143_v50, -inf  ;;  %v5000_v21 = vsel %vm298_vm2, %v6921_v51, 0.0  ;;  %v3980_v52 = vld [vmem:[#allocation8 + $0x60] sm:$0xff] }
0x1149   :  { %4314 = vmax.xlane.f32.xlu0 %v4313_v53 }
0x114d   :  { %v4306_v54 = vpop.f32.mrf.mxu1 }
0x114e   :  { %v4307_v62 = vadd.f32 %v6142_v36, %v4306_v54 }
0x114f   :  { %v5908_v56 = vpop.f32.mrf.mxu1 }
0x1150   :  { %v4319_v4 = vsel %vm1905_vm5, %v4307_v62, -inf  ;;  %v3982_v56 = vld [vmem:[#allocation8 + $0x70] sm:$0xff] }
0x115f   :  { %4436 = vrot.lane.b32.xlu0 %v6728_v17, %s6268_s21 }
0x117e   :  { %4311 = vmax.xlane.f32.xlu0 %v4310_v3 }
0x1182   :  { %4320 = vmax.xlane.f32.xlu0 %v4319_v4  ;;  %v3983_v4 = vld [vmem:[#allocation8 + $0x78] sm:$0xff] }
0x11d2   :  { %v4315_v58 = vpop.xlane.xlu0 %4314 }
0x11d3   :  { %v4323_v60 = vsub.f32 %v4143_v50, %v4315_v58 }
0x11d5   :  { %v4328_v61 = vmul.f32 1.442695, %v4323_v60 }
0x11d6   :  { %v4437_v1 = vpop.permute.xlu0 %4436 }
0x11d7   :  { %6118 = vpow2.f32 %v4328_v61  ;;  %5917 = vmatpush3.msk.msra.mxu1 %vm1958_vm6, %v4437_v1 }
0x11d8   :  { %5918 = vmatprep.subr.mxu1 %v6259_v0 }
0x11e4   :  { %v6119_v2 = vpop.eup %6118 }
0x11e5   :  { %v4337_v5 = vsel %vm1905_vm5, %v6119_v2, 0.0 }
0x11e6   :  { %4338 = vadd.xlane.f32.xlu1 %v4337_v5 }
0x11f7   :  { %4434 = vrot.lane.b32.xlu1 %v6730_v42, %s6268_s21 }
0x1207   :  { %v4312_v6 = vpop.xlane.xlu0 %4311 }
0x1208   :  { %v4322_v7 = vsub.f32 %v4061_v57, %v4312_v6 }
0x120a   :  { %v4326_v8 = vmul.f32 1.442695, %v4322_v7 }
0x120b   :  { %v4321_v11 = vpop.xlane.xlu0 %4320 }
0x120c   :  { %6120 = vpow2.f32 %v4326_v8  ;;  %v4325_v14 = vsub.f32 %v4307_v62, %v4321_v11 }
0x120e   :  { %v4332_v15 = vmul.f32 1.442695, %v4325_v14 }
0x1210   :  { %6122 = vpow2.f32 %v4332_v15 }
0x1219   :  { %v6121_v63 = vpop.eup %6120 }
0x121a   :  { %v4334_v10 = vsel %vm1905_vm5, %v6121_v63, 0.0 }
0x121b   :  { %4317 = vmax.xlane.f32.xlu1 %v4316_v9  ;;  %4335 = vadd.xlane.f32.xlu0 %v4334_v10  ;;  %v5441_v10 = vld [vmem:[%s7066_s9 + $0x3] ss:$0 sm:$0xff] }
0x121d   :  { %v6937_v40 = vpop.eup %6122 }
0x121e   :  { %v4343_v16 = vsel %vm1905_vm5, %v6937_v40, 0.0 }
0x1231   :  { %4354 = vrot.lane.b32.xlu0 %v6730_v42, %s6270_s23 }
0x1250   :  { %4344 = vadd.xlane.f32.xlu0 %v4343_v16 }
0x1266   :  { %4816 = vrot.lane.b32.xlu0 %v6728_v17, %s6271_s24 }
0x126a   :  { %5055 = vrot.lane.b32.xlu0 %v6673_v38, %s6272_s3 }
0x126f   :  { %v4339_v18 = vpop.xlane.xlu1 %4338 }
0x1270   :  { %6124 = vrcp.f32 %v4339_v18 }
0x1273   :  { %v4435_v19 = vpop.permute.xlu1 %4434 }
0x1274   :  { %5919 = vmatpush3.msra.mxu1 %v4435_v19 }
0x1275   :  { %5928 = vmatprep.subr.mxu1 %v6259_v0 }
0x127d   :  { %v6125_v12 = vpop.eup %6124 }
0x127e   :  { %v4349_v13 = vmul.f32 %v6125_v12, %v6119_v2 }
0x1280   :  { %5921 = vmatmul.mubr.msk.f32.vlgmr.msra.gmra.mxu1 %vm1905_vm5, %v4349_v13 }
0x1281   :  { %5930 = vmatprep.mubr.msk.f32.mxu1 %vm6260_vm0, %v6259_v0  ;;  %5929 = vmatpush3.msra.mxu1 %v3980_v52  ;;  %v5443_v52 = vld [vmem:[%s7067_s10 + $0x3] ss:$0 sm:$0xff] }
0x1282   :  { %5940 = vmatprep.subr.mxu1 %v6259_v0 }
0x1289   :  { %5001 = vadd.xlane.f32.xlu0 %v5000_v21 }
0x12a4   :  { %v4318_v22 = vpop.xlane.xlu1 %4317  ;;  %v4336_v20 = vpop.xlane.xlu0 %4335 }
0x12a5   :  { %v4324_v23 = vsub.f32 %v4225_v59, %v4318_v22 }
0x12a7   :  { %v4330_v24 = vmul.f32 1.442695, %v4324_v23 }
0x12a8   :  { %v4355_v27 = vpop.permute.xlu0 %4354 }
0x12a9   :  { %6126 = vpow2.f32 %v4330_v24 }
0x12aa   :  { %6128 = vrcp.f32 %v4336_v20 }
0x12b6   :  { %v6127_v25 = vpop.eup %6126 }
0x12b7   :  { %v4340_v26 = vsel %vm1905_vm5, %v6127_v25, 0.0  ;;  %v6129_v33 = vpop.eup %6128 }
0x12b8   :  { %4341 = vadd.xlane.f32.xlu1 %v4340_v26  ;;  %v4347_v38 = vmul.f32 %v6129_v33, %v6121_v63  ;;  %v5101_v26 = vld [vmem:[%s7070_s13 + $0x10] sm:$0xff] }
0x12c9   :  { %4356 = vrot.lane.b32.xlu1 %v6728_v17, %s6270_s23 }
0x12cd   :  { %4662 = vrot.lane.b32.xlu1 %v6728_v17, %s6269_s22 }
0x12d1   :  { %4660 = vrot.lane.b32.xlu1 %v6730_v42, %s6269_s22 }
0x12d5   :  { %4814 = vrot.lane.b32.xlu1 %v6730_v42, %s6271_s24 }
0x12d9   :  { %5061 = vrot.lane.b32.xlu1 %v4991_v44, %s6272_s3  ;;  %v4345_v28 = vpop.xlane.xlu0 %4344  ;;  %v3981_v44 = vld [vmem:[#allocation8 + $0x68] sm:$0xff] }
0x12dd   :  { %v4817_v29 = vpop.permute.xlu0 %4816 }
0x12e1   :  { %v5056_v30 = vpop.permute.xlu0 %5055 }
0x12e2   :  { %5991 = vpush %v5056_v30 }
0x12fd   :  { %5004 = vadd.xlane.f32.xlu1 %v5003_v34 }
0x1312   :  { %v5002_v8 = vpop.xlane.xlu0 %5001 }
0x1313   :  { %s5992_s28 = spop %5991  ;;  %v5006_v11 = vmul.f32 0.03125, %v5002_v8 }
0x1314   :  { %v5058_v15 = vstv %s5992_s28 }
0x1315   :  { %v5008_v19 = vsub.f32 %v6921_v51, %v5006_v11  ;;  %v5099_v51 = vld [vmem:[%s7070_s13] sm:$0xff] }
0x1317   :  { %v5010_v23 = vmul.f32 %v5008_v19, %v5008_v19 }
0x1319   :  { %v5012_v24 = vsel %vm298_vm2, %v5010_v23, 0.0 }
0x1340   :  { %v4510_v17 = vpop.f32.mrf.mxu1 }
0x1341   :  { %v4342_v35 = vpop.xlane.xlu1 %4341 }
0x1342   :  { %6130 = vrcp.f32 %v4342_v35  ;;  %v5922_v37 = vpop.f32.mrf.mxu1 }
0x1343   :  { %6132 = vrcp.f32 %v4345_v28 }
0x1345   :  { %v4357_v42 = vpop.permute.xlu1 %4356 }
0x1346   :  { %5910 = vmatpush3.msk.msra.mxu0 %vm1958_vm6, %v4357_v42 }
0x1347   :  { %5911 = vmatprep.subr.mxu0 %v6259_v0 }
0x1348   :  { %5912 = vmatpush3.msra.mxu0 %v4355_v27 }
0x1349   :  { %v4663_v32 = vpop.permute.xlu1 %4662  ;;  %5914 = vmatmul.mubr.msk.f32.vlgmr.msra.gmra.mxu0 %vm1905_vm5, %v4347_v38  ;;  %5923 = vmatprep.subr.mxu0 %v6259_v0 }
0x134a   :  { %5924 = vmatpush3.msra.mxu0 %v3981_v44  ;;  %5925 = vmatprep.mubr.msk.f32.mxu0 %vm6260_vm0, %v6259_v0  ;;  %v5437_v44 = vld [vmem:[%s7067_s10 + $0x2] ss:$0 sm:$0xff] }
0x134b   :  { %5933 = vmatprep.subr.mxu0 %v6259_v0 }
0x134d   :  { %v4661_v39 = vpop.permute.xlu1 %4660  ;;  %5926 = vmatmul.mubr.msk.f32.vlgmr.msra.gmra.mxu0 %vm475_vm3, %v4510_v17 }
0x134e   :  { %5934 = vmatpush3.msk.msra.mxu0 %vm1958_vm6, %v4663_v32  ;;  %5937 = vmatprep.mubr.msk.f32.mxu0 %vm6260_vm0, %v6259_v0 }
0x134f   :  { %v6131_v41 = vpop.eup %6130  ;;  %5935 = vmatprep.subr.mxu0 %v6259_v0 }
0x1350   :  { %5936 = vmatpush3.msra.mxu0 %v4661_v39  ;;  %v4351_v43 = vmul.f32 %v6131_v41, %v6127_v25  ;;  %v6133_v45 = vpop.eup %6132  ;;  %v5102_v25 = vld [vmem:[%s7070_s13 + $0x18] sm:$0xff] }
0x1351   :  { %v4815_v46 = vpop.permute.xlu1 %4814  ;;  %5945 = vmatprep.subr.mxu0 %v6259_v0  ;;  %v4353_v47 = vmul.f32 %v6133_v45, %v6937_v40  ;;  %v5439_v45 = vld [vmem:[%s7068_s11 + $0x2] ss:$0 sm:$0xff] }
0x1352   :  { %5938 = vmatmul.mubr.msk.f32.vlgmr.msra.gmra.mxu0 %vm1905_vm5, %v4351_v43 }
0x1353   :  { %5946 = vmatpush3.msk.msra.mxu0 %vm1958_vm6, %v4817_v29  ;;  %5949 = vmatprep.mubr.msk.f32.mxu0 %vm6260_vm0, %v6259_v0 }
0x1354   :  { %5947 = vmatprep.subr.mxu0 %v6259_v0 }
0x1355   :  { %5948 = vmatpush3.msra.mxu0 %v4815_v46  ;;  %v5062_v31 = vpop.permute.xlu1 %5061 }
0x1356   :  { %5950 = vmatmul.mubr.msk.f32.vlgmr.msra.gmra.mxu0 %vm1905_vm5, %v4353_v47  ;;  %5993 = vpush %v5062_v31  ;;  %5957 = vmatprep.subr.mxu0 %v5102_v25 }
0x1357   :  { %5958 = vmatpush3.msra.mxu0 %v5102_v25 }
0x1358   :  { %5959 = vmatprep.subr.mxu0 %v5101_v26 }
0x1359   :  { %5960 = vmatpush3.msra.mxu0 %v5101_v26 }
0x1386   :  { %v5005_v49 = vpop.xlane.xlu1 %5004 }
0x1387   :  { %v5007_v36 = vmul.f32 0.03125, %v5005_v49  ;;  %s5994_s29 = spop %5993 }
0x1388   :  { %v5064_v40 = vstv %s5994_s29 }
0x1389   :  { %v6986_v50 = vsub.f32 %v6919_v48, %v5007_v36  ;;  %v5066_v12 = vmul.f32 %v5064_v40, %v6753_v55  ;;  %v5100_v55 = vld [vmem:[%s7070_s13 + $0x8] sm:$0xff] }
0x138a   :  { %5961 = vmatprep.subr.mxu0 %v5100_v55 }
0x138b   :  { %v5011_v53 = vmul.f32 %v6986_v50, %v6986_v50  ;;  %5962 = vmatpush3.msra.mxu0 %v5100_v55 }
0x138c   :  { %5963 = vmatprep.subr.mxu0 %v5099_v51 }
0x138d   :  { %v5015_v54 = vsel %vm2599_vm7, %v5011_v53, 0.0  ;;  %5964 = vmatpush3.msra.mxu0 %v5099_v51 }
0x138e   :  { %5016 = vadd.xlane.f32.xlu1 %v5015_v54  ;;  %v5445_v54 = vld [vmem:[%s7068_s11 + $0x3] ss:$0 sm:$0xff] }
0x1409   :  { %v4430_v57 = vpop.f32.mrf.mxu0 }
0x140a   :  { %5931 = vmatmul.mubr.msk.f32.vlgmr.msra.gmra.mxu1 %vm475_vm3, %v4430_v57 }
0x140b   :  { %v5915_v62 = vpop.f32.mrf.mxu0  ;;  %5941 = vmatpush3.msra.mxu1 %v3982_v56  ;;  %5942 = vmatprep.mubr.msk.f32.mxu1 %vm6260_vm0, %v6259_v0 }
0x140c   :  { %5952 = vmatprep.subr.mxu1 %v6259_v0  ;;  %v5446_v62 = vld [vmem:[%s7071_s14] ss:$0 sm:$0xff]  ;;  %s6223_s14 = scalar_lea.vmem %s5287_s6, 128 }
0x140d   :  { %v4583_v48 = vpop.f32.mrf.mxu0  ;;  %p6224_p6 = scmp.ne.s32.totalorder %s5287_s6, %s6223_s14  ;;  %p6229_p8 = scmp.lt.s32.totalorder %s6223_s14, %s6223_s14 }
0x140f   :  { %v5927_v3 = vpop.f32.mrf.mxu0  ;;  %p6230_p9 = por %p6229_p8, %p6228_p7 }
0x1411   :  { %p6231_p10 = pnand %p6230_p9, %p6224_p6 }
0x1412   :  { %v4736_v58 = vpop.f32.mrf.mxu0 }
0x1413   :  { %5943 = vmatmul.mubr.msk.f32.vlgmr.msra.gmra.mxu1 %vm475_vm3, %v4736_v58 }
0x1414   :  { %v5939_v60 = vpop.f32.mrf.mxu0  ;;  %5953 = vmatpush3.msra.mxu1 %v3983_v4  ;;  %5954 = vmatprep.mubr.msk.f32.mxu1 %vm6260_vm0, %v6259_v0 }
0x1415   :  { %5968 = vmatprep.subr.mxu1 %v6259_v0 }
0x1416   :  { %v4890_v61 = vpop.f32.mrf.mxu0 }
0x1417   :  { %5955 = vmatmul.mubr.msk.f32.vlgmr.msra.gmra.mxu1 %vm475_vm3, %v4890_v61  ;;  %v5017_v20 = vpop.xlane.xlu1 %5016 }
0x1418   :  { %v5951_v1 = vpop.f32.mrf.mxu0  ;;  %5976 = vmatprep.mubr.msk.f32.mxu1 %vm6260_vm0, %v6259_v0  ;;  %5969 = vmatpush3.msra.mxu1 %v5102_v25  ;;  %v5019_v27 = vmul.f32 0.03125, %v5017_v20 }
0x1419   :  { %5970 = vmatprep.subr.mxu1 %v6259_v0 }
0x141a   :  { %5971 = vmatpush3.msra.mxu1 %v5101_v26  ;;  %v5021_v28 = vadd.f32 1e-05, %v5019_v27 }
0x141b   :  { %5972 = vmatprep.subr.mxu1 %v6259_v0 }
0x141c   :  { %5973 = vmatpush3.msra.mxu1 %v5100_v55  ;;  %6134 = vrsqrt.f32 %v5021_v28 }
0x141d   :  { %5974 = vmatprep.subr.mxu1 %v6259_v0 }
0x141e   :  { %5975 = vmatpush3.msra.mxu1 %v5099_v51 }
0x1429   :  { %v6135_v38 = vpop.eup %6134 }
0x142a   :  { %v5025_v0 = vmul.f32 %v6135_v38, %v6986_v50 }
0x142c   :  { %v5035_v41 = vmul.f32 %v5437_v44, %v5025_v0 }
0x142e   :  { %v5045_v47 = vadd.f32 %v5439_v45, %v5035_v41 }
0x14ca   :  { %v4656_v2 = vpop.f32.mrf.mxu1 }
0x14cb   :  { %v4657_v7 = vadd.f32 %v4656_v2, %v4583_v48 }
0x14cc   :  { %v5932_v5 = vpop.f32.mrf.mxu1 }
0x14d3   :  { %v4809_v6 = vpop.f32.mrf.mxu1 }
0x14d4   :  { %v4813_v63 = vadd.f32 %v4809_v6, %v4657_v7 }
0x14d5   :  { %v5944_v59 = vpop.f32.mrf.mxu1 }
0x14d7   :  { %v4963_v9 = vpop.f32.mrf.mxu1 }
0x14d8   :  { %v4967_v14 = vadd.f32 %v4963_v9, %v4813_v63 }
0x14d9   :  { %v5956_v16 = vpop.f32.mrf.mxu1 }
0x14da   :  { %v5054_v18 = vadd.f32 %v5441_v10, %v4967_v14 }
0x14dc   :  { %v5060_v13 = vmul.f32 %v5058_v15, %v5054_v18 }
0x14de   :  { %v5067_v21 = vadd.f32 %v5066_v12, %v5060_v13 }
0x14e0   :  { %v5068_v22 = vsel %vm298_vm2, %v5067_v21, 0.0 }
0x14e1   :  { %5069 = vadd.xlane.f32.xlu0 %v5068_v22 }
0x14e5   :  { %5013 = vadd.xlane.f32.xlu0 %v5012_v24 }
0x156a   :  { %v5070_v29 = vpop.xlane.xlu0 %5069 }
0x156b   :  { %v5071_v30 = vmul.f32 0.03125, %v5070_v29 }
0x156d   :  { %v5072_v34 = vsub.f32 %v5067_v21, %v5071_v30 }
0x156e   :  { %v5014_v17 = vpop.xlane.xlu0 %5013 }
0x156f   :  { %v5018_v35 = vmul.f32 0.03125, %v5014_v17  ;;  %v5073_v37 = vmul.f32 %v5072_v34, %v5072_v34 }
0x1571   :  { %v5020_v33 = vadd.f32 1e-05, %v5018_v35  ;;  %v5074_v42 = vsel %vm298_vm2, %v5073_v37, 0.0 }
0x1572   :  { %5075 = vadd.xlane.f32.xlu0 %v5074_v42 }
0x1573   :  { %6136 = vrsqrt.f32 %v5020_v33 }
0x1580   :  { %v6137_v32 = vpop.eup %6136 }
0x1581   :  { %v5024_v39 = vmul.f32 %v6137_v32, %v5008_v19 }
0x1583   :  { %v5034_v43 = vmul.f32 %v5437_v44, %v5024_v39 }
0x1585   :  { %v5044_v46 = vadd.f32 %v5439_v45, %v5034_v43 }
0x1587   :  { %5965 = vmatprep.mubr.msk.f32.mxu0 %vm298_vm2, %v5044_v46 }
0x1588   :  { %5966 = vmatmul.mubr.msk.f32.vlgmr.msra.gmra.mxu0 %vm298_vm2, %v5045_v47 }
0x15fb   :  { %v5076_v31 = vpop.xlane.xlu0 %5075 }
0x15fc   :  { %v5077_v49 = vmul.f32 0.03125, %v5076_v31 }
0x15fe   :  { %v5078_v36 = vadd.f32 1e-05, %v5077_v49 }
0x1600   :  { %6138 = vrsqrt.f32 %v5078_v36 }
0x160d   :  { %v6139_v50 = vpop.eup %6138 }
0x160e   :  { %v5080_v53 = vmul.f32 %v6139_v50, %v5072_v34 }
0x1610   :  { %v5089_v56 = vmul.f32 %v5443_v52, %v5080_v53 }
0x1612   :  { %v5098_v57 = vadd.f32 %v5445_v54, %v5089_v56 }
0x1614   :  { %5977 = vmatmul.mubr.msk.f32.vlgmr.msra.gmra.mxu1 %vm298_vm2, %v5098_v57 }
0x1648   :  { %v5967_v48 = vpop.f32.mrf.mxu0 }
0x1649   :  { %v5188_v3 = vadd.f32 %v5967_v48, %v5446_v62 }
0x164a   :  { %v5182_v4 = vpop.f32.mrf.mxu0 }
0x164b   :  { %5192 = vst.msk [vmem:[%s7072_s15 + $0x8] sm:$0xf] %vm823_vm4, %v5188_v3  ;;  %v5183_v58 = vadd.f32 %v5446_v62, %v5182_v4 }
0x164d   :  { %5191 = vst.msk [vmem:[%s7072_s15] sm:$0xff] %vm475_vm3, %v5183_v58 }
0x16d4   :  { %v5273_v60 = vpop.f32.mrf.mxu1 }
0x16d5   :  { %v5274_v61 = vadd.f32 %v5446_v62, %v5273_v60 }
0x16d6   :  { %v5978_v1 = vpop.f32.mrf.mxu1 }
0x16d7   :  { %5277 = vst.msk [vmem:[#allocation10] sm:$0xff] %vm475_vm3, %v5274_v61 }
0x16d8   :  { %6234 = shalt.err (!%p6231_p10)
}
0x16d9   :  { %5289 = dma.vmem_to_hbm [thread:$0]  %s5287_s6, 128, %s7073_s16, [#allocation4]  }
0x16da   :  { %6249 = dma.done.wait [#allocation4], 128  }
0x16db   :  { %6250 = vsyncadd [#allocation4], 4294967168 }
0x16dc   :  { %5295 = vsyncpa [#allocation3], 1 }
0x16dd   :  { %5296 = vsyncpa [#allocation6], 1 }
0x16de   :  { %5297 = vsyncpa [#allocation9], 1 }
0x16df   :  { %5298 = vsyncpa [#allocation4], 1 }

</bundles_post_ra>
